<compile_context>
chip_gen: v7x
topology: tpu7x:2x2x1
jax: 0.10.0
libtpu: 0.0.40
codegen_flags: <defaults>
</compile_context>

<pallas_src>
import functools

import numpy as np

import jax
import jax.numpy as jnp
from jax.experimental import pallas as pl
from jax.experimental.pallas import tpu as pltpu


# ----------------------------------------------------------------------------
# Network structure (scaled-down VGGish backbone, structure preserving)
# ----------------------------------------------------------------------------
_CONV_NAMES    = ["conv1", "conv2", "conv3_1", "conv3_2", "conv4_1", "conv4_2"]
_CONV_CHANNELS = [(1, 8), (8, 16), (16, 32), (32, 32), (32, 64), (64, 64)]
_POOL_AFTER    = [True, True, False, True, False, True]
FEAT_LANES     = 128            # lane-dense width of the per-frame feature row


def _layer_cfgs(H0, W0):
    cfgs, H, W = [], H0, W0
    for (cin, cout), pool, name in zip(_CONV_CHANNELS, _POOL_AFTER, _CONV_NAMES):
        cfgs.append(dict(name=name, H=H, W=W, cin=cin, cout=cout, pool=pool))
        if pool:
            H, W = H // 2, W // 2
    return cfgs, (H, W)


# ----------------------------------------------------------------------------
# Pallas kernels
# ----------------------------------------------------------------------------
def _conv_stack_kernel(*refs, pool_flags):
    """Whole VGGish conv stack for one frame.

    refs = [x, (rowshift, banded_w, bias_row[, pool_rowsel, pool_colsel])*6, out]
    x:   (1, H, (W+2)*1)  bf16, zero W-borders.
    out: (1, 1, 128)      bf16, lanes 0..63 = flattened NHWC features, rest 0.
    """
    out_ref = refs[-1]
    it = iter(refs[:-1])
    x_ref = next(it)

    a = x_ref[0]                                    # (H, (W+2)*Cin) bf16
    for pool in pool_flags:
        rs_ref, bw_ref, b_ref = next(it), next(it), next(it)

        # conv3x3 + bias + ReLU, f32 accumulation on the MXU.
        acc = b_ref[...]                            # (1, M) f32, broadcasts
        for dh in range(3):
            shifted = jnp.dot(rs_ref[dh], a,        # row shift (zero fill)
                              preferred_element_type=jnp.float32)
            acc = acc + jnp.dot(shifted.astype(jnp.bfloat16), bw_ref[dh],
                                preferred_element_type=jnp.float32)
        y = jnp.maximum(acc, 0.0).astype(jnp.bfloat16)   # (H, (W+2)*Cout)

        if pool:
            prs_ref, pcs_ref = next(it), next(it)
            # 2x2 maxpool = max over row-selection and column-selection matmuls
            r = jnp.maximum(
                jnp.dot(prs_ref[0], y, preferred_element_type=jnp.float32),
                jnp.dot(prs_ref[1], y, preferred_element_type=jnp.float32),
            ).astype(jnp.bfloat16)
            y = jnp.maximum(
                jnp.dot(r, pcs_ref[0], preferred_element_type=jnp.float32),
                jnp.dot(r, pcs_ref[1], preferred_element_type=jnp.float32),
            ).astype(jnp.bfloat16)
        a = y

    out_ref[0] = a                                  # (1, 128) bf16


def _head_kernel(f_ref, w1_ref, b1_ref, w2_ref, b2_ref, w3_ref, b3_ref,
                 mavg_ref, wc_ref, bc_ref, o_ref):
    """fc1/fc2/fc3 (+ReLU) -> mean over frames (as a matmul) -> classifier."""
    h = jnp.dot(f_ref[...], w1_ref[...], preferred_element_type=jnp.float32)
    h = jnp.maximum(h + b1_ref[...], 0.0).astype(jnp.bfloat16)
    h = jnp.dot(h, w2_ref[...], preferred_element_type=jnp.float32)
    h = jnp.maximum(h + b2_ref[...], 0.0).astype(jnp.bfloat16)
    e = jnp.dot(h, w3_ref[...], preferred_element_type=jnp.float32)
    e = jnp.maximum(e + b3_ref[...], 0.0).astype(jnp.bfloat16)
    m = jnp.dot(mavg_ref[...], e,                   # (B, N) x (N, 128) = mean
                preferred_element_type=jnp.float32).astype(jnp.bfloat16)
    logits = jnp.dot(m, wc_ref[...], preferred_element_type=jnp.float32)
    o_ref[...] = logits + bc_ref[...]               # (B, 128) f32, lane-dense


# ----------------------------------------------------------------------------
# One-time host-side packing of weights into kernel operands
# ----------------------------------------------------------------------------
def pack_conv_operands(params, cfgs):
    ops = []
    n_layers = len(cfgs)
    for li, cfg in enumerate(cfgs):
        H, W, cin, cout = cfg["H"], cfg["W"], cfg["cin"], cfg["cout"]
        wconv = np.asarray(params[f"{cfg['name']}_w"], np.float32)   # HWIO
        bias = np.asarray(params[f"{cfg['name']}_b"], np.float32)
        Wp = W + 2

        # row-shift selectors: (RowShift_dh @ a)[h] = a[h + dh - 1] (zero fill)
        rs = np.zeros((3, H, H), np.float32)
        for dh in range(3):
            for h in range(H):
                src = h + dh - 1
                if 0 <= src < H:
                    rs[dh, h, src] = 1.0

        # banded weights: output lane block q (interior 1..W) gets taps from
        # input lane blocks q-1..q+1; border output columns stay all-zero.
        bw = np.zeros((3, Wp * cin, Wp * cout), np.float32)
        for dh in range(3):
            for q in range(1, W + 1):
                for dw in range(3):
                    p = q - 1 + dw
                    bw[dh, p * cin:(p + 1) * cin,
                       q * cout:(q + 1) * cout] = wconv[dh, dw]

        br = np.zeros((1, Wp * cout), np.float32)
        for q in range(1, W + 1):
            br[0, q * cout:(q + 1) * cout] = bias

        ops += [jnp.asarray(rs, jnp.bfloat16),
                jnp.asarray(bw, jnp.bfloat16),
                jnp.asarray(br, jnp.float32)]

        if cfg["pool"]:
            Ho, Wo = H // 2, W // 2
            last = li == n_layers - 1
            prs = np.zeros((2, Ho, H), np.float32)
            for s in range(2):
                for h2 in range(Ho):
                    prs[s, h2, 2 * h2 + s] = 1.0
            out_lanes = FEAT_LANES if last else (Wo + 2) * cout
            pcs = np.zeros((2, Wp * cout, out_lanes), np.float32)
            eye = np.eye(cout, dtype=np.float32)
            for t in range(2):
                for w2 in range(Wo):
                    src = (1 + 2 * w2 + t) * cout
                    dst = (w2 if last else (1 + w2)) * cout
                    pcs[t, src:src + cout, dst:dst + cout] = eye
            ops += [jnp.asarray(prs, jnp.bfloat16),
                    jnp.asarray(pcs, jnp.bfloat16)]
    return ops


def pack_head_operands(params, *, B, F, flat_dim, hidden, emb_dim, num_classes):
    assert flat_dim <= FEAT_LANES and num_classes <= FEAT_LANES

    def pad2(a, rows, cols):
        out = np.zeros((rows, cols), np.float32)
        a = np.asarray(a, np.float32)
        out[:a.shape[0], :a.shape[1]] = a
        return out

    mavg = np.zeros((B, B * F), np.float32)
    for b in range(B):
        mavg[b, b * F:(b + 1) * F] = 1.0 / F

    return dict(
        w1=jnp.asarray(pad2(params["fc1_w"], FEAT_LANES, hidden), jnp.bfloat16),
        b1=jnp.asarray(np.asarray(params["fc1_b"]).reshape(1, -1), jnp.float32),
        w2=jnp.asarray(params["fc2_w"], jnp.bfloat16),
        b2=jnp.asarray(np.asarray(params["fc2_b"]).reshape(1, -1), jnp.float32),
        w3=jnp.asarray(params["fc3_w"], jnp.bfloat16),
        b3=jnp.asarray(np.asarray(params["fc3_b"]).reshape(1, -1), jnp.float32),
        mavg=jnp.asarray(mavg, jnp.bfloat16),
        wc=jnp.asarray(pad2(params["lin_w"], emb_dim, FEAT_LANES), jnp.bfloat16),
        bc=jnp.asarray(pad2(np.asarray(params["lin_b"]).reshape(1, -1),
                            1, FEAT_LANES), jnp.float32),
    )


# ----------------------------------------------------------------------------
# Forward pass
# ----------------------------------------------------------------------------
def _const_index(ndim):
    return lambda n: (0,) * ndim


def vggish_classifier_forward(x, conv_ops, head_ops, *, num_classes):
    """x: (B, F, 1, H, W) float32 log-mel patches (preprocess=False)."""
    B, F = x.shape[0], x.shape[1]
    H, W = x.shape[3], x.shape[4]
    N = B * F

    # reference: x = x.reshape(-1, 1, H, W); with C=1 NHWC is the same data.
    # Single cheap pad -> zero W-borders of the packed-lane layout.
    xp = jnp.pad(x.reshape(N, H, W).astype(jnp.bfloat16),
                 ((0, 0), (0, 0), (1, 1)))

    kernel = functools.partial(_conv_stack_kernel,
                               pool_flags=tuple(_POOL_AFTER))
    in_specs = [pl.BlockSpec((1, H, W + 2), lambda n: (n, 0, 0))]
    for p in conv_ops:
        in_specs.append(pl.BlockSpec(p.shape, _const_index(p.ndim)))

    feats = pl.pallas_call(
        kernel,
        out_shape=jax.ShapeDtypeStruct((N, 1, FEAT_LANES), jnp.bfloat16),
        grid=(N,),
        in_specs=in_specs,
        out_specs=pl.BlockSpec((1, 1, FEAT_LANES), lambda n: (n, 0, 0)),
        compiler_params=pltpu.CompilerParams(
            dimension_semantics=("parallel",)),
    )(xp, *conv_ops)

    feats = feats.reshape(N, FEAT_LANES)

    logits_pad = pl.pallas_call(
        _head_kernel,
        out_shape=jax.ShapeDtypeStruct((B, FEAT_LANES), jnp.float32),
    )(feats, head_ops["w1"], head_ops["b1"], head_ops["w2"], head_ops["b2"],
      head_ops["w3"], head_ops["b3"], head_ops["mavg"],
      head_ops["wc"], head_ops["bc"])

    logits = logits_pad[:, :num_classes]
    # TODO(synk): loss (CrossEntropy / BCEWithLogits) not computed; forward is
    # exercised with y=None, matching the reference's (None, logits) return.
    return None, logits


# ----------------------------------------------------------------------------
# Deterministic synthetic parameters (no checkpoint loaded)
# ----------------------------------------------------------------------------
def init_params(key, *, num_classes, flat_dim, hidden, emb_dim=128):
    params = {}
    for name, (cin, cout) in zip(_CONV_NAMES, _CONV_CHANNELS):
        key, kw, kb = jax.random.split(key, 3)
        scale = 1.0 / jnp.sqrt(9.0 * cin)
        params[f"{name}_w"] = scale * jax.random.normal(
            kw, (3, 3, cin, cout), jnp.float32)                # HWIO
        params[f"{name}_b"] = 0.01 * jax.random.normal(kb, (cout,), jnp.float32)

    fc_cfg = [("fc1", flat_dim, hidden), ("fc2", hidden, hidden),
              ("fc3", hidden, emb_dim), ("lin", emb_dim, num_classes)]
    for name, fin, fout in fc_cfg:
        key, kw, kb = jax.random.split(key, 3)
        scale = 1.0 / jnp.sqrt(float(fin))
        params[f"{name}_w"] = scale * jax.random.normal(
            kw, (fin, fout), jnp.float32)                       # (in, out)
        params[f"{name}_b"] = 0.01 * jax.random.normal(kb, (fout,), jnp.float32)
    return params


if __name__ == "__main__":
    key = jax.random.PRNGKey(0)
    kx, kp = jax.random.split(key)

    # (batch, frames, 1, H, W) log-mel patches; small shapes.
    B, F, H, W = 2, 2, 16, 16
    num_classes = 10
    hidden, emb_dim = 128, 128
    x = jax.random.normal(kx, (B, F, 1, H, W), jnp.float32)

    cfgs, (Hf, Wf) = _layer_cfgs(H, W)
    assert Hf == 1 and Wf * _CONV_CHANNELS[-1][1] <= FEAT_LANES
    flat_dim = Hf * Wf * _CONV_CHANNELS[-1][1]        # 64

    params = init_params(kp, num_classes=num_classes, flat_dim=flat_dim,
                         hidden=hidden, emb_dim=emb_dim)
    conv_ops = pack_conv_operands(params, cfgs)
    head_ops = pack_head_operands(params, B=B, F=F, flat_dim=flat_dim,
                                  hidden=hidden, emb_dim=emb_dim,
                                  num_classes=num_classes)

    loss, logits = vggish_classifier_forward(x, conv_ops, head_ops,
                                             num_classes=num_classes)
    logits = jax.block_until_ready(logits)
    assert loss is None
    assert logits.shape == (B, num_classes)
    assert logits.dtype == jnp.float32
    print("KERNEL_OK")
</pallas_src>

<mosaic_0001>
module attributes {stable_mosaic.version = 11 : i64} {
  func.func @_conv_stack_kernel(%arg0: i32, %arg1: memref<1x16x18xbf16, #tpu.memory_space<vmem>>, %arg2: memref<3x16x16xbf16, #tpu.memory_space<vmem>>, %arg3: memref<3x18x144xbf16, #tpu.memory_space<vmem>>, %arg4: memref<1x144xf32, #tpu.memory_space<vmem>>, %arg5: memref<2x8x16xbf16, #tpu.memory_space<vmem>>, %arg6: memref<2x144x80xbf16, #tpu.memory_space<vmem>>, %arg7: memref<3x8x8xbf16, #tpu.memory_space<vmem>>, %arg8: memref<3x80x160xbf16, #tpu.memory_space<vmem>>, %arg9: memref<1x160xf32, #tpu.memory_space<vmem>>, %arg10: memref<2x4x8xbf16, #tpu.memory_space<vmem>>, %arg11: memref<2x160x96xbf16, #tpu.memory_space<vmem>>, %arg12: memref<3x4x4xbf16, #tpu.memory_space<vmem>>, %arg13: memref<3x96x192xbf16, #tpu.memory_space<vmem>>, %arg14: memref<1x192xf32, #tpu.memory_space<vmem>>, %arg15: memref<3x4x4xbf16, #tpu.memory_space<vmem>>, %arg16: memref<3x192x192xbf16, #tpu.memory_space<vmem>>, %arg17: memref<1x192xf32, #tpu.memory_space<vmem>>, %arg18: memref<2x2x4xbf16, #tpu.memory_space<vmem>>, %arg19: memref<2x192x128xbf16, #tpu.memory_space<vmem>>, %arg20: memref<3x2x2xbf16, #tpu.memory_space<vmem>>, %arg21: memref<3x128x256xbf16, #tpu.memory_space<vmem>>, %arg22: memref<1x256xf32, #tpu.memory_space<vmem>>, %arg23: memref<3x2x2xbf16, #tpu.memory_space<vmem>>, %arg24: memref<3x256x256xbf16, #tpu.memory_space<vmem>>, %arg25: memref<1x256xf32, #tpu.memory_space<vmem>>, %arg26: memref<2x1x2xbf16, #tpu.memory_space<vmem>>, %arg27: memref<2x256x128xbf16, #tpu.memory_space<vmem>>, %arg28: memref<1x1x128xbf16, #tpu.memory_space<vmem>>) attributes {dimension_semantics = [#tpu.dimension_semantics<parallel>], iteration_bounds = array<i64: 4>, scalar_prefetch = 0 : i64, scratch_operands = 0 : i64, tpu.core_type = #tpu.core_type<tc>, window_params = [{transform_indices = @transform_0, window_bounds = array<i64: 1, 16, 18>}, {pipeline_mode = #tpu.pipeline_mode<synchronous>, transform_indices = @transform_1, window_bounds = array<i64: 3, 16, 16>}, {pipeline_mode = #tpu.pipeline_mode<synchronous>, transform_indices = @transform_2, window_bounds = array<i64: 3, 18, 144>}, {pipeline_mode = #tpu.pipeline_mode<synchronous>, transform_indices = @transform_3, window_bounds = array<i64: 1, 144>}, {pipeline_mode = #tpu.pipeline_mode<synchronous>, transform_indices = @transform_4, window_bounds = array<i64: 2, 8, 16>}, {pipeline_mode = #tpu.pipeline_mode<synchronous>, transform_indices = @transform_5, window_bounds = array<i64: 2, 144, 80>}, {pipeline_mode = #tpu.pipeline_mode<synchronous>, transform_indices = @transform_6, window_bounds = array<i64: 3, 8, 8>}, {pipeline_mode = #tpu.pipeline_mode<synchronous>, transform_indices = @transform_7, window_bounds = array<i64: 3, 80, 160>}, {pipeline_mode = #tpu.pipeline_mode<synchronous>, transform_indices = @transform_8, window_bounds = array<i64: 1, 160>}, {pipeline_mode = #tpu.pipeline_mode<synchronous>, transform_indices = @transform_9, window_bounds = array<i64: 2, 4, 8>}, {pipeline_mode = #tpu.pipeline_mode<synchronous>, transform_indices = @transform_10, window_bounds = array<i64: 2, 160, 96>}, {pipeline_mode = #tpu.pipeline_mode<synchronous>, transform_indices = @transform_11, window_bounds = array<i64: 3, 4, 4>}, {pipeline_mode = #tpu.pipeline_mode<synchronous>, transform_indices = @transform_12, window_bounds = array<i64: 3, 96, 192>}, {pipeline_mode = #tpu.pipeline_mode<synchronous>, transform_indices = @transform_13, window_bounds = array<i64: 1, 192>}, {pipeline_mode = #tpu.pipeline_mode<synchronous>, transform_indices = @transform_14, window_bounds = array<i64: 3, 4, 4>}, {pipeline_mode = #tpu.pipeline_mode<synchronous>, transform_indices = @transform_15, window_bounds = array<i64: 3, 192, 192>}, {pipeline_mode = #tpu.pipeline_mode<synchronous>, transform_indices = @transform_16, window_bounds = array<i64: 1, 192>}, {pipeline_mode = #tpu.pipeline_mode<synchronous>, transform_indices = @transform_17, window_bounds = array<i64: 2, 2, 4>}, {pipeline_mode = #tpu.pipeline_mode<synchronous>, transform_indices = @transform_18, window_bounds = array<i64: 2, 192, 128>}, {pipeline_mode = #tpu.pipeline_mode<synchronous>, transform_indices = @transform_19, window_bounds = array<i64: 3, 2, 2>}, {pipeline_mode = #tpu.pipeline_mode<synchronous>, transform_indices = @transform_20, window_bounds = array<i64: 3, 128, 256>}, {pipeline_mode = #tpu.pipeline_mode<synchronous>, transform_indices = @transform_21, window_bounds = array<i64: 1, 256>}, {pipeline_mode = #tpu.pipeline_mode<synchronous>, transform_indices = @transform_22, window_bounds = array<i64: 3, 2, 2>}, {pipeline_mode = #tpu.pipeline_mode<synchronous>, transform_indices = @transform_23, window_bounds = array<i64: 3, 256, 256>}, {pipeline_mode = #tpu.pipeline_mode<synchronous>, transform_indices = @transform_24, window_bounds = array<i64: 1, 256>}, {pipeline_mode = #tpu.pipeline_mode<synchronous>, transform_indices = @transform_25, window_bounds = array<i64: 2, 1, 2>}, {pipeline_mode = #tpu.pipeline_mode<synchronous>, transform_indices = @transform_26, window_bounds = array<i64: 2, 256, 128>}, {transform_indices = @transform_27, window_bounds = array<i64: 1, 1, 128>}]} {
    %c0 = arith.constant 0 : index
    %c0_0 = arith.constant 0 : index
    %c0_1 = arith.constant 0 : index
    %0 = vector.load %arg1[%c0, %c0_0, %c0_1] : memref<1x16x18xbf16, #tpu.memory_space<vmem>>, vector<1x16x18xbf16>
    %1 = vector.shape_cast %0 : vector<1x16x18xbf16> to vector<16x18xbf16>
    %c0_2 = arith.constant 0 : index
    %c0_3 = arith.constant 0 : index
    %2 = vector.load %arg4[%c0_2, %c0_3] : memref<1x144xf32, #tpu.memory_space<vmem>>, vector<1x144xf32>
    %c0_4 = arith.constant 0 : index
    %c0_5 = arith.constant 0 : index
    %c0_6 = arith.constant 0 : index
    %3 = vector.load %arg2[%c0_4, %c0_5, %c0_6] : memref<3x16x16xbf16, #tpu.memory_space<vmem>>, vector<1x16x16xbf16>
    %4 = vector.shape_cast %3 : vector<1x16x16xbf16> to vector<16x16xbf16>
    %cst = arith.constant dense<0.000000e+00> : vector<16x18xf32>
    %5 = tpu.matmul %4, %1, %cst {dimension_numbers = #tpu.dot_dimension_numbers<[1], [0], [0], [1], [0, 0, 1, 1], [], []>} : vector<16x16xbf16>, vector<16x18xbf16>, vector<16x18xf32> -> vector<16x18xf32>
    %6 = arith.truncf %5 : vector<16x18xf32> to vector<16x18xbf16>
    %c0_7 = arith.constant 0 : index
    %c0_8 = arith.constant 0 : index
    %c0_9 = arith.constant 0 : index
    %7 = vector.load %arg3[%c0_7, %c0_8, %c0_9] : memref<3x18x144xbf16, #tpu.memory_space<vmem>>, vector<1x18x144xbf16>
    %8 = vector.shape_cast %7 : vector<1x18x144xbf16> to vector<18x144xbf16>
    %cst_10 = arith.constant dense<0.000000e+00> : vector<16x144xf32>
    %9 = tpu.matmul %6, %8, %cst_10 {dimension_numbers = #tpu.dot_dimension_numbers<[1], [0], [0], [1], [0, 0, 1, 1], [], []>} : vector<16x18xbf16>, vector<18x144xbf16>, vector<16x144xf32> -> vector<16x144xf32>
    %10 = vector.broadcast %2 : vector<1x144xf32> to vector<16x144xf32>
    %11 = arith.addf %10, %9 : vector<16x144xf32>
    %c1 = arith.constant 1 : index
    %c0_11 = arith.constant 0 : index
    %c0_12 = arith.constant 0 : index
    %12 = vector.load %arg2[%c1, %c0_11, %c0_12] : memref<3x16x16xbf16, #tpu.memory_space<vmem>>, vector<1x16x16xbf16>
    %13 = vector.shape_cast %12 : vector<1x16x16xbf16> to vector<16x16xbf16>
    %cst_13 = arith.constant dense<0.000000e+00> : vector<16x18xf32>
    %14 = tpu.matmul %13, %1, %cst_13 {dimension_numbers = #tpu.dot_dimension_numbers<[1], [0], [0], [1], [0, 0, 1, 1], [], []>} : vector<16x16xbf16>, vector<16x18xbf16>, vector<16x18xf32> -> vector<16x18xf32>
    %15 = arith.truncf %14 : vector<16x18xf32> to vector<16x18xbf16>
    %c1_14 = arith.constant 1 : index
    %c0_15 = arith.constant 0 : index
    %c0_16 = arith.constant 0 : index
    %16 = vector.load %arg3[%c1_14, %c0_15, %c0_16] : memref<3x18x144xbf16, #tpu.memory_space<vmem>>, vector<1x18x144xbf16>
    %17 = vector.shape_cast %16 : vector<1x18x144xbf16> to vector<18x144xbf16>
    %cst_17 = arith.constant dense<0.000000e+00> : vector<16x144xf32>
    %18 = tpu.matmul %15, %17, %cst_17 {dimension_numbers = #tpu.dot_dimension_numbers<[1], [0], [0], [1], [0, 0, 1, 1], [], []>} : vector<16x18xbf16>, vector<18x144xbf16>, vector<16x144xf32> -> vector<16x144xf32>
    %19 = arith.addf %11, %18 : vector<16x144xf32>
    %c2 = arith.constant 2 : index
    %c0_18 = arith.constant 0 : index
    %c0_19 = arith.constant 0 : index
    %20 = vector.load %arg2[%c2, %c0_18, %c0_19] : memref<3x16x16xbf16, #tpu.memory_space<vmem>>, vector<1x16x16xbf16>
    %21 = vector.shape_cast %20 : vector<1x16x16xbf16> to vector<16x16xbf16>
    %cst_20 = arith.constant dense<0.000000e+00> : vector<16x18xf32>
    %22 = tpu.matmul %21, %1, %cst_20 {dimension_numbers = #tpu.dot_dimension_numbers<[1], [0], [0], [1], [0, 0, 1, 1], [], []>} : vector<16x16xbf16>, vector<16x18xbf16>, vector<16x18xf32> -> vector<16x18xf32>
    %23 = arith.truncf %22 : vector<16x18xf32> to vector<16x18xbf16>
    %c2_21 = arith.constant 2 : index
    %c0_22 = arith.constant 0 : index
    %c0_23 = arith.constant 0 : index
    %24 = vector.load %arg3[%c2_21, %c0_22, %c0_23] : memref<3x18x144xbf16, #tpu.memory_space<vmem>>, vector<1x18x144xbf16>
    %25 = vector.shape_cast %24 : vector<1x18x144xbf16> to vector<18x144xbf16>
    %cst_24 = arith.constant dense<0.000000e+00> : vector<16x144xf32>
    %26 = tpu.matmul %23, %25, %cst_24 {dimension_numbers = #tpu.dot_dimension_numbers<[1], [0], [0], [1], [0, 0, 1, 1], [], []>} : vector<16x18xbf16>, vector<18x144xbf16>, vector<16x144xf32> -> vector<16x144xf32>
    %27 = arith.addf %19, %26 : vector<16x144xf32>
    %cst_25 = arith.constant 0.000000e+00 : f32
    %28 = vector.broadcast %cst_25 : f32 to vector<16x144xf32>
    %29 = arith.maximumf %27, %28 : vector<16x144xf32>
    %30 = arith.truncf %29 : vector<16x144xf32> to vector<16x144xbf16>
    %c0_26 = arith.constant 0 : index
    %c0_27 = arith.constant 0 : index
    %c0_28 = arith.constant 0 : index
    %31 = vector.load %arg5[%c0_26, %c0_27, %c0_28] : memref<2x8x16xbf16, #tpu.memory_space<vmem>>, vector<1x8x16xbf16>
    %32 = vector.shape_cast %31 : vector<1x8x16xbf16> to vector<8x16xbf16>
    %cst_29 = arith.constant dense<0.000000e+00> : vector<8x144xf32>
    %33 = tpu.matmul %32, %30, %cst_29 {dimension_numbers = #tpu.dot_dimension_numbers<[1], [0], [0], [1], [0, 0, 1, 1], [], []>} : vector<8x16xbf16>, vector<16x144xbf16>, vector<8x144xf32> -> vector<8x144xf32>
    %c1_30 = arith.constant 1 : index
    %c0_31 = arith.constant 0 : index
    %c0_32 = arith.constant 0 : index
    %34 = vector.load %arg5[%c1_30, %c0_31, %c0_32] : memref<2x8x16xbf16, #tpu.memory_space<vmem>>, vector<1x8x16xbf16>
    %35 = vector.shape_cast %34 : vector<1x8x16xbf16> to vector<8x16xbf16>
    %cst_33 = arith.constant dense<0.000000e+00> : vector<8x144xf32>
    %36 = tpu.matmul %35, %30, %cst_33 {dimension_numbers = #tpu.dot_dimension_numbers<[1], [0], [0], [1], [0, 0, 1, 1], [], []>} : vector<8x16xbf16>, vector<16x144xbf16>, vector<8x144xf32> -> vector<8x144xf32>
    %37 = arith.maximumf %33, %36 : vector<8x144xf32>
    %38 = arith.truncf %37 : vector<8x144xf32> to vector<8x144xbf16>
    %c0_34 = arith.constant 0 : index
    %c0_35 = arith.constant 0 : index
    %c0_36 = arith.constant 0 : index
    %39 = vector.load %arg6[%c0_34, %c0_35, %c0_36] : memref<2x144x80xbf16, #tpu.memory_space<vmem>>, vector<1x144x80xbf16>
    %40 = vector.shape_cast %39 : vector<1x144x80xbf16> to vector<144x80xbf16>
    %cst_37 = arith.constant dense<0.000000e+00> : vector<8x80xf32>
    %41 = tpu.matmul %38, %40, %cst_37 {dimension_numbers = #tpu.dot_dimension_numbers<[1], [0], [0], [1], [0, 0, 1, 1], [], []>} : vector<8x144xbf16>, vector<144x80xbf16>, vector<8x80xf32> -> vector<8x80xf32>
    %c1_38 = arith.constant 1 : index
    %c0_39 = arith.constant 0 : index
    %c0_40 = arith.constant 0 : index
    %42 = vector.load %arg6[%c1_38, %c0_39, %c0_40] : memref<2x144x80xbf16, #tpu.memory_space<vmem>>, vector<1x144x80xbf16>
    %43 = vector.shape_cast %42 : vector<1x144x80xbf16> to vector<144x80xbf16>
    %cst_41 = arith.constant dense<0.000000e+00> : vector<8x80xf32>
    %44 = tpu.matmul %38, %43, %cst_41 {dimension_numbers = #tpu.dot_dimension_numbers<[1], [0], [0], [1], [0, 0, 1, 1], [], []>} : vector<8x144xbf16>, vector<144x80xbf16>, vector<8x80xf32> -> vector<8x80xf32>
    %45 = arith.maximumf %41, %44 : vector<8x80xf32>
    %46 = arith.truncf %45 : vector<8x80xf32> to vector<8x80xbf16>
    %c0_42 = arith.constant 0 : index
    %c0_43 = arith.constant 0 : index
    %47 = vector.load %arg9[%c0_42, %c0_43] : memref<1x160xf32, #tpu.memory_space<vmem>>, vector<1x160xf32>
    %c0_44 = arith.constant 0 : index
    %c0_45 = arith.constant 0 : index
    %c0_46 = arith.constant 0 : index
    %48 = vector.load %arg7[%c0_44, %c0_45, %c0_46] : memref<3x8x8xbf16, #tpu.memory_space<vmem>>, vector<1x8x8xbf16>
    %49 = vector.shape_cast %48 : vector<1x8x8xbf16> to vector<8x8xbf16>
    %cst_47 = arith.constant dense<0.000000e+00> : vector<8x80xf32>
    %50 = tpu.matmul %49, %46, %cst_47 {dimension_numbers = #tpu.dot_dimension_numbers<[1], [0], [0], [1], [0, 0, 1, 1], [], []>} : vector<8x8xbf16>, vector<8x80xbf16>, vector<8x80xf32> -> vector<8x80xf32>
    %51 = arith.truncf %50 : vector<8x80xf32> to vector<8x80xbf16>
    %c0_48 = arith.constant 0 : index
    %c0_49 = arith.constant 0 : index
    %c0_50 = arith.constant 0 : index
    %52 = vector.load %arg8[%c0_48, %c0_49, %c0_50] : memref<3x80x160xbf16, #tpu.memory_space<vmem>>, vector<1x80x160xbf16>
    %53 = vector.shape_cast %52 : vector<1x80x160xbf16> to vector<80x160xbf16>
    %cst_51 = arith.constant dense<0.000000e+00> : vector<8x160xf32>
    %54 = tpu.matmul %51, %53, %cst_51 {dimension_numbers = #tpu.dot_dimension_numbers<[1], [0], [0], [1], [0, 0, 1, 1], [], []>} : vector<8x80xbf16>, vector<80x160xbf16>, vector<8x160xf32> -> vector<8x160xf32>
    %55 = vector.broadcast %47 : vector<1x160xf32> to vector<8x160xf32>
    %56 = arith.addf %55, %54 : vector<8x160xf32>
    %c1_52 = arith.constant 1 : index
    %c0_53 = arith.constant 0 : index
    %c0_54 = arith.constant 0 : index
    %57 = vector.load %arg7[%c1_52, %c0_53, %c0_54] : memref<3x8x8xbf16, #tpu.memory_space<vmem>>, vector<1x8x8xbf16>
    %58 = vector.shape_cast %57 : vector<1x8x8xbf16> to vector<8x8xbf16>
    %cst_55 = arith.constant dense<0.000000e+00> : vector<8x80xf32>
    %59 = tpu.matmul %58, %46, %cst_55 {dimension_numbers = #tpu.dot_dimension_numbers<[1], [0], [0], [1], [0, 0, 1, 1], [], []>} : vector<8x8xbf16>, vector<8x80xbf16>, vector<8x80xf32> -> vector<8x80xf32>
    %60 = arith.truncf %59 : vector<8x80xf32> to vector<8x80xbf16>
    %c1_56 = arith.constant 1 : index
    %c0_57 = arith.constant 0 : index
    %c0_58 = arith.constant 0 : index
    %61 = vector.load %arg8[%c1_56, %c0_57, %c0_58] : memref<3x80x160xbf16, #tpu.memory_space<vmem>>, vector<1x80x160xbf16>
    %62 = vector.shape_cast %61 : vector<1x80x160xbf16> to vector<80x160xbf16>
    %cst_59 = arith.constant dense<0.000000e+00> : vector<8x160xf32>
    %63 = tpu.matmul %60, %62, %cst_59 {dimension_numbers = #tpu.dot_dimension_numbers<[1], [0], [0], [1], [0, 0, 1, 1], [], []>} : vector<8x80xbf16>, vector<80x160xbf16>, vector<8x160xf32> -> vector<8x160xf32>
    %64 = arith.addf %56, %63 : vector<8x160xf32>
    %c2_60 = arith.constant 2 : index
    %c0_61 = arith.constant 0 : index
    %c0_62 = arith.constant 0 : index
    %65 = vector.load %arg7[%c2_60, %c0_61, %c0_62] : memref<3x8x8xbf16, #tpu.memory_space<vmem>>, vector<1x8x8xbf16>
    %66 = vector.shape_cast %65 : vector<1x8x8xbf16> to vector<8x8xbf16>
    %cst_63 = arith.constant dense<0.000000e+00> : vector<8x80xf32>
    %67 = tpu.matmul %66, %46, %cst_63 {dimension_numbers = #tpu.dot_dimension_numbers<[1], [0], [0], [1], [0, 0, 1, 1], [], []>} : vector<8x8xbf16>, vector<8x80xbf16>, vector<8x80xf32> -> vector<8x80xf32>
    %68 = arith.truncf %67 : vector<8x80xf32> to vector<8x80xbf16>
    %c2_64 = arith.constant 2 : index
    %c0_65 = arith.constant 0 : index
    %c0_66 = arith.constant 0 : index
    %69 = vector.load %arg8[%c2_64, %c0_65, %c0_66] : memref<3x80x160xbf16, #tpu.memory_space<vmem>>, vector<1x80x160xbf16>
    %70 = vector.shape_cast %69 : vector<1x80x160xbf16> to vector<80x160xbf16>
    %cst_67 = arith.constant dense<0.000000e+00> : vector<8x160xf32>
    %71 = tpu.matmul %68, %70, %cst_67 {dimension_numbers = #tpu.dot_dimension_numbers<[1], [0], [0], [1], [0, 0, 1, 1], [], []>} : vector<8x80xbf16>, vector<80x160xbf16>, vector<8x160xf32> -> vector<8x160xf32>
    %72 = arith.addf %64, %71 : vector<8x160xf32>
    %cst_68 = arith.constant 0.000000e+00 : f32
    %73 = vector.broadcast %cst_68 : f32 to vector<8x160xf32>
    %74 = arith.maximumf %72, %73 : vector<8x160xf32>
    %75 = arith.truncf %74 : vector<8x160xf32> to vector<8x160xbf16>
    %c0_69 = arith.constant 0 : index
    %c0_70 = arith.constant 0 : index
    %c0_71 = arith.constant 0 : index
    %76 = vector.load %arg10[%c0_69, %c0_70, %c0_71] : memref<2x4x8xbf16, #tpu.memory_space<vmem>>, vector<1x4x8xbf16>
    %77 = vector.shape_cast %76 : vector<1x4x8xbf16> to vector<4x8xbf16>
    %cst_72 = arith.constant dense<0.000000e+00> : vector<4x160xf32>
    %78 = tpu.matmul %77, %75, %cst_72 {dimension_numbers = #tpu.dot_dimension_numbers<[1], [0], [0], [1], [0, 0, 1, 1], [], []>} : vector<4x8xbf16>, vector<8x160xbf16>, vector<4x160xf32> -> vector<4x160xf32>
    %c1_73 = arith.constant 1 : index
    %c0_74 = arith.constant 0 : index
    %c0_75 = arith.constant 0 : index
    %79 = vector.load %arg10[%c1_73, %c0_74, %c0_75] : memref<2x4x8xbf16, #tpu.memory_space<vmem>>, vector<1x4x8xbf16>
    %80 = vector.shape_cast %79 : vector<1x4x8xbf16> to vector<4x8xbf16>
    %cst_76 = arith.constant dense<0.000000e+00> : vector<4x160xf32>
    %81 = tpu.matmul %80, %75, %cst_76 {dimension_numbers = #tpu.dot_dimension_numbers<[1], [0], [0], [1], [0, 0, 1, 1], [], []>} : vector<4x8xbf16>, vector<8x160xbf16>, vector<4x160xf32> -> vector<4x160xf32>
    %82 = arith.maximumf %78, %81 : vector<4x160xf32>
    %83 = arith.truncf %82 : vector<4x160xf32> to vector<4x160xbf16>
    %c0_77 = arith.constant 0 : index
    %c0_78 = arith.constant 0 : index
    %c0_79 = arith.constant 0 : index
    %84 = vector.load %arg11[%c0_77, %c0_78, %c0_79] : memref<2x160x96xbf16, #tpu.memory_space<vmem>>, vector<1x160x96xbf16>
    %85 = vector.shape_cast %84 : vector<1x160x96xbf16> to vector<160x96xbf16>
    %cst_80 = arith.constant dense<0.000000e+00> : vector<4x96xf32>
    %86 = tpu.matmul %83, %85, %cst_80 {dimension_numbers = #tpu.dot_dimension_numbers<[1], [0], [0], [1], [0, 0, 1, 1], [], []>} : vector<4x160xbf16>, vector<160x96xbf16>, vector<4x96xf32> -> vector<4x96xf32>
    %c1_81 = arith.constant 1 : index
    %c0_82 = arith.constant 0 : index
    %c0_83 = arith.constant 0 : index
    %87 = vector.load %arg11[%c1_81, %c0_82, %c0_83] : memref<2x160x96xbf16, #tpu.memory_space<vmem>>, vector<1x160x96xbf16>
    %88 = vector.shape_cast %87 : vector<1x160x96xbf16> to vector<160x96xbf16>
    %cst_84 = arith.constant dense<0.000000e+00> : vector<4x96xf32>
    %89 = tpu.matmul %83, %88, %cst_84 {dimension_numbers = #tpu.dot_dimension_numbers<[1], [0], [0], [1], [0, 0, 1, 1], [], []>} : vector<4x160xbf16>, vector<160x96xbf16>, vector<4x96xf32> -> vector<4x96xf32>
    %90 = arith.maximumf %86, %89 : vector<4x96xf32>
    %91 = arith.truncf %90 : vector<4x96xf32> to vector<4x96xbf16>
    %c0_85 = arith.constant 0 : index
    %c0_86 = arith.constant 0 : index
    %92 = vector.load %arg14[%c0_85, %c0_86] : memref<1x192xf32, #tpu.memory_space<vmem>>, vector<1x192xf32>
    %c0_87 = arith.constant 0 : index
    %c0_88 = arith.constant 0 : index
    %c0_89 = arith.constant 0 : index
    %93 = vector.load %arg12[%c0_87, %c0_88, %c0_89] : memref<3x4x4xbf16, #tpu.memory_space<vmem>>, vector<1x4x4xbf16>
    %94 = vector.shape_cast %93 : vector<1x4x4xbf16> to vector<4x4xbf16>
    %cst_90 = arith.constant dense<0.000000e+00> : vector<4x96xf32>
    %95 = tpu.matmul %94, %91, %cst_90 {dimension_numbers = #tpu.dot_dimension_numbers<[1], [0], [0], [1], [0, 0, 1, 1], [], []>} : vector<4x4xbf16>, vector<4x96xbf16>, vector<4x96xf32> -> vector<4x96xf32>
    %96 = arith.truncf %95 : vector<4x96xf32> to vector<4x96xbf16>
    %c0_91 = arith.constant 0 : index
    %c0_92 = arith.constant 0 : index
    %c0_93 = arith.constant 0 : index
    %97 = vector.load %arg13[%c0_91, %c0_92, %c0_93] : memref<3x96x192xbf16, #tpu.memory_space<vmem>>, vector<1x96x192xbf16>
    %98 = vector.shape_cast %97 : vector<1x96x192xbf16> to vector<96x192xbf16>
    %cst_94 = arith.constant dense<0.000000e+00> : vector<4x192xf32>
    %99 = tpu.matmul %96, %98, %cst_94 {dimension_numbers = #tpu.dot_dimension_numbers<[1], [0], [0], [1], [0, 0, 1, 1], [], []>} : vector<4x96xbf16>, vector<96x192xbf16>, vector<4x192xf32> -> vector<4x192xf32>
    %100 = vector.broadcast %92 : vector<1x192xf32> to vector<4x192xf32>
    %101 = arith.addf %100, %99 : vector<4x192xf32>
    %c1_95 = arith.constant 1 : index
    %c0_96 = arith.constant 0 : index
    %c0_97 = arith.constant 0 : index
    %102 = vector.load %arg12[%c1_95, %c0_96, %c0_97] : memref<3x4x4xbf16, #tpu.memory_space<vmem>>, vector<1x4x4xbf16>
    %103 = vector.shape_cast %102 : vector<1x4x4xbf16> to vector<4x4xbf16>
    %cst_98 = arith.constant dense<0.000000e+00> : vector<4x96xf32>
    %104 = tpu.matmul %103, %91, %cst_98 {dimension_numbers = #tpu.dot_dimension_numbers<[1], [0], [0], [1], [0, 0, 1, 1], [], []>} : vector<4x4xbf16>, vector<4x96xbf16>, vector<4x96xf32> -> vector<4x96xf32>
    %105 = arith.truncf %104 : vector<4x96xf32> to vector<4x96xbf16>
    %c1_99 = arith.constant 1 : index
    %c0_100 = arith.constant 0 : index
    %c0_101 = arith.constant 0 : index
    %106 = vector.load %arg13[%c1_99, %c0_100, %c0_101] : memref<3x96x192xbf16, #tpu.memory_space<vmem>>, vector<1x96x192xbf16>
    %107 = vector.shape_cast %106 : vector<1x96x192xbf16> to vector<96x192xbf16>
    %cst_102 = arith.constant dense<0.000000e+00> : vector<4x192xf32>
    %108 = tpu.matmul %105, %107, %cst_102 {dimension_numbers = #tpu.dot_dimension_numbers<[1], [0], [0], [1], [0, 0, 1, 1], [], []>} : vector<4x96xbf16>, vector<96x192xbf16>, vector<4x192xf32> -> vector<4x192xf32>
    %109 = arith.addf %101, %108 : vector<4x192xf32>
    %c2_103 = arith.constant 2 : index
    %c0_104 = arith.constant 0 : index
    %c0_105 = arith.constant 0 : index
    %110 = vector.load %arg12[%c2_103, %c0_104, %c0_105] : memref<3x4x4xbf16, #tpu.memory_space<vmem>>, vector<1x4x4xbf16>
    %111 = vector.shape_cast %110 : vector<1x4x4xbf16> to vector<4x4xbf16>
    %cst_106 = arith.constant dense<0.000000e+00> : vector<4x96xf32>
    %112 = tpu.matmul %111, %91, %cst_106 {dimension_numbers = #tpu.dot_dimension_numbers<[1], [0], [0], [1], [0, 0, 1, 1], [], []>} : vector<4x4xbf16>, vector<4x96xbf16>, vector<4x96xf32> -> vector<4x96xf32>
    %113 = arith.truncf %112 : vector<4x96xf32> to vector<4x96xbf16>
    %c2_107 = arith.constant 2 : index
    %c0_108 = arith.constant 0 : index
    %c0_109 = arith.constant 0 : index
    %114 = vector.load %arg13[%c2_107, %c0_108, %c0_109] : memref<3x96x192xbf16, #tpu.memory_space<vmem>>, vector<1x96x192xbf16>
    %115 = vector.shape_cast %114 : vector<1x96x192xbf16> to vector<96x192xbf16>
    %cst_110 = arith.constant dense<0.000000e+00> : vector<4x192xf32>
    %116 = tpu.matmul %113, %115, %cst_110 {dimension_numbers = #tpu.dot_dimension_numbers<[1], [0], [0], [1], [0, 0, 1, 1], [], []>} : vector<4x96xbf16>, vector<96x192xbf16>, vector<4x192xf32> -> vector<4x192xf32>
    %117 = arith.addf %109, %116 : vector<4x192xf32>
    %cst_111 = arith.constant 0.000000e+00 : f32
    %118 = vector.broadcast %cst_111 : f32 to vector<4x192xf32>
    %119 = arith.maximumf %117, %118 : vector<4x192xf32>
    %120 = arith.truncf %119 : vector<4x192xf32> to vector<4x192xbf16>
    %c0_112 = arith.constant 0 : index
    %c0_113 = arith.constant 0 : index
    %121 = vector.load %arg17[%c0_112, %c0_113] : memref<1x192xf32, #tpu.memory_space<vmem>>, vector<1x192xf32>
    %c0_114 = arith.constant 0 : index
    %c0_115 = arith.constant 0 : index
    %c0_116 = arith.constant 0 : index
    %122 = vector.load %arg15[%c0_114, %c0_115, %c0_116] : memref<3x4x4xbf16, #tpu.memory_space<vmem>>, vector<1x4x4xbf16>
    %123 = vector.shape_cast %122 : vector<1x4x4xbf16> to vector<4x4xbf16>
    %cst_117 = arith.constant dense<0.000000e+00> : vector<4x192xf32>
    %124 = tpu.matmul %123, %120, %cst_117 {dimension_numbers = #tpu.dot_dimension_numbers<[1], [0], [0], [1], [0, 0, 1, 1], [], []>} : vector<4x4xbf16>, vector<4x192xbf16>, vector<4x192xf32> -> vector<4x192xf32>
    %125 = arith.truncf %124 : vector<4x192xf32> to vector<4x192xbf16>
    %c0_118 = arith.constant 0 : index
    %c0_119 = arith.constant 0 : index
    %c0_120 = arith.constant 0 : index
    %126 = vector.load %arg16[%c0_118, %c0_119, %c0_120] : memref<3x192x192xbf16, #tpu.memory_space<vmem>>, vector<1x192x192xbf16>
    %127 = vector.shape_cast %126 : vector<1x192x192xbf16> to vector<192x192xbf16>
    %cst_121 = arith.constant dense<0.000000e+00> : vector<4x192xf32>
    %128 = tpu.matmul %125, %127, %cst_121 {dimension_numbers = #tpu.dot_dimension_numbers<[1], [0], [0], [1], [0, 0, 1, 1], [], []>} : vector<4x192xbf16>, vector<192x192xbf16>, vector<4x192xf32> -> vector<4x192xf32>
    %129 = vector.broadcast %121 : vector<1x192xf32> to vector<4x192xf32>
    %130 = arith.addf %129, %128 : vector<4x192xf32>
    %c1_122 = arith.constant 1 : index
    %c0_123 = arith.constant 0 : index
    %c0_124 = arith.constant 0 : index
    %131 = vector.load %arg15[%c1_122, %c0_123, %c0_124] : memref<3x4x4xbf16, #tpu.memory_space<vmem>>, vector<1x4x4xbf16>
    %132 = vector.shape_cast %131 : vector<1x4x4xbf16> to vector<4x4xbf16>
    %cst_125 = arith.constant dense<0.000000e+00> : vector<4x192xf32>
    %133 = tpu.matmul %132, %120, %cst_125 {dimension_numbers = #tpu.dot_dimension_numbers<[1], [0], [0], [1], [0, 0, 1, 1], [], []>} : vector<4x4xbf16>, vector<4x192xbf16>, vector<4x192xf32> -> vector<4x192xf32>
    %134 = arith.truncf %133 : vector<4x192xf32> to vector<4x192xbf16>
    %c1_126 = arith.constant 1 : index
    %c0_127 = arith.constant 0 : index
    %c0_128 = arith.constant 0 : index
    %135 = vector.load %arg16[%c1_126, %c0_127, %c0_128] : memref<3x192x192xbf16, #tpu.memory_space<vmem>>, vector<1x192x192xbf16>
    %136 = vector.shape_cast %135 : vector<1x192x192xbf16> to vector<192x192xbf16>
    %cst_129 = arith.constant dense<0.000000e+00> : vector<4x192xf32>
    %137 = tpu.matmul %134, %136, %cst_129 {dimension_numbers = #tpu.dot_dimension_numbers<[1], [0], [0], [1], [0, 0, 1, 1], [], []>} : vector<4x192xbf16>, vector<192x192xbf16>, vector<4x192xf32> -> vector<4x192xf32>
    %138 = arith.addf %130, %137 : vector<4x192xf32>
    %c2_130 = arith.constant 2 : index
    %c0_131 = arith.constant 0 : index
    %c0_132 = arith.constant 0 : index
    %139 = vector.load %arg15[%c2_130, %c0_131, %c0_132] : memref<3x4x4xbf16, #tpu.memory_space<vmem>>, vector<1x4x4xbf16>
    %140 = vector.shape_cast %139 : vector<1x4x4xbf16> to vector<4x4xbf16>
    %cst_133 = arith.constant dense<0.000000e+00> : vector<4x192xf32>
    %141 = tpu.matmul %140, %120, %cst_133 {dimension_numbers = #tpu.dot_dimension_numbers<[1], [0], [0], [1], [0, 0, 1, 1], [], []>} : vector<4x4xbf16>, vector<4x192xbf16>, vector<4x192xf32> -> vector<4x192xf32>
    %142 = arith.truncf %141 : vector<4x192xf32> to vector<4x192xbf16>
    %c2_134 = arith.constant 2 : index
    %c0_135 = arith.constant 0 : index
    %c0_136 = arith.constant 0 : index
    %143 = vector.load %arg16[%c2_134, %c0_135, %c0_136] : memref<3x192x192xbf16, #tpu.memory_space<vmem>>, vector<1x192x192xbf16>
    %144 = vector.shape_cast %143 : vector<1x192x192xbf16> to vector<192x192xbf16>
    %cst_137 = arith.constant dense<0.000000e+00> : vector<4x192xf32>
    %145 = tpu.matmul %142, %144, %cst_137 {dimension_numbers = #tpu.dot_dimension_numbers<[1], [0], [0], [1], [0, 0, 1, 1], [], []>} : vector<4x192xbf16>, vector<192x192xbf16>, vector<4x192xf32> -> vector<4x192xf32>
    %146 = arith.addf %138, %145 : vector<4x192xf32>
    %cst_138 = arith.constant 0.000000e+00 : f32
    %147 = vector.broadcast %cst_138 : f32 to vector<4x192xf32>
    %148 = arith.maximumf %146, %147 : vector<4x192xf32>
    %149 = arith.truncf %148 : vector<4x192xf32> to vector<4x192xbf16>
    %c0_139 = arith.constant 0 : index
    %c0_140 = arith.constant 0 : index
    %c0_141 = arith.constant 0 : index
    %150 = vector.load %arg18[%c0_139, %c0_140, %c0_141] : memref<2x2x4xbf16, #tpu.memory_space<vmem>>, vector<1x2x4xbf16>
    %151 = vector.shape_cast %150 : vector<1x2x4xbf16> to vector<2x4xbf16>
    %cst_142 = arith.constant dense<0.000000e+00> : vector<2x192xf32>
    %152 = tpu.matmul %151, %149, %cst_142 {dimension_numbers = #tpu.dot_dimension_numbers<[1], [0], [0], [1], [0, 0, 1, 1], [], []>} : vector<2x4xbf16>, vector<4x192xbf16>, vector<2x192xf32> -> vector<2x192xf32>
    %c1_143 = arith.constant 1 : index
    %c0_144 = arith.constant 0 : index
    %c0_145 = arith.constant 0 : index
    %153 = vector.load %arg18[%c1_143, %c0_144, %c0_145] : memref<2x2x4xbf16, #tpu.memory_space<vmem>>, vector<1x2x4xbf16>
    %154 = vector.shape_cast %153 : vector<1x2x4xbf16> to vector<2x4xbf16>
    %cst_146 = arith.constant dense<0.000000e+00> : vector<2x192xf32>
    %155 = tpu.matmul %154, %149, %cst_146 {dimension_numbers = #tpu.dot_dimension_numbers<[1], [0], [0], [1], [0, 0, 1, 1], [], []>} : vector<2x4xbf16>, vector<4x192xbf16>, vector<2x192xf32> -> vector<2x192xf32>
    %156 = arith.maximumf %152, %155 : vector<2x192xf32>
    %157 = arith.truncf %156 : vector<2x192xf32> to vector<2x192xbf16>
    %c0_147 = arith.constant 0 : index
    %c0_148 = arith.constant 0 : index
    %c0_149 = arith.constant 0 : index
    %158 = vector.load %arg19[%c0_147, %c0_148, %c0_149] : memref<2x192x128xbf16, #tpu.memory_space<vmem>>, vector<1x192x128xbf16>
    %159 = vector.shape_cast %158 : vector<1x192x128xbf16> to vector<192x128xbf16>
    %cst_150 = arith.constant dense<0.000000e+00> : vector<2x128xf32>
    %160 = tpu.matmul %157, %159, %cst_150 {dimension_numbers = #tpu.dot_dimension_numbers<[1], [0], [0], [1], [0, 0, 1, 1], [], []>} : vector<2x192xbf16>, vector<192x128xbf16>, vector<2x128xf32> -> vector<2x128xf32>
    %c1_151 = arith.constant 1 : index
    %c0_152 = arith.constant 0 : index
    %c0_153 = arith.constant 0 : index
    %161 = vector.load %arg19[%c1_151, %c0_152, %c0_153] : memref<2x192x128xbf16, #tpu.memory_space<vmem>>, vector<1x192x128xbf16>
    %162 = vector.shape_cast %161 : vector<1x192x128xbf16> to vector<192x128xbf16>
    %cst_154 = arith.constant dense<0.000000e+00> : vector<2x128xf32>
    %163 = tpu.matmul %157, %162, %cst_154 {dimension_numbers = #tpu.dot_dimension_numbers<[1], [0], [0], [1], [0, 0, 1, 1], [], []>} : vector<2x192xbf16>, vector<192x128xbf16>, vector<2x128xf32> -> vector<2x128xf32>
    %164 = arith.maximumf %160, %163 : vector<2x128xf32>
    %165 = arith.truncf %164 : vector<2x128xf32> to vector<2x128xbf16>
    %c0_155 = arith.constant 0 : index
    %c0_156 = arith.constant 0 : index
    %166 = vector.load %arg22[%c0_155, %c0_156] : memref<1x256xf32, #tpu.memory_space<vmem>>, vector<1x256xf32>
    %c0_157 = arith.constant 0 : index
    %c0_158 = arith.constant 0 : index
    %c0_159 = arith.constant 0 : index
    %167 = vector.load %arg20[%c0_157, %c0_158, %c0_159] : memref<3x2x2xbf16, #tpu.memory_space<vmem>>, vector<1x2x2xbf16>
    %168 = vector.shape_cast %167 : vector<1x2x2xbf16> to vector<2x2xbf16>
    %cst_160 = arith.constant dense<0.000000e+00> : vector<2x128xf32>
    %169 = tpu.matmul %168, %165, %cst_160 {dimension_numbers = #tpu.dot_dimension_numbers<[1], [0], [0], [1], [0, 0, 1, 1], [], []>} : vector<2x2xbf16>, vector<2x128xbf16>, vector<2x128xf32> -> vector<2x128xf32>
    %170 = arith.truncf %169 : vector<2x128xf32> to vector<2x128xbf16>
    %c0_161 = arith.constant 0 : index
    %c0_162 = arith.constant 0 : index
    %c0_163 = arith.constant 0 : index
    %171 = vector.load %arg21[%c0_161, %c0_162, %c0_163] : memref<3x128x256xbf16, #tpu.memory_space<vmem>>, vector<1x128x256xbf16>
    %172 = vector.shape_cast %171 : vector<1x128x256xbf16> to vector<128x256xbf16>
    %cst_164 = arith.constant dense<0.000000e+00> : vector<2x256xf32>
    %173 = tpu.matmul %170, %172, %cst_164 {dimension_numbers = #tpu.dot_dimension_numbers<[1], [0], [0], [1], [0, 0, 1, 1], [], []>} : vector<2x128xbf16>, vector<128x256xbf16>, vector<2x256xf32> -> vector<2x256xf32>
    %174 = vector.broadcast %166 : vector<1x256xf32> to vector<2x256xf32>
    %175 = arith.addf %174, %173 : vector<2x256xf32>
    %c1_165 = arith.constant 1 : index
    %c0_166 = arith.constant 0 : index
    %c0_167 = arith.constant 0 : index
    %176 = vector.load %arg20[%c1_165, %c0_166, %c0_167] : memref<3x2x2xbf16, #tpu.memory_space<vmem>>, vector<1x2x2xbf16>
    %177 = vector.shape_cast %176 : vector<1x2x2xbf16> to vector<2x2xbf16>
    %cst_168 = arith.constant dense<0.000000e+00> : vector<2x128xf32>
    %178 = tpu.matmul %177, %165, %cst_168 {dimension_numbers = #tpu.dot_dimension_numbers<[1], [0], [0], [1], [0, 0, 1, 1], [], []>} : vector<2x2xbf16>, vector<2x128xbf16>, vector<2x128xf32> -> vector<2x128xf32>
    %179 = arith.truncf %178 : vector<2x128xf32> to vector<2x128xbf16>
    %c1_169 = arith.constant 1 : index
    %c0_170 = arith.constant 0 : index
    %c0_171 = arith.constant 0 : index
    %180 = vector.load %arg21[%c1_169, %c0_170, %c0_171] : memref<3x128x256xbf16, #tpu.memory_space<vmem>>, vector<1x128x256xbf16>
    %181 = vector.shape_cast %180 : vector<1x128x256xbf16> to vector<128x256xbf16>
    %cst_172 = arith.constant dense<0.000000e+00> : vector<2x256xf32>
    %182 = tpu.matmul %179, %181, %cst_172 {dimension_numbers = #tpu.dot_dimension_numbers<[1], [0], [0], [1], [0, 0, 1, 1], [], []>} : vector<2x128xbf16>, vector<128x256xbf16>, vector<2x256xf32> -> vector<2x256xf32>
    %183 = arith.addf %175, %182 : vector<2x256xf32>
    %c2_173 = arith.constant 2 : index
    %c0_174 = arith.constant 0 : index
    %c0_175 = arith.constant 0 : index
    %184 = vector.load %arg20[%c2_173, %c0_174, %c0_175] : memref<3x2x2xbf16, #tpu.memory_space<vmem>>, vector<1x2x2xbf16>
    %185 = vector.shape_cast %184 : vector<1x2x2xbf16> to vector<2x2xbf16>
    %cst_176 = arith.constant dense<0.000000e+00> : vector<2x128xf32>
    %186 = tpu.matmul %185, %165, %cst_176 {dimension_numbers = #tpu.dot_dimension_numbers<[1], [0], [0], [1], [0, 0, 1, 1], [], []>} : vector<2x2xbf16>, vector<2x128xbf16>, vector<2x128xf32> -> vector<2x128xf32>
    %187 = arith.truncf %186 : vector<2x128xf32> to vector<2x128xbf16>
    %c2_177 = arith.constant 2 : index
    %c0_178 = arith.constant 0 : index
    %c0_179 = arith.constant 0 : index
    %188 = vector.load %arg21[%c2_177, %c0_178, %c0_179] : memref<3x128x256xbf16, #tpu.memory_space<vmem>>, vector<1x128x256xbf16>
    %189 = vector.shape_cast %188 : vector<1x128x256xbf16> to vector<128x256xbf16>
    %cst_180 = arith.constant dense<0.000000e+00> : vector<2x256xf32>
    %190 = tpu.matmul %187, %189, %cst_180 {dimension_numbers = #tpu.dot_dimension_numbers<[1], [0], [0], [1], [0, 0, 1, 1], [], []>} : vector<2x128xbf16>, vector<128x256xbf16>, vector<2x256xf32> -> vector<2x256xf32>
    %191 = arith.addf %183, %190 : vector<2x256xf32>
    %cst_181 = arith.constant 0.000000e+00 : f32
    %192 = vector.broadcast %cst_181 : f32 to vector<2x256xf32>
    %193 = arith.maximumf %191, %192 : vector<2x256xf32>
    %194 = arith.truncf %193 : vector<2x256xf32> to vector<2x256xbf16>
    %c0_182 = arith.constant 0 : index
    %c0_183 = arith.constant 0 : index
    %195 = vector.load %arg25[%c0_182, %c0_183] : memref<1x256xf32, #tpu.memory_space<vmem>>, vector<1x256xf32>
    %c0_184 = arith.constant 0 : index
    %c0_185 = arith.constant 0 : index
    %c0_186 = arith.constant 0 : index
    %196 = vector.load %arg23[%c0_184, %c0_185, %c0_186] : memref<3x2x2xbf16, #tpu.memory_space<vmem>>, vector<1x2x2xbf16>
    %197 = vector.shape_cast %196 : vector<1x2x2xbf16> to vector<2x2xbf16>
    %cst_187 = arith.constant dense<0.000000e+00> : vector<2x256xf32>
    %198 = tpu.matmul %197, %194, %cst_187 {dimension_numbers = #tpu.dot_dimension_numbers<[1], [0], [0], [1], [0, 0, 1, 1], [], []>} : vector<2x2xbf16>, vector<2x256xbf16>, vector<2x256xf32> -> vector<2x256xf32>
    %199 = arith.truncf %198 : vector<2x256xf32> to vector<2x256xbf16>
    %c0_188 = arith.constant 0 : index
    %c0_189 = arith.constant 0 : index
    %c0_190 = arith.constant 0 : index
    %200 = vector.load %arg24[%c0_188, %c0_189, %c0_190] : memref<3x256x256xbf16, #tpu.memory_space<vmem>>, vector<1x256x256xbf16>
    %201 = vector.shape_cast %200 : vector<1x256x256xbf16> to vector<256x256xbf16>
    %cst_191 = arith.constant dense<0.000000e+00> : vector<2x256xf32>
    %202 = tpu.matmul %199, %201, %cst_191 {dimension_numbers = #tpu.dot_dimension_numbers<[1], [0], [0], [1], [0, 0, 1, 1], [], []>} : vector<2x256xbf16>, vector<256x256xbf16>, vector<2x256xf32> -> vector<2x256xf32>
    %203 = vector.broadcast %195 : vector<1x256xf32> to vector<2x256xf32>
    %204 = arith.addf %203, %202 : vector<2x256xf32>
    %c1_192 = arith.constant 1 : index
    %c0_193 = arith.constant 0 : index
    %c0_194 = arith.constant 0 : index
    %205 = vector.load %arg23[%c1_192, %c0_193, %c0_194] : memref<3x2x2xbf16, #tpu.memory_space<vmem>>, vector<1x2x2xbf16>
    %206 = vector.shape_cast %205 : vector<1x2x2xbf16> to vector<2x2xbf16>
    %cst_195 = arith.constant dense<0.000000e+00> : vector<2x256xf32>
    %207 = tpu.matmul %206, %194, %cst_195 {dimension_numbers = #tpu.dot_dimension_numbers<[1], [0], [0], [1], [0, 0, 1, 1], [], []>} : vector<2x2xbf16>, vector<2x256xbf16>, vector<2x256xf32> -> vector<2x256xf32>
    %208 = arith.truncf %207 : vector<2x256xf32> to vector<2x256xbf16>
    %c1_196 = arith.constant 1 : index
    %c0_197 = arith.constant 0 : index
    %c0_198 = arith.constant 0 : index
    %209 = vector.load %arg24[%c1_196, %c0_197, %c0_198] : memref<3x256x256xbf16, #tpu.memory_space<vmem>>, vector<1x256x256xbf16>
    %210 = vector.shape_cast %209 : vector<1x256x256xbf16> to vector<256x256xbf16>
    %cst_199 = arith.constant dense<0.000000e+00> : vector<2x256xf32>
    %211 = tpu.matmul %208, %210, %cst_199 {dimension_numbers = #tpu.dot_dimension_numbers<[1], [0], [0], [1], [0, 0, 1, 1], [], []>} : vector<2x256xbf16>, vector<256x256xbf16>, vector<2x256xf32> -> vector<2x256xf32>
    %212 = arith.addf %204, %211 : vector<2x256xf32>
    %c2_200 = arith.constant 2 : index
    %c0_201 = arith.constant 0 : index
    %c0_202 = arith.constant 0 : index
    %213 = vector.load %arg23[%c2_200, %c0_201, %c0_202] : memref<3x2x2xbf16, #tpu.memory_space<vmem>>, vector<1x2x2xbf16>
    %214 = vector.shape_cast %213 : vector<1x2x2xbf16> to vector<2x2xbf16>
    %cst_203 = arith.constant dense<0.000000e+00> : vector<2x256xf32>
    %215 = tpu.matmul %214, %194, %cst_203 {dimension_numbers = #tpu.dot_dimension_numbers<[1], [0], [0], [1], [0, 0, 1, 1], [], []>} : vector<2x2xbf16>, vector<2x256xbf16>, vector<2x256xf32> -> vector<2x256xf32>
    %216 = arith.truncf %215 : vector<2x256xf32> to vector<2x256xbf16>
    %c2_204 = arith.constant 2 : index
    %c0_205 = arith.constant 0 : index
    %c0_206 = arith.constant 0 : index
    %217 = vector.load %arg24[%c2_204, %c0_205, %c0_206] : memref<3x256x256xbf16, #tpu.memory_space<vmem>>, vector<1x256x256xbf16>
    %218 = vector.shape_cast %217 : vector<1x256x256xbf16> to vector<256x256xbf16>
    %cst_207 = arith.constant dense<0.000000e+00> : vector<2x256xf32>
    %219 = tpu.matmul %216, %218, %cst_207 {dimension_numbers = #tpu.dot_dimension_numbers<[1], [0], [0], [1], [0, 0, 1, 1], [], []>} : vector<2x256xbf16>, vector<256x256xbf16>, vector<2x256xf32> -> vector<2x256xf32>
    %220 = arith.addf %212, %219 : vector<2x256xf32>
    %cst_208 = arith.constant 0.000000e+00 : f32
    %221 = vector.broadcast %cst_208 : f32 to vector<2x256xf32>
    %222 = arith.maximumf %220, %221 : vector<2x256xf32>
    %223 = arith.truncf %222 : vector<2x256xf32> to vector<2x256xbf16>
    %c0_209 = arith.constant 0 : index
    %c0_210 = arith.constant 0 : index
    %c0_211 = arith.constant 0 : index
    %224 = vector.load %arg26[%c0_209, %c0_210, %c0_211] : memref<2x1x2xbf16, #tpu.memory_space<vmem>>, vector<1x1x2xbf16>
    %225 = vector.shape_cast %224 : vector<1x1x2xbf16> to vector<1x2xbf16>
    %cst_212 = arith.constant dense<0.000000e+00> : vector<1x256xf32>
    %226 = tpu.matmul %225, %223, %cst_212 {dimension_numbers = #tpu.dot_dimension_numbers<[1], [0], [0], [1], [0, 0, 1, 1], [], []>} : vector<1x2xbf16>, vector<2x256xbf16>, vector<1x256xf32> -> vector<1x256xf32>
    %c1_213 = arith.constant 1 : index
    %c0_214 = arith.constant 0 : index
    %c0_215 = arith.constant 0 : index
    %227 = vector.load %arg26[%c1_213, %c0_214, %c0_215] : memref<2x1x2xbf16, #tpu.memory_space<vmem>>, vector<1x1x2xbf16>
    %228 = vector.shape_cast %227 : vector<1x1x2xbf16> to vector<1x2xbf16>
    %cst_216 = arith.constant dense<0.000000e+00> : vector<1x256xf32>
    %229 = tpu.matmul %228, %223, %cst_216 {dimension_numbers = #tpu.dot_dimension_numbers<[1], [0], [0], [1], [0, 0, 1, 1], [], []>} : vector<1x2xbf16>, vector<2x256xbf16>, vector<1x256xf32> -> vector<1x256xf32>
    %230 = arith.maximumf %226, %229 : vector<1x256xf32>
    %231 = arith.truncf %230 : vector<1x256xf32> to vector<1x256xbf16>
    %c0_217 = arith.constant 0 : index
    %c0_218 = arith.constant 0 : index
    %c0_219 = arith.constant 0 : index
    %232 = vector.load %arg27[%c0_217, %c0_218, %c0_219] : memref<2x256x128xbf16, #tpu.memory_space<vmem>>, vector<1x256x128xbf16>
    %233 = vector.shape_cast %232 : vector<1x256x128xbf16> to vector<256x128xbf16>
    %cst_220 = arith.constant dense<0.000000e+00> : vector<1x128xf32>
    %234 = tpu.matmul %231, %233, %cst_220 {dimension_numbers = #tpu.dot_dimension_numbers<[1], [0], [0], [1], [0, 0, 1, 1], [], []>} : vector<1x256xbf16>, vector<256x128xbf16>, vector<1x128xf32> -> vector<1x128xf32>
    %c1_221 = arith.constant 1 : index
    %c0_222 = arith.constant 0 : index
    %c0_223 = arith.constant 0 : index
    %235 = vector.load %arg27[%c1_221, %c0_222, %c0_223] : memref<2x256x128xbf16, #tpu.memory_space<vmem>>, vector<1x256x128xbf16>
    %236 = vector.shape_cast %235 : vector<1x256x128xbf16> to vector<256x128xbf16>
    %cst_224 = arith.constant dense<0.000000e+00> : vector<1x128xf32>
    %237 = tpu.matmul %231, %236, %cst_224 {dimension_numbers = #tpu.dot_dimension_numbers<[1], [0], [0], [1], [0, 0, 1, 1], [], []>} : vector<1x256xbf16>, vector<256x128xbf16>, vector<1x128xf32> -> vector<1x128xf32>
    %238 = arith.maximumf %234, %237 : vector<1x128xf32>
    %239 = arith.truncf %238 : vector<1x128xf32> to vector<1x128xbf16>
    %c0_225 = arith.constant 0 : index
    %c0_226 = arith.constant 0 : index
    %c0_227 = arith.constant 0 : index
    %240 = vector.load %arg28[%c0_225, %c0_226, %c0_227] : memref<1x1x128xbf16, #tpu.memory_space<vmem>>, vector<1x1x128xbf16>
    %241 = vector.shape_cast %240 : vector<1x1x128xbf16> to vector<1x128xbf16>
    %242 = vector.shape_cast %239 : vector<1x128xbf16> to vector<1x1x128xbf16>
    tpu.vector_store %arg28[%c0_225, %c0_226, %c0_227], %242 {strides = array<i32>} : memref<1x1x128xbf16, #tpu.memory_space<vmem>>, vector<1x1x128xbf16>,
    return
  }
  func.func @transform_0(%arg0: i32) -> (i32, i32, i32) {
    %c0_i32 = arith.constant 0 : i32
    %c0_i32_0 = arith.constant 0 : i32
    %c0_i32_1 = arith.constant 0 : i32
    return %arg0, %c0_i32, %c0_i32_0 : i32, i32, i32
  }
  func.func @transform_1(%arg0: i32) -> (i32, i32, i32) {
    %c0_i32 = arith.constant 0 : i32
    %c0_i32_0 = arith.constant 0 : i32
    %c0_i32_1 = arith.constant 0 : i32
    %c0_i32_2 = arith.constant 0 : i32
    return %c0_i32, %c0_i32_0, %c0_i32_1 : i32, i32, i32
  }
  func.func @transform_2(%arg0: i32) -> (i32, i32, i32) {
    %c0_i32 = arith.constant 0 : i32
    %c0_i32_0 = arith.constant 0 : i32
    %c0_i32_1 = arith.constant 0 : i32
    %c0_i32_2 = arith.constant 0 : i32
    return %c0_i32, %c0_i32_0, %c0_i32_1 : i32, i32, i32
  }
  func.func @transform_3(%arg0: i32) -> (i32, i32) {
    %c0_i32 = arith.constant 0 : i32
    %c0_i32_0 = arith.constant 0 : i32
    %c0_i32_1 = arith.constant 0 : i32
    return %c0_i32, %c0_i32_0 : i32, i32
  }
  func.func @transform_4(%arg0: i32) -> (i32, i32, i32) {
    %c0_i32 = arith.constant 0 : i32
    %c0_i32_0 = arith.constant 0 : i32
    %c0_i32_1 = arith.constant 0 : i32
    %c0_i32_2 = arith.constant 0 : i32
    return %c0_i32, %c0_i32_0, %c0_i32_1 : i32, i32, i32
  }
  func.func @transform_5(%arg0: i32) -> (i32, i32, i32) {
    %c0_i32 = arith.constant 0 : i32
    %c0_i32_0 = arith.constant 0 : i32
    %c0_i32_1 = arith.constant 0 : i32
    %c0_i32_2 = arith.constant 0 : i32
    return %c0_i32, %c0_i32_0, %c0_i32_1 : i32, i32, i32
  }
  func.func @transform_6(%arg0: i32) -> (i32, i32, i32) {
    %c0_i32 = arith.constant 0 : i32
    %c0_i32_0 = arith.constant 0 : i32
    %c0_i32_1 = arith.constant 0 : i32
    %c0_i32_2 = arith.constant 0 : i32
    return %c0_i32, %c0_i32_0, %c0_i32_1 : i32, i32, i32
  }
  func.func @transform_7(%arg0: i32) -> (i32, i32, i32) {
    %c0_i32 = arith.constant 0 : i32
    %c0_i32_0 = arith.constant 0 : i32
    %c0_i32_1 = arith.constant 0 : i32
    %c0_i32_2 = arith.constant 0 : i32
    return %c0_i32, %c0_i32_0, %c0_i32_1 : i32, i32, i32
  }
  func.func @transform_8(%arg0: i32) -> (i32, i32) {
    %c0_i32 = arith.constant 0 : i32
    %c0_i32_0 = arith.constant 0 : i32
    %c0_i32_1 = arith.constant 0 : i32
    return %c0_i32, %c0_i32_0 : i32, i32
  }
  func.func @transform_9(%arg0: i32) -> (i32, i32, i32) {
    %c0_i32 = arith.constant 0 : i32
    %c0_i32_0 = arith.constant 0 : i32
    %c0_i32_1 = arith.constant 0 : i32
    %c0_i32_2 = arith.constant 0 : i32
    return %c0_i32, %c0_i32_0, %c0_i32_1 : i32, i32, i32
  }
  func.func @transform_10(%arg0: i32) -> (i32, i32, i32) {
    %c0_i32 = arith.constant 0 : i32
    %c0_i32_0 = arith.constant 0 : i32
    %c0_i32_1 = arith.constant 0 : i32
    %c0_i32_2 = arith.constant 0 : i32
    return %c0_i32, %c0_i32_0, %c0_i32_1 : i32, i32, i32
  }
  func.func @transform_11(%arg0: i32) -> (i32, i32, i32) {
    %c0_i32 = arith.constant 0 : i32
    %c0_i32_0 = arith.constant 0 : i32
    %c0_i32_1 = arith.constant 0 : i32
    %c0_i32_2 = arith.constant 0 : i32
    return %c0_i32, %c0_i32_0, %c0_i32_1 : i32, i32, i32
  }
  func.func @transform_12(%arg0: i32) -> (i32, i32, i32) {
    %c0_i32 = arith.constant 0 : i32
    %c0_i32_0 = arith.constant 0 : i32
    %c0_i32_1 = arith.constant 0 : i32
    %c0_i32_2 = arith.constant 0 : i32
    return %c0_i32, %c0_i32_0, %c0_i32_1 : i32, i32, i32
  }
  func.func @transform_13(%arg0: i32) -> (i32, i32) {
    %c0_i32 = arith.constant 0 : i32
    %c0_i32_0 = arith.constant 0 : i32
    %c0_i32_1 = arith.constant 0 : i32
    return %c0_i32, %c0_i32_0 : i32, i32
  }
  func.func @transform_14(%arg0: i32) -> (i32, i32, i32) {
    %c0_i32 = arith.constant 0 : i32
    %c0_i32_0 = arith.constant 0 : i32
    %c0_i32_1 = arith.constant 0 : i32
    %c0_i32_2 = arith.constant 0 : i32
    return %c0_i32, %c0_i32_0, %c0_i32_1 : i32, i32, i32
  }
  func.func @transform_15(%arg0: i32) -> (i32, i32, i32) {
    %c0_i32 = arith.constant 0 : i32
    %c0_i32_0 = arith.constant 0 : i32
    %c0_i32_1 = arith.constant 0 : i32
    %c0_i32_2 = arith.constant 0 : i32
    return %c0_i32, %c0_i32_0, %c0_i32_1 : i32, i32, i32
  }
  func.func @transform_16(%arg0: i32) -> (i32, i32) {
    %c0_i32 = arith.constant 0 : i32
    %c0_i32_0 = arith.constant 0 : i32
    %c0_i32_1 = arith.constant 0 : i32
    return %c0_i32, %c0_i32_0 : i32, i32
  }
  func.func @transform_17(%arg0: i32) -> (i32, i32, i32) {
    %c0_i32 = arith.constant 0 : i32
    %c0_i32_0 = arith.constant 0 : i32
    %c0_i32_1 = arith.constant 0 : i32
    %c0_i32_2 = arith.constant 0 : i32
    return %c0_i32, %c0_i32_0, %c0_i32_1 : i32, i32, i32
  }
  func.func @transform_18(%arg0: i32) -> (i32, i32, i32) {
    %c0_i32 = arith.constant 0 : i32
    %c0_i32_0 = arith.constant 0 : i32
    %c0_i32_1 = arith.constant 0 : i32
    %c0_i32_2 = arith.constant 0 : i32
    return %c0_i32, %c0_i32_0, %c0_i32_1 : i32, i32, i32
  }
  func.func @transform_19(%arg0: i32) -> (i32, i32, i32) {
    %c0_i32 = arith.constant 0 : i32
    %c0_i32_0 = arith.constant 0 : i32
    %c0_i32_1 = arith.constant 0 : i32
    %c0_i32_2 = arith.constant 0 : i32
    return %c0_i32, %c0_i32_0, %c0_i32_1 : i32, i32, i32
  }
  func.func @transform_20(%arg0: i32) -> (i32, i32, i32) {
    %c0_i32 = arith.constant 0 : i32
    %c0_i32_0 = arith.constant 0 : i32
    %c0_i32_1 = arith.constant 0 : i32
    %c0_i32_2 = arith.constant 0 : i32
    return %c0_i32, %c0_i32_0, %c0_i32_1 : i32, i32, i32
  }
  func.func @transform_21(%arg0: i32) -> (i32, i32) {
    %c0_i32 = arith.constant 0 : i32
    %c0_i32_0 = arith.constant 0 : i32
    %c0_i32_1 = arith.constant 0 : i32
    return %c0_i32, %c0_i32_0 : i32, i32
  }
  func.func @transform_22(%arg0: i32) -> (i32, i32, i32) {
    %c0_i32 = arith.constant 0 : i32
    %c0_i32_0 = arith.constant 0 : i32
    %c0_i32_1 = arith.constant 0 : i32
    %c0_i32_2 = arith.constant 0 : i32
    return %c0_i32, %c0_i32_0, %c0_i32_1 : i32, i32, i32
  }
  func.func @transform_23(%arg0: i32) -> (i32, i32, i32) {
    %c0_i32 = arith.constant 0 : i32
    %c0_i32_0 = arith.constant 0 : i32
    %c0_i32_1 = arith.constant 0 : i32
    %c0_i32_2 = arith.constant 0 : i32
    return %c0_i32, %c0_i32_0, %c0_i32_1 : i32, i32, i32
  }
  func.func @transform_24(%arg0: i32) -> (i32, i32) {
    %c0_i32 = arith.constant 0 : i32
    %c0_i32_0 = arith.constant 0 : i32
    %c0_i32_1 = arith.constant 0 : i32
    return %c0_i32, %c0_i32_0 : i32, i32
  }
  func.func @transform_25(%arg0: i32) -> (i32, i32, i32) {
    %c0_i32 = arith.constant 0 : i32
    %c0_i32_0 = arith.constant 0 : i32
    %c0_i32_1 = arith.constant 0 : i32
    %c0_i32_2 = arith.constant 0 : i32
    return %c0_i32, %c0_i32_0, %c0_i32_1 : i32, i32, i32
  }
  func.func @transform_26(%arg0: i32) -> (i32, i32, i32) {
    %c0_i32 = arith.constant 0 : i32
    %c0_i32_0 = arith.constant 0 : i32
    %c0_i32_1 = arith.constant 0 : i32
    %c0_i32_2 = arith.constant 0 : i32
    return %c0_i32, %c0_i32_0, %c0_i32_1 : i32, i32, i32
  }
  func.func @transform_27(%arg0: i32) -> (i32, i32, i32) {
    %c0_i32 = arith.constant 0 : i32
    %c0_i32_0 = arith.constant 0 : i32
    %c0_i32_1 = arith.constant 0 : i32
    return %arg0, %c0_i32, %c0_i32_0 : i32, i32, i32
  }
}

</mosaic_0001>

<bundles_post_ra>
// kernel: tpu_custom_call.1
= control target key start
LH: loop header
LB: loop body
LE: loop exit
PB: predicated region body
PF: predicated region fallthrough
CT: control target
= control target key end

     0   :  { %s8998_s0 = inlined_call_operand.hbm [shape: bf16[4,16,18], index: 0, kind: input, shape index: {}]   ;;  %s8999_s1 = inlined_call_operand.hbm [shape: bf16[3,16,16], index: 1, kind: input, shape index: {}]   ;;  %s9000_s2 = inlined_call_operand.hbm [shape: bf16[3,18,144], index: 2, kind: input, shape index: {}]   ;;  %s9001_s3 = inlined_call_operand.hbm [shape: f32[1,144], index: 3, kind: input, shape index: {}]   ;;  %s9002_s4 = inlined_call_operand.vmem [shape: bf16[2,8,16], index: 4, kind: input, shape index: {}]   ;;  %s9003_s5 = inlined_call_operand.hbm [shape: bf16[2,144,80], index: 5, kind: input, shape index: {}]   ;;  %s9004_s6 = inlined_call_operand.vmem [shape: bf16[3,8,8], index: 6, kind: input, shape index: {}]   ;;  %s9005_s7 = inlined_call_operand.hbm [shape: bf16[3,80,160], index: 7, kind: input, shape index: {}]   ;;  %s9006_s8 = inlined_call_operand.vmem [shape: f32[1,160], index: 8, kind: input, shape index: {}]   ;;  %s9007_s9 = inlined_call_operand.vmem [shape: bf16[2,4,8], index: 9, kind: input, shape index: {}]   ;;  %s9008_s10 = inlined_call_operand.hbm [shape: bf16[2,160,96], index: 10, kind: input, shape index: {}]   ;;  %s9009_s11 = inlined_call_operand.vmem [shape: bf16[3,4,4], index: 11, kind: input, shape index: {}]   ;;  %s9010_s12 = inlined_call_operand.hbm [shape: bf16[3,96,192], index: 12, kind: input, shape index: {}]   ;;  %s9011_s13 = inlined_call_operand.vmem [shape: f32[1,192], index: 13, kind: input, shape index: {}]   ;;  %s9012_s14 = inlined_call_operand.vmem [shape: bf16[3,4,4], index: 14, kind: input, shape index: {}]   ;;  %s9013_s15 = inlined_call_operand.hbm [shape: bf16[3,192,192], index: 15, kind: input, shape index: {}]   ;;  %s9014_s16 = inlined_call_operand.vmem [shape: f32[1,192], index: 16, kind: input, shape index: {}]   ;;  %s9015_s17 = inlined_call_operand.vmem [shape: bf16[2,2,4], index: 17, kind: input, shape index: {}]   ;;  %s9016_s18 = inlined_call_operand.hbm [shape: bf16[2,192,128], index: 18, kind: input, shape index: {}]   ;;  %s9017_s19 = inlined_call_operand.vmem [shape: bf16[3,2,2], index: 19, kind: input, shape index: {}]   ;;  %s9018_s20 = inlined_call_operand.hbm [shape: bf16[3,128,256], index: 20, kind: input, shape index: {}]   ;;  %s9019_s21 = inlined_call_operand.vmem [shape: f32[1,256], index: 21, kind: input, shape index: {}]   ;;  %s9020_s22 = inlined_call_operand.vmem [shape: bf16[3,2,2], index: 22, kind: input, shape index: {}]   ;;  %s9021_s23 = inlined_call_operand.hbm [shape: bf16[3,256,256], index: 23, kind: input, shape index: {}]   ;;  %s9022_s24 = inlined_call_operand.vmem [shape: f32[1,256], index: 24, kind: input, shape index: {}]   ;;  %s9023_s25 = inlined_call_operand.vmem [shape: bf16[2,1,2], index: 25, kind: input, shape index: {}]   ;;  %s9024_s26 = inlined_call_operand.hbm [shape: bf16[2,256,128], index: 26, kind: input, shape index: {}]   ;;  %s9025_s27 = inlined_call_operand.vmem [shape: bf16[4,1,128], index: 27, kind: output, shape index: {}]  }
   0x1   :  { %9054 = sst [smem:[#allocation29_spill]] %s8998_s0 }
   0x2   :  { %9055 = sst [smem:[#allocation30_spill]] %s8999_s1 }
   0x3   :  { %9056 = sst [smem:[#allocation31_spill]] %s9000_s2 }
   0x4   :  { %9057 = sst [smem:[#allocation32_spill]] %s9001_s3 }
   0x5   :  { %9058 = sst [smem:[#allocation33_spill]] %s9002_s4 }
   0x6   :  { %9059 = sst [smem:[#allocation34_spill]] %s9003_s5 }
   0x7   :  { %9060 = sst [smem:[#allocation35_spill]] %s9004_s6 }
   0x8   :  { %9061 = sst [smem:[#allocation36_spill]] %s9005_s7 }
   0x9   :  { %9062 = sst [smem:[#allocation37_spill]] %s9006_s8 }
   0xa   :  { %9063 = sst [smem:[#allocation38_spill]] %s9007_s9 }
   0xb   :  { %9064 = sst [smem:[#allocation39_spill]] %s9008_s10 }
   0xc   :  { %9065 = sst [smem:[#allocation40_spill]] %s9009_s11 }
   0xd   :  { %9066 = sst [smem:[#allocation41_spill]] %s9010_s12 }
   0xe   :  { %9067 = sst [smem:[#allocation42_spill]] %s9011_s13 }
   0xf   :  { %9068 = sst [smem:[#allocation43_spill]] %s9012_s14 }
  0x10   :  { %9069 = sst [smem:[#allocation44_spill]] %s9014_s16 }
  0x11   :  { %9070 = sst [smem:[#allocation45_spill]] %s9015_s17 }
  0x12   :  { %9071 = sst [smem:[#allocation46_spill]] %s9016_s18 }
  0x13   :  { %9072 = sst [smem:[#allocation47_spill]] %s9017_s19 }
  0x14   :  { %9073 = sst [smem:[#allocation48_spill]] %s9019_s21 }
  0x15   :  { %9074 = sst [smem:[#allocation49_spill]] %s9020_s22 }
  0x16   :  { %9075 = sst [smem:[#allocation50_spill]] %s9021_s23 }
  0x17   :  { %9076 = sst [smem:[#allocation51_spill]] %s9022_s24 }
  0x18   :  { %9077 = sst [smem:[#allocation52_spill]] %s9023_s25 }
  0x19   :  { %9078 = sst [smem:[#allocation53_spill]] %s9025_s27 }
  0x1a   :  { %32 = vsyncpa [#allocation3], 0 }
  0x1b   :  { %34 = vsyncpa [#allocation3 + $0x1], 0 }
  0x1c   :  { %35 = vsyncpa [#allocation5], 0 }
  0x1d   :  { %36 = vsyncpa [#allocation8], 0 }
  0x1e   :  { %37 = vsyncpa [#allocation11], 0 }
  0x1f   :  { %38 = vsyncpa [#allocation14], 0 }
  0x20   :  { %39 = vsyncpa [#allocation17], 0 }
  0x21   :  { %40 = vsyncpa [#allocation20], 0  ;;  %s8259_s7 = smov 0   ;;  %s8261_s4 = smov 0  }
  0x22   :  { %s8263_s8 = smov 0   ;;  %s8265_s30 = smov 0  }
  0x23 LB: > { %s8099_s9 = smov [#allocation4]   ;;  %s8280_s28 = sadd.s32 4294967295, %s8097_s30   ;;  %s8097_s30 = sphi %s8265_s30, %s9132_s30   ;;  %s8093_s8 = sphi %s8263_s8, %s9131_s8   ;;  %s8089_s4 = sphi %s8261_s4, %s9130_s4   ;;  %s8085_s7 = sphi %s8259_s7, %s9129_s7  }
  0x24   : > { %s661_s5 = sshll.u32 %s8099_s9, 4  ;;  %p6271_p0 = scmp.ge.s32.totalorder %s8097_s30, 1  ;;  %s8285_s5 = int_to_ptr.vmem [resolvable:$true] %s661_s5 }
  0x25   : > { %p9042_p1 = scmp.eq.s32.totalorder %s8280_s28, 0  ;;  %p649_p2 = scmp.lt.s32.totalorder %s8097_s30, 5 }
  0x26   : > { %s8100_s10 = smov [#allocation7]   ;;  %s8101_s6 = smov [#allocation10]  }
  0x27   : > { %p8287_p3 = pnand %p6271_p0, %p649_p2  ;;  %s688_s29 = sshll.u32 %s8100_s10, 4  ;;  %s8299_s29 = int_to_ptr.vmem [resolvable:$true] %s688_s29 }
  0x28   : > { %s8301_s11 = sshll.u32 %s8101_s6, 4  ;;  %s9081_s9 = sld [smem:[#allocation30_spill]]  ;;  %s718_s11 = int_to_ptr.vmem [resolvable:$true] %s8301_s11 }
  0x29   : > { %s9079_s0 = scalar_select %p8287_p3, 1, 0 }
  0x2a   : > { %p7020_p4 = pneg %p8287_p3 }
  0x2c   : > { %p8295_p5 = pnand %p7020_p4, %p9042_p1 }
  0x2e   : > { %s7673_s27 = scalar_lea.hbm %s9081_s9, 384  ;;  %p8311_p7 = pneg %p8295_p5 }
  0x2f   : > { %p7674_p6 = scmp.ne.s32.totalorder %s9081_s9, %s7673_s27  ;;  %p7680_p10 = scmp.lt.u32.totalorder %s7673_s27, %s9081_s9 }
  0x31   : > { %p7676_p8 = pnand %p8311_p7, %p7674_p6 }
  0x33   : > { %p7677_p9 = pneg %p7676_p8 }
  0x35   : > { %p7682_p11 = pnand %p7680_p10, %p7677_p9 }
  0x37   : > { %7685 = shalt.err (!%p7682_p11)
}
  0x38   : > { %s7686_s24 = scalar_lea.vmem %s8285_s5, 384  ;;  %p7694_p2 = scmp.lt.s32.totalorder %s8285_s5, %s8285_s5 }
  0x39   : > { %p7687_p12 = scmp.ne.s32.totalorder %s8285_s5, %s7686_s24  ;;  %p7695_p4 = scmp.lt.s32.totalorder %s7686_s24, %s7686_s24 }
  0x3b   : > { %p7689_p13 = pnand %p7687_p12, %p8311_p7  ;;  %p7696_p6 = por %p7695_p4, %p7694_p2 }
  0x3d   : > { %p7690_p0 = pneg %p7689_p13 }
  0x3f   : > { %p7697_p8 = pnand %p7696_p6, %p7690_p0 }
  0x41   : > { %7700 = shalt.err (!%p7697_p8)
}
  0x42   : > { %s9044_s25 = smov 64   ;;  %s9046_s22 = smov 4  }
  0x43   : > { %7023 = dma.hbm_to_vmem [thread:$0]  (!%p8295_p5), %s9081_s9, 384, %s8285_s5, [#allocation5], %s9044_s25, %s9044_s25, %s9046_s22  }
  0x44   : > { %s9083_s21 = sld [smem:[#allocation32_spill]] }
  0x4a   : > { %s7701_s24 = scalar_lea.hbm %s9083_s21, 32 }
  0x4b   : > { %p7702_p9 = scmp.ne.s32.totalorder %s9083_s21, %s7701_s24  ;;  %p7708_p12 = scmp.lt.u32.totalorder %s7701_s24, %s9083_s21 }
  0x4d   : > { %p7704_p10 = pnand %p7702_p9, %p8311_p7 }
  0x4f   : > { %p7705_p11 = pneg %p7704_p10 }
  0x51   : > { %p7710_p13 = pnand %p7708_p12, %p7705_p11 }
  0x53   : > { %7713 = shalt.err (!%p7710_p13)
}
  0x54   : > { %s7714_s5 = scalar_lea.vmem %s8299_s29, 32  ;;  %p7722_p6 = scmp.lt.s32.totalorder %s8299_s29, %s8299_s29 }
  0x55   : > { %p7715_p0 = scmp.ne.s32.totalorder %s8299_s29, %s7714_s5  ;;  %p7723_p8 = scmp.lt.s32.totalorder %s7714_s5, %s7714_s5 }
  0x57   : > { %p7717_p2 = pnand %p7715_p0, %p8311_p7  ;;  %p7724_p9 = por %p7723_p8, %p7722_p6 }
  0x59   : > { %p7718_p4 = pneg %p7717_p2 }
  0x5b   : > { %p7725_p10 = pnand %p7724_p9, %p7718_p4 }
  0x5d   : > { %7728 = shalt.err (!%p7725_p10)
}
  0x5e   : > { %7029 = dma.hbm_to_vmem [thread:$0]  (!%p8295_p5), %s9083_s21, 32, %s8299_s29, [#allocation8]  }
  0x5f   : > { %s9084_s27 = sld [smem:[#allocation36_spill]] }
  0x65   : > { %s7729_s2 = scalar_lea.hbm %s9084_s27, 3840 }
  0x66   : > { %p7730_p11 = scmp.ne.s32.totalorder %s9084_s27, %s7729_s2  ;;  %p7736_p0 = scmp.lt.u32.totalorder %s7729_s2, %s9084_s27 }
  0x68   : > { %p7732_p12 = pnand %p7730_p11, %p8311_p7 }
  0x6a   : > { %p7733_p13 = pneg %p7732_p12 }
  0x6c   : > { %p7738_p2 = pnand %p7736_p0, %p7733_p13 }
  0x6e   : > { %7741 = shalt.err (!%p7738_p2)
}
  0x6f   : > { %s7742_s14 = scalar_lea.vmem %s718_s11, 3840  ;;  %p7750_p9 = scmp.lt.s32.totalorder %s718_s11, %s718_s11 }
  0x70   : > { %p7743_p4 = scmp.ne.s32.totalorder %s718_s11, %s7742_s14  ;;  %p7751_p10 = scmp.lt.s32.totalorder %s7742_s14, %s7742_s14 }
  0x72   : > { %p7745_p6 = pnand %p7743_p4, %p8311_p7  ;;  %p7752_p1 = por %p7751_p10, %p7750_p9 }
  0x74   : > { %p7746_p8 = pneg %p7745_p6 }
  0x76   : > { %p7753_p3 = pnand %p7752_p1, %p7746_p8 }
  0x78   : > { %7756 = shalt.err (!%p7753_p3)
}
  0x79   : > { %s9050_s29 = smov 128   ;;  %s9052_s16 = smov 8  }
  0x7a   : > { %7035 = dma.hbm_to_vmem [thread:$0]  (!%p8295_p5), %s9084_s27, 3840, %s718_s11, [#allocation11], %s9050_s29, %s9050_s29, %s9052_s16  }
  0x7b   : > { %s8106_s2 = smov [#allocation13]   ;;  %s8107_s6 = smov [#allocation16]  }
  0x7c   : > { %s752_s3 = sshll.u32 %s8106_s2, 4  ;;  %s790_s24 = sshll.u32 %s8107_s6, 4  ;;  %s753_s3 = int_to_ptr.vmem [resolvable:$true] %s752_s3  ;;  %s791_s24 = int_to_ptr.vmem [resolvable:$true] %s790_s24 }
  0x7d   : > { %s9085_s12 = sld [smem:[#allocation41_spill]] }
  0x83   : > { %s7757_s25 = scalar_lea.hbm %s9085_s12, 4608 }
  0x84   : > { %p7758_p1 = scmp.ne.s32.totalorder %s9085_s12, %s7757_s25  ;;  %p7764_p12 = scmp.lt.u32.totalorder %s7757_s25, %s9085_s12 }
  0x86   : > { %p7760_p3 = pnand %p7758_p1, %p8311_p7 }
  0x88   : > { %p7761_p11 = pneg %p7760_p3 }
  0x8a   : > { %p7766_p13 = pnand %p7764_p12, %p7761_p11 }
  0x8c   : > { %7769 = shalt.err (!%p7766_p13)
}
  0x8d   : > { %s7770_s11 = scalar_lea.vmem %s753_s3, 4608  ;;  %p7778_p6 = scmp.lt.s32.totalorder %s753_s3, %s753_s3 }
  0x8e   : > { %p7771_p0 = scmp.ne.s32.totalorder %s753_s3, %s7770_s11  ;;  %p7779_p8 = scmp.lt.s32.totalorder %s7770_s11, %s7770_s11 }
  0x90   : > { %p7773_p2 = pnand %p7771_p0, %p8311_p7  ;;  %p7780_p9 = por %p7779_p8, %p7778_p6 }
  0x92   : > { %p7774_p4 = pneg %p7773_p2 }
  0x94   : > { %p7781_p10 = pnand %p7780_p9, %p7774_p4 }
  0x96   : > { %7784 = shalt.err (!%p7781_p10)
}
  0x97   : > { %7041 = dma.hbm_to_vmem [thread:$0]  (!%p8295_p5), %s9085_s12, 4608, %s753_s3, [#allocation14], %s9050_s29, %s9050_s29, %s9052_s16  }
  0x98   : > { %s9086_s18 = sld [smem:[#allocation46_spill]] }
  0x9e   : > { %s7785_s22 = scalar_lea.hbm %s9086_s18, 3072 }
  0x9f   : > { %p7786_p1 = scmp.ne.s32.totalorder %s9086_s18, %s7785_s22  ;;  %p7792_p12 = scmp.lt.u32.totalorder %s7785_s22, %s9086_s18 }
  0xa1   : > { %p7788_p3 = pnand %p7786_p1, %p8311_p7 }
  0xa3   : > { %p7789_p11 = pneg %p7788_p3 }
  0xa5   : > { %p7794_p13 = pnand %p7792_p12, %p7789_p11 }
  0xa7   : > { %7797 = shalt.err (!%p7794_p13)
}
  0xa8   : > { %s7798_s5 = scalar_lea.vmem %s791_s24, 3072  ;;  %p7806_p6 = scmp.lt.s32.totalorder %s791_s24, %s791_s24 }
  0xa9   : > { %p7799_p0 = scmp.ne.s32.totalorder %s791_s24, %s7798_s5  ;;  %p7807_p8 = scmp.lt.s32.totalorder %s7798_s5, %s7798_s5 }
  0xab   : > { %p7801_p2 = pnand %p7799_p0, %p8311_p7  ;;  %p7808_p9 = por %p7807_p8, %p7806_p6 }
  0xad   : > { %p7802_p4 = pneg %p7801_p2 }
  0xaf   : > { %p7809_p10 = pnand %p7808_p9, %p7802_p4 }
  0xb1   : > { %7812 = shalt.err (!%p7809_p10)
}
  0xb2   : > { %s9087_s3 = smov 4   ;;  %s9088_s14 = smov 64  }
  0xb3   : > { %7047 = dma.hbm_to_vmem [thread:$0]  (!%p8295_p5), %s9086_s18, 3072, %s791_s24, [#allocation17], %s9088_s14, %s9088_s14, %s9087_s3  }
  0xb4   : > { %s8108_s21 = smov [#allocation19]   ;;  %s8109_s25 = smov [#allocation6]  }
  0xb5   : > { %s825_s9 = sshll.u32 %s8108_s21, 4  ;;  %s674_s22 = sshll.u32 %s8109_s25, 4  ;;  %s826_s9 = int_to_ptr.vmem [resolvable:$true] %s825_s9  ;;  %s675_s22 = int_to_ptr.vmem [resolvable:$true] %s674_s22 }
  0xb6   : > { %s9089_s23 = sld [smem:[#allocation50_spill]] }
  0xbc   : > { %s7813_s2 = scalar_lea.hbm %s9089_s23, 12288 }
  0xbd   : > { %p7814_p1 = scmp.ne.s32.totalorder %s9089_s23, %s7813_s2  ;;  %p7820_p12 = scmp.lt.u32.totalorder %s7813_s2, %s9089_s23 }
  0xbf   : > { %p7816_p3 = pnand %p7814_p1, %p8311_p7 }
  0xc1   : > { %p7817_p11 = pneg %p7816_p3 }
  0xc3   : > { %p7822_p13 = pnand %p7820_p12, %p7817_p11 }
  0xc5   : > { %7825 = shalt.err (!%p7822_p13)
}
  0xc6   : > { %s7826_s24 = scalar_lea.vmem %s826_s9, 12288  ;;  %p7834_p6 = scmp.lt.s32.totalorder %s826_s9, %s826_s9 }
  0xc7   : > { %p7827_p0 = scmp.ne.s32.totalorder %s826_s9, %s7826_s24  ;;  %p7835_p8 = scmp.lt.s32.totalorder %s7826_s24, %s7826_s24 }
  0xc9   : > { %p7829_p2 = pnand %p7827_p0, %p8311_p7  ;;  %p7836_p9 = por %p7835_p8, %p7834_p6 }
  0xcb   : > { %p7830_p4 = pneg %p7829_p2 }
  0xcd   : > { %p7837_p10 = pnand %p7836_p9, %p7830_p4 }
  0xcf   : > { %7840 = shalt.err (!%p7837_p10)
}
  0xd0   : > { %s9090_s13 = smov 128   ;;  %s9091_s19 = sld [smem:[#allocation31_spill]] }
  0xd1   : > { %7053 = dma.hbm_to_vmem [thread:$0]  (!%p8295_p5), %s9089_s23, 12288, %s826_s9, [#allocation20], %s9090_s13, %s9090_s13, %s9052_s16  }
  0xd6   : > { %s7841_s2 = scalar_lea.hbm %s9091_s19, 1152 }
  0xd7   : > { %p7842_p1 = scmp.ne.s32.totalorder %s9091_s19, %s7841_s2  ;;  %p7848_p12 = scmp.lt.u32.totalorder %s7841_s2, %s9091_s19 }
  0xd9   : > { %p7844_p3 = pnand %p7842_p1, %p8311_p7 }
  0xdb   : > { %p7845_p11 = pneg %p7844_p3 }
  0xdd   : > { %p7850_p13 = pnand %p7848_p12, %p7845_p11 }
  0xdf   : > { %7853 = shalt.err (!%p7850_p13)
}
  0xe0   : > { %s7854_s29 = scalar_lea.vmem %s675_s22, 1152  ;;  %p7862_p6 = scmp.lt.s32.totalorder %s675_s22, %s675_s22 }
  0xe1   : > { %p7855_p0 = scmp.ne.s32.totalorder %s675_s22, %s7854_s29  ;;  %p7863_p8 = scmp.lt.s32.totalorder %s7854_s29, %s7854_s29 }
  0xe3   : > { %p7857_p2 = pnand %p7855_p0, %p8311_p7  ;;  %p7864_p9 = por %p7863_p8, %p7862_p6 }
  0xe5   : > { %p7858_p4 = pneg %p7857_p2 }
  0xe7   : > { %p7865_p10 = pnand %p7864_p9, %p7858_p4 }
  0xe9   : > { %7868 = shalt.err (!%p7865_p10)
}
  0xea   : > { %7026 = dma.hbm_to_vmem [thread:$0]  (!%p8295_p5), %s9091_s19, 1152, %s675_s22, [#allocation5], %s9090_s13, %s9090_s13, %s9052_s16  }
  0xeb   : > { %s8110_s25 = smov [#allocation9]   ;;  %s8111_s2 = smov [#allocation12]  }
  0xec   : > { %s701_s17 = sshll.u32 %s8110_s25, 4  ;;  %s736_s6 = sshll.u32 %s8111_s2, 4  ;;  %s702_s17 = int_to_ptr.vmem [resolvable:$true] %s701_s17  ;;  %s737_s6 = int_to_ptr.vmem [resolvable:$true] %s736_s6 }
  0xed   : > { %s9092_s24 = sld [smem:[#allocation34_spill]] }
  0xf3   : > { %s7869_s29 = scalar_lea.hbm %s9092_s24, 2304 }
  0xf4   : > { %p7870_p1 = scmp.ne.s32.totalorder %s9092_s24, %s7869_s29  ;;  %p7876_p12 = scmp.lt.u32.totalorder %s7869_s29, %s9092_s24 }
  0xf6   : > { %p7872_p3 = pnand %p7870_p1, %p8311_p7 }
  0xf8   : > { %p7873_p11 = pneg %p7872_p3 }
  0xfa   : > { %p7878_p13 = pnand %p7876_p12, %p7873_p11 }
  0xfc   : > { %7881 = shalt.err (!%p7878_p13)
}
  0xfd   : > { %s7882_s22 = scalar_lea.vmem %s702_s17, 2304  ;;  %p7890_p6 = scmp.lt.s32.totalorder %s702_s17, %s702_s17 }
  0xfe   : > { %p7883_p0 = scmp.ne.s32.totalorder %s702_s17, %s7882_s22  ;;  %p7891_p8 = scmp.lt.s32.totalorder %s7882_s22, %s7882_s22 }
 0x100   : > { %p7885_p2 = pnand %p7883_p0, %p8311_p7  ;;  %p7892_p9 = por %p7891_p8, %p7890_p6 }
 0x102   : > { %p7886_p4 = pneg %p7885_p2 }
 0x104   : > { %p7893_p10 = pnand %p7892_p9, %p7886_p4 }
 0x106   : > { %7896 = shalt.err (!%p7893_p10)
}
 0x107   : > { %7032 = dma.hbm_to_vmem [thread:$0]  (!%p8295_p5), %s9092_s24, 2304, %s702_s17, [#allocation8], %s9088_s14, %s9088_s14, %s9087_s3  }
 0x108   : > { %s9093_s25 = sld [smem:[#allocation39_spill]] }
 0x10e   : > { %s7897_s2 = scalar_lea.hbm %s9093_s25, 2560 }
 0x10f   : > { %p7898_p1 = scmp.ne.s32.totalorder %s9093_s25, %s7897_s2  ;;  %p7904_p12 = scmp.lt.u32.totalorder %s7897_s2, %s9093_s25 }
 0x111   : > { %p7900_p3 = pnand %p7898_p1, %p8311_p7 }
 0x113   : > { %p7901_p11 = pneg %p7900_p3 }
 0x115   : > { %p7906_p13 = pnand %p7904_p12, %p7901_p11 }
 0x117   : > { %7909 = shalt.err (!%p7906_p13)
}
 0x118   : > { %s7910_s22 = scalar_lea.vmem %s737_s6, 2560  ;;  %p7918_p6 = scmp.lt.s32.totalorder %s737_s6, %s737_s6 }
 0x119   : > { %p7911_p0 = scmp.ne.s32.totalorder %s737_s6, %s7910_s22  ;;  %p7919_p8 = scmp.lt.s32.totalorder %s7910_s22, %s7910_s22 }
 0x11b   : > { %p7913_p2 = pnand %p7911_p0, %p8311_p7  ;;  %p7920_p9 = por %p7919_p8, %p7918_p6 }
 0x11d   : > { %p7914_p4 = pneg %p7913_p2 }
 0x11f   : > { %p7921_p10 = pnand %p7920_p9, %p7914_p4 }
 0x121   : > { %7924 = shalt.err (!%p7921_p10)
}
 0x122   : > { %7038 = dma.hbm_to_vmem [thread:$0]  (!%p8295_p5), %s9093_s25, 2560, %s737_s6, [#allocation11], %s9088_s14, %s9088_s14, %s9087_s3  }
 0x123   : > { %s8112_s18 = smov [#allocation15]   ;;  %s8113_s21 = smov [#allocation18]  }
 0x124   : > { %s771_s23 = sshll.u32 %s8112_s18, 4  ;;  %s806_s2 = sshll.u32 %s8113_s21, 4  ;;  %s772_s23 = int_to_ptr.vmem [resolvable:$true] %s771_s23  ;;  %s807_s2 = int_to_ptr.vmem [resolvable:$true] %s806_s2 }
 0x125   : > { %s7925_s29 = scalar_lea.hbm %s9013_s15, 9216 }
 0x126   : > { %p7926_p1 = scmp.ne.s32.totalorder %s9013_s15, %s7925_s29  ;;  %p7932_p12 = scmp.lt.u32.totalorder %s7925_s29, %s9013_s15 }
 0x128   : > { %p7928_p3 = pnand %p7926_p1, %p8311_p7 }
 0x12a   : > { %p7929_p11 = pneg %p7928_p3 }
 0x12c   : > { %p7934_p13 = pnand %p7932_p12, %p7929_p11 }
 0x12e   : > { %7937 = shalt.err (!%p7934_p13)
}
 0x12f   : > { %s7938_s6 = scalar_lea.vmem %s772_s23, 9216  ;;  %p7946_p6 = scmp.lt.s32.totalorder %s772_s23, %s772_s23 }
 0x130   : > { %p7939_p0 = scmp.ne.s32.totalorder %s772_s23, %s7938_s6  ;;  %p7947_p8 = scmp.lt.s32.totalorder %s7938_s6, %s7938_s6 }
 0x132   : > { %p7941_p2 = pnand %p7939_p0, %p8311_p7  ;;  %p7948_p9 = por %p7947_p8, %p7946_p6 }
 0x134   : > { %p7942_p4 = pneg %p7941_p2 }
 0x136   : > { %p7949_p10 = pnand %p7948_p9, %p7942_p4 }
 0x138   : > { %7952 = shalt.err (!%p7949_p10)
}
 0x139   : > { %s9094_s12 = smov 8   ;;  %s7953_s11 = scalar_lea.hbm %s9018_s20, 6144 }
 0x13a   : > { %7044 = dma.hbm_to_vmem [thread:$0]  (!%p8295_p5), %s9013_s15, 9216, %s772_s23, [#allocation14], %s9090_s13, %s9090_s13, %s9094_s12  }
 0x13b   : > { %p7954_p1 = scmp.ne.s32.totalorder %s9018_s20, %s7953_s11  ;;  %p7960_p12 = scmp.lt.u32.totalorder %s7953_s11, %s9018_s20 }
 0x13d   : > { %p7956_p3 = pnand %p7954_p1, %p8311_p7 }
 0x13f   : > { %p7957_p11 = pneg %p7956_p3 }
 0x141   : > { %p7962_p13 = pnand %p7960_p12, %p7957_p11 }
 0x143   : > { %7965 = shalt.err (!%p7962_p13)
}
 0x144   : > { %s7966_s6 = scalar_lea.vmem %s807_s2, 6144  ;;  %p7974_p6 = scmp.lt.s32.totalorder %s807_s2, %s807_s2 }
 0x145   : > { %p7967_p0 = scmp.ne.s32.totalorder %s807_s2, %s7966_s6  ;;  %p7975_p8 = scmp.lt.s32.totalorder %s7966_s6, %s7966_s6 }
 0x147   : > { %p7969_p2 = pnand %p7967_p0, %p8311_p7  ;;  %p7976_p9 = por %p7975_p8, %p7974_p6 }
 0x149   : > { %p7970_p4 = pneg %p7969_p2 }
 0x14b   : > { %p7977_p10 = pnand %p7976_p9, %p7970_p4 }
 0x14d   : > { %7980 = shalt.err (!%p7977_p10)
}
 0x14e   : > { %7050 = dma.hbm_to_vmem [thread:$0]  (!%p8295_p5), %s9018_s20, 6144, %s807_s2, [#allocation17], %s9090_s13, %s9090_s13, %s9094_s12  }
 0x14f   : > { %s8114_s18 = smov [#allocation21]   ;;  %s7981_s29 = scalar_lea.hbm %s9024_s26, 4096 }
 0x150   : > { %s844_s21 = sshll.u32 %s8114_s18, 4  ;;  %p7982_p1 = scmp.ne.s32.totalorder %s9024_s26, %s7981_s29  ;;  %s845_s21 = int_to_ptr.vmem [resolvable:$true] %s844_s21 }
 0x151   : > { %p7988_p12 = scmp.lt.u32.totalorder %s7981_s29, %s9024_s26 }
 0x152   : > { %p7984_p3 = pnand %p7982_p1, %p8311_p7 }
 0x154   : > { %p7985_p11 = pneg %p7984_p3 }
 0x156   : > { %p7990_p13 = pnand %p7988_p12, %p7985_p11 }
 0x158   : > { %7993 = shalt.err (!%p7990_p13)
}
 0x159   : > { %s7994_s13 = scalar_lea.vmem %s845_s21, 4096  ;;  %p8002_p6 = scmp.lt.s32.totalorder %s845_s21, %s845_s21 }
 0x15a   : > { %p7995_p0 = scmp.ne.s32.totalorder %s845_s21, %s7994_s13  ;;  %p8003_p8 = scmp.lt.s32.totalorder %s7994_s13, %s7994_s13 }
 0x15c   : > { %p7997_p2 = pnand %p7995_p0, %p8311_p7  ;;  %p8004_p9 = por %p8003_p8, %p8002_p6 }
 0x15e   : > { %p7998_p4 = pneg %p7997_p2 }
 0x160   : > { %p8005_p10 = pnand %p8004_p9, %p7998_p4 }
 0x162   : > { %8008 = shalt.err (!%p8005_p10)
}
 0x163   : > { %7056 = dma.hbm_to_vmem [thread:$0]  (!%p8295_p5), %s9024_s26, 4096, %s845_s21, [#allocation20], %s9088_s14, %s9088_s14, %s9087_s3  }
 0x164   : > { %s8570_s1 = sadd.s32 1, %s8097_s30   ;;  %s53_s10 = sadd.s32 1, %s8093_s8 }
 0x165   : > { %s50_s23 = ssub.s32 %s8097_s30, %s8570_s1  ;;  %p60_p7 = scmp.ne.s32.totalorder %s8093_s8, %s8089_s4 }
 0x166   : > { %p51_p1 = scmp.eq.s32.totalorder %s50_s23, 0  ;;  %p61_p3 = scmp.eq.s32.totalorder %s8097_s30, 0 }
 0x167   : > { %p66_p11 = scmp.ne.s32.totalorder %s8089_s4, %s8085_s7  ;;  %p7073_p12 = scmp.lt.s32.totalorder %s8097_s30, 4 }
 0x168   : > { %s8582_s16 = scalar_select %p51_p1, %s8093_s8, %s53_s10  }
 0x169   : > { %p62_p13 = por %p61_p3, %p60_p7  ;;  %p9095_p0 = scmp.eq.s32.totalorder %s8280_s28, 0 }
 0x16a   : > { %s858_s5 = sand.u32 1, %s8093_s8   ;;  %s6769_s21 = sshll.u32 %s8097_s30, 7 }
 0x16b   : > { %p8586_p2 = por %p9095_p0, %p66_p11  ;;  %s6285_s11 = sshll.u32 %s858_s5, 3 }
 0x16c   : > { %s9097_s22 = sld [smem:[#allocation29_spill]]  ;;  %s862_s7 = scalar_lea.vmem [#allocation2], %s6285_s11 }
 0x16d   : > { %s869_s6 = sshll.u32 %s862_s7, 4  ;;  %p8597_p5 = pnand %p7073_p12, %p62_p13  ;;  %s8601_s6 = int_to_ptr.vmem [resolvable:$true] %s869_s6 }
 0x16e   : > { %s8603_s30 = scalar_lea.sflag [#allocation3], %s858_s5 }
 0x16f   : > { %p8011_p6 = pneg %p8597_p5 }
 0x172   : > { %s8595_s17 = scalar_lea.hbm %s9097_s22, %s6769_s21  ;;  %s8014_s23 = scalar_lea.hbm %s9097_s22, 512 }
 0x173   : > { %s8009_s2 = scalar_lea.hbm %s8595_s17, 128  ;;  %p8015_p10 = scmp.lt.u32.totalorder %s8595_s17, %s9097_s22 }
 0x174   : > { %p8010_p4 = scmp.ne.s32.totalorder %s8595_s17, %s8009_s2  ;;  %p8016_p7 = scmp.lt.u32.totalorder %s8014_s23, %s8009_s2 }
 0x175   : > { %p8018_p3 = scmp.lt.u32.totalorder %s8009_s2, %s8595_s17 }
 0x176   : > { %p8012_p8 = pnand %p8011_p6, %p8010_p4  ;;  %p8017_p1 = por %p8016_p7, %p8015_p10 }
 0x178   : > { %p8013_p9 = pneg %p8012_p8  ;;  %p8019_p11 = por %p8018_p3, %p8017_p1 }
 0x17a   : > { %p8020_p12 = pnand %p8019_p11, %p8013_p9 }
 0x17c   : > { %8023 = shalt.err (!%p8020_p12)
}
 0x17d   : > { %s8024_s5 = scalar_lea.vmem %s8601_s6, 128  ;;  %s8115_s29 = smov [#allocation2]  }
 0x17e   : > { %p8025_p13 = scmp.ne.s32.totalorder %s8601_s6, %s8024_s5  ;;  %s8029_s9 = sshll.u32 %s8115_s29, 4  ;;  %s8030_s9 = int_to_ptr.vmem [resolvable:$false] %s8029_s9 }
 0x17f   : > { %s8031_s7 = scalar_lea.vmem %s8030_s9, 256  ;;  %p8032_p8 = scmp.lt.s32.totalorder %s8601_s6, %s8030_s9 }
 0x180   : > { %p8027_p0 = pnand %p8025_p13, %p8011_p6  ;;  %p8033_p10 = scmp.lt.s32.totalorder %s8031_s7, %s8024_s5 }
 0x182   : > { %p8028_p4 = pneg %p8027_p0  ;;  %p8034_p7 = por %p8033_p10, %p8032_p8 }
 0x184   : > { %p8035_p1 = pnand %p8034_p7, %p8028_p4 }
 0x186   : > { %8038 = shalt.err (!%p8035_p1)
}
 0x187   : > { %7060 = dma.hbm_to_vmem [thread:$0]  (!%p8597_p5), %s8595_s17, 128, %s8601_s6, %s8603_s30, %s9088_s14, %s9088_s14, %s9087_s3  }
 0x188   : > { %p9099_p6 = scmp.ne.s32.totalorder %s9079_s0, 0 }
 0x189   : > { %s883_s2 = sand.u32 (!%p9099_p6), 1, %s8089_s4  }
 0x18a   : > { %881 = sbr.rel (%p9099_p6) target bundleno = 5672 (0x1628), region = 128  ;;  %s6289_s12 = sshll.u32 (!%p9099_p6), %s883_s2, 3 }
 0x18b   : > { %s884_s10 = scalar_lea.sflag (!%p9099_p6), [#allocation3], %s883_s2  ;;  %s887_s23 = scalar_lea.vmem (!%p9099_p6), [#allocation2], %s6289_s12 }
 0x191   : > { %8056 = dma.done.wait (%p8586_p2), %s884_s10, 128  }
 0x192   : > { %8058 = vsyncadd (%p8586_p2), %s884_s10, 4294967168  ;;  %p9100_p9 = scmp.eq.s32.totalorder %s8280_s28, 0 }
 0x194   : > { %8060 = dma.done.wait (%p9100_p9), [#allocation5], 1536   ;;  %p9101_p3 = pmov %p9100_p9 }
 0x196   : > { %8062 = vsyncadd (%p9101_p3), [#allocation5], 4294965760  ;;  %p9102_p5 = pmov %p9101_p3 }
 0x197   : > { %p9103_p11 = pmov %p9101_p3 }
 0x198   : > { %8064 = dma.done.wait (%p9102_p5), [#allocation8], 2336  }
 0x199   : > { %8066 = vsyncadd (%p9103_p11), [#allocation8], 4294964960  ;;  %p9104_p12 = pmov %p9101_p3 }
 0x19a   : > { %p9105_p13 = pmov %p9101_p3 }
 0x19b   : > { %8068 = dma.done.wait (%p9104_p12), [#allocation11], 6400  }
 0x19c   : > { %8070 = vsyncadd (%p9105_p13), [#allocation11], 4294960896  ;;  %p9106_p2 = pmov %p9101_p3 }
 0x19e   : > { %8072 = dma.done.wait (%p9106_p2), [#allocation14], 13824   ;;  %p9107_p0 = pmov %p9106_p2 }
 0x1a0   : > { %8074 = vsyncadd (%p9107_p0), [#allocation14], 4294953472  ;;  %p9108_p4 = pmov %p9107_p0 }
 0x1a1   : > { %p9109_p8 = pmov %p9107_p0 }
 0x1a2   : > { %8076 = dma.done.wait (%p9108_p4), [#allocation17], 9216  }
 0x1a3   : > { %8078 = vsyncadd (%p9109_p8), [#allocation17], 4294958080  ;;  %p9110_p10 = pmov %p9107_p0 }
 0x1a4   : > { %p9111_p7 = pmov %p9107_p0 }
 0x1a5   : > { %8080 = dma.done.wait (%p9110_p10), [#allocation20], 16384  }
 0x1a6   : > { %8082 = vsyncadd (%p9111_p7), [#allocation20], 4294950912  ;;  %v8116_v0 = vmov 0.0   ;;  %vm8117_vm0 = vmmov 0   ;;  %v7137_v1 = vld [vmem:[%s887_s23] sm:$0xff]   ;;  %v7138_v2 = vld [vmem:[#allocation4] sm:$0xff]   ;;  %v1143_v39 = vlaneseq }
 0x1a7   : > { %6838 = vmatprep.subr.bf16.mxu0 %v8116_v0  ;;  %6840 = vmatprep.mubr.msk.bf16.mxu0 %vm8117_vm0, %v8116_v0  ;;  %vm1024_vm1 = vcmask 130048   ;;  %v7141_v3 = vld [vmem:[#allocation6 + $0x4] ss:$8 sps:$4 sm:$0xff]   ;;  %v7143_v4 = vld [vmem:[#allocation6] ss:$8 sps:$4 sm:$0xff]   ;;  %v7139_v5 = vld [vmem:[#allocation4 + $0x8] sm:$0xff]  }
 0x1a8   : > { %6839 = vmatpush3.bf16.msra.mxu0 %v7137_v1  ;;  %1099 = vmatprep.subr.bf16.mxu1 %v7141_v3  ;;  %v7140_v6 = vld [vmem:[#allocation4 + $0x10] sm:$0xff]   ;;  %v1072_v7 = vld [vmem:[#allocation6 + $0x10] sm:$0x11]  ;;  %vm1092_vm2 = vcmask 1040384   ;;  %v8118_v11 = vmov 0   ;;  %vm1088_vm3 = vcmask 146432  }
 0x1a9   : > { %6844 = vmatprep.subr.bf16.mxu0 %v8116_v0  ;;  %1100 = vmatpush1.bf16.msra.mxu1 %v7143_v4  ;;  %v6308_v8 = vcombine.high %v1072_v7, %v1072_v7  ;;  %v6307_v9 = vcombine.low %v1072_v7, %v1072_v7  ;;  %v7148_v12 = vld [vmem:[#allocation6 + $0x1c] ss:$8 sps:$4 sm:$0xff]   ;;  %v1213_v14 = vld [vmem:[#allocation6 + $0x28] sm:$0x11]  ;;  %v7146_v17 = vld [vmem:[#allocation6 + $0x18] ss:$8 sps:$4 sm:$0xff]  }
 0x1aa   : > { %1131 = vmatprep.mubr.bf16.mxu1 %v8118_v11  ;;  %v6316_v20 = vcombine.high %v1213_v14, %v1213_v14  ;;  %v6315_v21 = vcombine.low %v1213_v14, %v1213_v14  ;;  %v7153_v23 = vld [vmem:[#allocation6 + $0x34] ss:$8 sps:$4 sm:$0xff]   ;;  %v1341_v29 = vld [vmem:[#allocation6 + $0x40] sm:$0x11]  ;;  %v7151_v30 = vld [vmem:[#allocation6 + $0x30] ss:$8 sps:$4 sm:$0xff]  }
 0x1ab   : > { %6841 = vmatmul.mubr.msk.bf16.vlgmr.msra.gmra.mrb[0].mxu0 %vm1024_vm1, %v7138_v2  ;;  %6309 = vmatprep.subr.msk.bf16.mxu1 %vm1092_vm2, %v6308_v8  ;;  %v1094_v10 = vsel %vm1092_vm2, %v6307_v9, 0  ;;  %v6324_v31 = vcombine.high %v1341_v29, %v1341_v29  ;;  %v6323_v32 = vcombine.low %v1341_v29, %v1341_v29  ;;  %v1144_v40 = vshrl.u32 %v1143_v39, 7  ;;  %v1010_v42 = vld [vmem:[#allocation7] sm:$0x3]  ;;  %s9112_s14 = sld [smem:[#allocation33_spill]]  ;;  %v7156_v62 = vld [vmem:[#allocation9] sm:$0xff]  }
 0x1ac   : > { %6845 = vmatpush3.bf16.msra.mxu0 %v7137_v1  ;;  %6846 = vmatprep.mubr.msk.bf16.mxu0 %vm8117_vm0, %v8116_v0  ;;  %v1233_v22 = vsel %vm1092_vm2, %v6315_v21, 0  ;;  %v7157_v63 = vld [vmem:[#allocation9 + $0x48] sm:$0xff]   ;;  %v7159_v2 = vld [vmem:[#allocation9 + $0x50] sm:$0xff]   ;;  %v7161_v4 = vld [vmem:[#allocation9 + $0x58] sm:$0xff]   ;;  %vm1750_vm4 = vcmask 1043456   ;;  %s9113_s30 = sld [smem:[#allocation35_spill]] }
 0x1ad   : > { %6850 = vmatprep.subr.bf16.mxu0 %v8116_v0  ;;  %1102 = vmatpush1.bf16.msra.mxu1 %v1094_v10  ;;  %v1361_v38 = vsel %vm1092_vm2, %v6323_v32, 0  ;;  %v8691_v41 = vsub.s32 0, %v1144_v40  ;;  %v8693_v43 = vsub.s32 1, %v1144_v40  ;;  %v7160_v3 = vld [vmem:[#allocation9 + $0x10] sm:$0xff]   ;;  %v7164_v7 = vld [vmem:[#allocation9 + $0x20] sm:$0xff]   ;;  %v7165_v8 = vld [vmem:[#allocation9 + $0x68] sm:$0xff]  }
 0x1ae   : > { %1238 = vmatprep.subr.bf16.mxu1 %v7148_v12  ;;  %v7166_v9 = vld [vmem:[#allocation9 + $0x28] sm:$0xff]   ;;  %v7167_v10 = vld [vmem:[#allocation9 + $0x70] sm:$0xff]   ;;  %v7170_v14 = vld [vmem:[#allocation9 + $0x38] sm:$0xff]   ;;  %vm1746_vm5 = vcmask 64512   ;;  %vm1855_vm6 = vcmask 654336   ;;  %s9115_s12 = sld [smem:[#allocation37_spill]] }
 0x1af   : > { %v1146_v44 = vrot.slane %v1010_v42, %v8691_v41  ;;  %v1150_v45 = vrot.slane %v1010_v42, %v8693_v43  ;;  %v7168_v12 = vld [vmem:[#allocation9 + $0x30] sm:$0xff]   ;;  %v7179_v32 = vld [vmem:[#allocation10 + $0x14] ss:$8 sps:$4 sm:$0xff]   ;;  %s9116_s0 = sld [smem:[#allocation38_spill]]  ;;  %vm2404_vm7 = vcmask 261120   ;;  %vm2577_vm8 = vcmask 1041408  }
 0x1b0   : > { %v7186_v39 = vld [vmem:[#allocation10 + $0x40] ss:$8 sps:$4 sm:$0xff]   ;;  %s9117_s13 = sld [smem:[#allocation40_spill]]  ;;  %vm2573_vm9 = vcmask 31744   ;;  %vm2694_vm10 = vcmask 785408   ;;  %s9118_s2 = sld [smem:[#allocation42_spill]] }
 0x1b1   : > { %v1419_v60 = vld [vmem:[%s9112_s14] sm:$0xf]  ;;  %v6328_v61 = vld [vmem:[%s9112_s14 + $0x4] sm:$0xf]  ;;  %s9119_s23 = sld [smem:[#allocation43_spill]]  ;;  %vm3284_vm11 = vcmask 523264  }
 0x1b2   : > { %s9114_s21 = smov %s9113_s30  ;;  %s9120_s5 = sld [smem:[#allocation44_spill]]  ;;  %vm4205_vm12 = vcmask 15360   ;;  %vm6092_vm13 = vsmask.f32 256 }
 0x1b3   : > { %6847 = vmatmul.mubr.msk.bf16.vlgmr.msra.gmra.mrb[4].mxu0 %vm1024_vm1, %v7139_v5  ;;  %v7162_v5 = vld [vmem:[#allocation9 + $0x18] sm:$0xff]   ;;  %s9121_s7 = sld [smem:[#allocation45_spill]]  ;;  %s9123_s17 = sld [smem:[#allocation47_spill]]  ;;  %vm6093_vm14 = vmand %vm1092_vm2, %vm6092_vm13 }
 0x1b4   : > { %6851 = vmatpush3.bf16.msra.mxu0 %v7137_v1  ;;  %6852 = vmatprep.mubr.msk.bf16.mxu0 %vm8117_vm0, %v8116_v0  ;;  %v7158_v1 = vld [vmem:[#allocation9 + $0x8] sm:$0xff]   ;;  %s9125_s3 = sld [smem:[#allocation49_spill]]  ;;  %s9126_s9 = sld [smem:[#allocation51_spill]] }
 0x1b5   : > { %s9127_s10 = sld [smem:[#allocation52_spill]]  ;;  %p1004_p1 = scmp.lt.s32.totalorder %s8280_s28, 3 }
 0x1b7   : > { %s9134_s28 = smov (!%p1004_p1, %s8280_s28), 3 }
 0x1bb   : > { %6853 = vmatmul.mubr.msk.bf16.vlgmr.msra.gmra.mrb[8].mxu0 %vm1024_vm1, %v7140_v6  ;;  %v7163_v6 = vld [vmem:[#allocation9 + $0x60] sm:$0xff]  }
 0x1bc   : > { %1455 = vmatprep.mubr.bf16.mxu0 %v8118_v11 }
 0x27e   : > { %v1062_v13 = vpop.f32.mrb[0].mxu0 }
 0x27f   : > { %v6842_v15 = vpop.f32.mrb[1].mxu0 }
 0x280   : > { %v1065_v16 = vpop.f32.mrb[2].mxu0  ;;  %v7171_v15 = vld [vmem:[#allocation9 + $0x80] sm:$0xff]  }
 0x281   : > { %v1069_v18 = vpack.c.bf16 %v1065_v16, %v1062_v13  ;;  %v6843_v19 = vpop.f32.mrb[3].mxu0  ;;  %v7169_v13 = vld [vmem:[#allocation9 + $0x78] sm:$0xff]   ;;  %v7172_v16 = vld [vmem:[#allocation9 + $0x40] sm:$0xff]  }
 0x283   : > { %6310 = vmatmul.mubr.msk.bf16.vlgmr.msra.gmra.mrb[0].mxu1 %vm1088_vm3, %v1069_v18 }
 0x284   : > { %1239 = vmatpush1.bf16.msra.mxu1 %v7146_v17  ;;  %1270 = vmatprep.mubr.bf16.mxu1 %v8118_v11  ;;  %v7173_v17 = vld [vmem:[#allocation9 + $0x88] sm:$0xff]  }
 0x285   : > { %6317 = vmatprep.subr.msk.bf16.mxu1 %vm1092_vm2, %v6316_v20 }
 0x286   : > { %v1202_v24 = vpop.f32.mrb[4].mxu0 }
 0x287   : > { %v6848_v25 = vpop.f32.mrb[5].mxu0 }
 0x288   : > { %v1205_v26 = vpop.f32.mrb[6].mxu0  ;;  %1241 = vmatpush1.bf16.msra.mxu1 %v1233_v22 }
 0x289   : > { %v1209_v27 = vpack.c.bf16 %v1205_v26, %v1202_v24  ;;  %v6849_v28 = vpop.f32.mrb[7].mxu0  ;;  %1366 = vmatprep.subr.bf16.mxu1 %v7153_v23 }
 0x28e   : > { %v1330_v33 = vpop.f32.mrb[8].mxu0 }
 0x28f   : > { %6318 = vmatmul.mubr.msk.bf16.vlgmr.msra.gmra.mrb[0].mxu1 %vm1088_vm3, %v1209_v27  ;;  %v6854_v34 = vpop.f32.mrb[9].mxu0 }
 0x290   : > { %1367 = vmatpush1.bf16.msra.mxu1 %v7151_v30  ;;  %v1333_v35 = vpop.f32.mrb[10].mxu0  ;;  %1398 = vmatprep.mubr.bf16.mxu1 %v8118_v11  ;;  %v7174_v30 = vld [vmem:[#allocation10] ss:$8 sps:$4 sm:$0xff]   ;;  %v7182_v34 = vld [vmem:[#allocation10 + $0x24] ss:$8 sps:$4 sm:$0xff]  }
 0x291   : > { %v1337_v36 = vpack.c.bf16 %v1333_v35, %v1330_v33  ;;  %v6855_v37 = vpop.f32.mrb[11].mxu0  ;;  %6325 = vmatprep.subr.msk.bf16.mxu1 %vm1092_vm2, %v6324_v31  ;;  %v7176_v31 = vld [vmem:[#allocation10 + $0x4] ss:$8 sps:$4 sm:$0xff]   ;;  %v7177_v33 = vld [vmem:[#allocation10 + $0x10] ss:$8 sps:$4 sm:$0xff]  }
 0x292   : > { %v7180_v35 = vld [vmem:[#allocation10 + $0x20] ss:$8 sps:$4 sm:$0xff]   ;;  %v7183_v37 = vld [vmem:[#allocation10 + $0x30] ss:$8 sps:$4 sm:$0xff]  }
 0x294   : > { %1369 = vmatpush1.bf16.msra.mxu1 %v1361_v38  ;;  %v7188_v38 = vld [vmem:[#allocation10 + $0x44] ss:$8 sps:$4 sm:$0xff]  }
 0x29b   : > { %6326 = vmatmul.mubr.msk.bf16.vlgmr.msra.gmra.mrb[0].mxu1 %vm1088_vm3, %v1337_v36  ;;  %v7185_v36 = vld [vmem:[#allocation10 + $0x34] ss:$8 sps:$4 sm:$0xff]  }
 0x29c   : > { %1501 = vmatprep.mubr.bf16.mxu1 %v8118_v11 }
 0x36e   : > { %v1400_v46 = vpop.f32.mrb[0].mxu1 }
 0x36f   : > { %v6910_v47 = vadd.f32 %v1400_v46, %v1146_v44  ;;  %v1402_v48 = vpop.f32.mrb[1].mxu1 }
 0x370   : > { %v6911_v49 = vadd.f32 %v1402_v48, %v1150_v45  ;;  %v1404_v50 = vpop.f32.mrb[2].mxu1 }
 0x371   : > { %v6912_v51 = vadd.f32 %v1404_v50, %v1146_v44  ;;  %v1406_v52 = vpop.f32.mrb[3].mxu1  ;;  %v1413_v54 = vmax.f32 %v6910_v47, 0.0 }
 0x372   : > { %v6913_v53 = vadd.f32 %v1406_v52, %v1150_v45  ;;  %v1414_v56 = vmax.f32 %v6911_v49, 0.0 }
 0x373   : > { %v1415_v55 = vmax.f32 %v6912_v51, 0.0 }
 0x374   : > { %v1416_v57 = vmax.f32 %v6913_v53, 0.0  ;;  %v1745_v53 = vld [vmem:[%s9113_s30] sm:$0xf] }
 0x375   : > { %v1417_v58 = vpack.c.bf16 %v1415_v55, %v1413_v54  ;;  %v6362_v54 = vld [vmem:[%s9114_s21 + $0x4] sm:$0xf]  ;;  %v6375_v55 = vld [vmem:[%s9114_s21 + $0x8] sm:$0xf] }
 0x376   : > { %v1418_v59 = vpack.c.bf16 %v1416_v57, %v1414_v56  ;;  %v7191_v56 = vld [vmem:[#allocation10 + $0x54] ss:$8 sps:$4 sm:$0xff]  }
 0x378   : > { %1423 = vmatprep.subr.bf16.mxu0 %v1418_v59  ;;  %1469 = vmatprep.subr.bf16.mxu1 %v1418_v59 }
 0x379   : > { %1424 = vmatpush1.bf16.msra.mxu0 %v1417_v58  ;;  %1470 = vmatpush1.bf16.msra.mxu1 %v1417_v58  ;;  %v7189_v58 = vld [vmem:[#allocation10 + $0x50] ss:$8 sps:$4 sm:$0xff]  }
 0x37a   : > { %1589 = vmatprep.subr.bf16.mxu0 %v8118_v11  ;;  %1702 = vmatprep.subr.bf16.mxu1 %v8118_v11 }
 0x37c   : > { %6327 = vmatmul.mubr.msk.bf16.vlgmr.msra.gmra.mrb[12].mxu0 %vm1024_vm1, %v1419_v60  ;;  %6329 = vmatmul.mubr.msk.bf16.vlgmr.msra.gmra.mrb[4].mxu1 %vm1024_vm1, %v6328_v61  ;;  %v7194_v61 = vld [vmem:[#allocation10 + $0x64] ss:$8 sps:$4 sm:$0xff]  }
 0x37d   : > { %1590 = vmatpush1.bf16.msra.mxu0 %v7156_v62  ;;  %1703 = vmatpush1.bf16.msra.mxu1 %v7157_v63 }
 0x37e   : > { %1591 = vmatprep.subr.bf16.mxu0 %v8118_v11  ;;  %1704 = vmatprep.subr.bf16.mxu1 %v8118_v11 }
 0x381   : > { %1592 = vmatpush1.bf16.msra.mxu0 %v7158_v1  ;;  %1705 = vmatpush1.bf16.msra.mxu1 %v7159_v2  ;;  %v7192_v1 = vld [vmem:[#allocation10 + $0x60] ss:$8 sps:$4 sm:$0xff]   ;;  %v7197_v2 = vld [vmem:[#allocation10 + $0x74] ss:$8 sps:$4 sm:$0xff]  }
 0x382   : > { %1593 = vmatprep.subr.bf16.mxu0 %v8118_v11  ;;  %1706 = vmatprep.subr.bf16.mxu1 %v8118_v11 }
 0x385   : > { %1594 = vmatpush1.bf16.msra.mxu0 %v7160_v3  ;;  %1707 = vmatpush1.bf16.msra.mxu1 %v7161_v4  ;;  %v7195_v3 = vld [vmem:[#allocation10 + $0x70] ss:$8 sps:$4 sm:$0xff]  }
 0x386   : > { %1595 = vmatprep.subr.bf16.mxu0 %v8118_v11  ;;  %1708 = vmatprep.subr.bf16.mxu1 %v8118_v11 }
 0x389   : > { %1596 = vmatpush1.bf16.msra.mxu0 %v7162_v5  ;;  %1709 = vmatpush1.bf16.msra.mxu1 %v7163_v6  ;;  %v7200_v5 = vld [vmem:[#allocation10 + $0x84] ss:$8 sps:$4 sm:$0xff]  }
 0x38a   : > { %1597 = vmatprep.subr.bf16.mxu0 %v8118_v11  ;;  %1710 = vmatprep.subr.bf16.mxu1 %v8118_v11 }
 0x38d   : > { %1598 = vmatpush1.bf16.msra.mxu0 %v7164_v7  ;;  %1711 = vmatpush1.bf16.msra.mxu1 %v7165_v8 }
 0x38e   : > { %1599 = vmatprep.subr.bf16.mxu0 %v8118_v11  ;;  %1712 = vmatprep.subr.bf16.mxu1 %v8118_v11 }
 0x391   : > { %1600 = vmatpush1.bf16.msra.mxu0 %v7166_v9  ;;  %1713 = vmatpush1.bf16.msra.mxu1 %v7167_v10  ;;  %v7198_v9 = vld [vmem:[#allocation10 + $0x80] ss:$8 sps:$4 sm:$0xff]   ;;  %v7203_v10 = vld [vmem:[#allocation10 + $0x94] ss:$8 sps:$4 sm:$0xff]  }
 0x392   : > { %1601 = vmatprep.subr.bf16.mxu0 %v8118_v11  ;;  %1714 = vmatprep.subr.bf16.mxu1 %v8118_v11 }
 0x395   : > { %1602 = vmatpush1.bf16.msra.mxu0 %v7168_v12  ;;  %1715 = vmatpush1.bf16.msra.mxu1 %v7169_v13  ;;  %v7201_v12 = vld [vmem:[#allocation10 + $0x90] ss:$8 sps:$4 sm:$0xff]  }
 0x396   : > { %1603 = vmatprep.subr.bf16.mxu0 %v8118_v11  ;;  %1716 = vmatprep.subr.bf16.mxu1 %v8118_v11 }
 0x399   : > { %1604 = vmatpush1.bf16.msra.mxu0 %v7170_v14  ;;  %1717 = vmatpush1.bf16.msra.mxu1 %v7171_v15  ;;  %v7206_v14 = vld [vmem:[#allocation10 + $0xa4] ss:$8 sps:$4 sm:$0xff]  }
 0x39a   : > { %1605 = vmatprep.subr.bf16.mxu0 %v8118_v11  ;;  %1718 = vmatprep.subr.bf16.mxu1 %v8118_v11 }
 0x39d   : > { %1606 = vmatpush1.bf16.msra.mxu0 %v7172_v16  ;;  %1719 = vmatpush1.bf16.msra.mxu1 %v7173_v17 }
 0x39e   : > { %6856 = vmatprep.subr.bf16.mxu0 %v8116_v0  ;;  %1859 = vmatprep.subr.bf16.mxu1 %v7176_v31  ;;  %v7224_v31 = vld [vmem:[#allocation12 + $0x60] sm:$0xff]  }
 0x44f   : > { %v1457_v18 = vpop.f32.mrb[12].mxu0  ;;  %v1503_v19 = vpop.f32.mrb[4].mxu1 }
 0x450   : > { %v1510_v20 = vmax.f32 %v1457_v18, %v1503_v19  ;;  %v1459_v21 = vpop.f32.mrb[13].mxu0  ;;  %v1505_v22 = vpop.f32.mrb[5].mxu1  ;;  %v7204_v19 = vld [vmem:[#allocation10 + $0xa0] ss:$8 sps:$4 sm:$0xff]  }
 0x451   : > { %v1511_v23 = vmax.f32 %v1459_v21, %v1505_v22  ;;  %v1461_v24 = vpop.f32.mrb[14].mxu0  ;;  %v1507_v25 = vpop.f32.mrb[6].mxu1  ;;  %v7207_v21 = vld [vmem:[#allocation10 + $0xb0] ss:$8 sps:$4 sm:$0xff]   ;;  %v7212_v22 = vld [vmem:[#allocation10 + $0xc4] ss:$8 sps:$4 sm:$0xff]  }
 0x452   : > { %v1462_v26 = vpop.f32.mrb[15].mxu0  ;;  %v1508_v27 = vpop.f32.mrb[7].mxu1  ;;  %v1512_v29 = vpack.c.bf16 %v1510_v20, %v1510_v20  ;;  %v7209_v20 = vld [vmem:[#allocation10 + $0xb4] ss:$8 sps:$4 sm:$0xff]   ;;  %v7213_v25 = vld [vmem:[#allocation10 + $0xd0] ss:$8 sps:$4 sm:$0xff]  }
 0x453   : > { %v1513_v28 = vpack.c.bf16 %v1511_v23, %v1511_v23  ;;  %v7210_v23 = vld [vmem:[#allocation10 + $0xc0] ss:$8 sps:$4 sm:$0xff]   ;;  %v7215_v24 = vld [vmem:[#allocation10 + $0xd4] ss:$8 sps:$4 sm:$0xff]   ;;  %v7218_v26 = vld [vmem:[#allocation10 + $0xe4] ss:$8 sps:$4 sm:$0xff]  }
 0x454   : > { %v7216_v27 = vld [vmem:[#allocation10 + $0xe0] ss:$8 sps:$4 sm:$0xff]  }
 0x455   : > { %6339 = vmatprep.mubr.msk.bf16.mxu0 %vm1024_vm1, %v1513_v28  ;;  %6349 = vmatprep.mubr.msk.bf16.mxu1 %vm1024_vm1, %v1513_v28 }
 0x456   : > { %1622 = vmatmul.mubr.bf16.vlgmr.msra.gmra.mrb[16].mxu0 %v1512_v29  ;;  %1735 = vmatmul.mubr.bf16.vlgmr.msra.gmra.mrb[8].mxu1 %v1512_v29  ;;  %v7220_v29 = vld [vmem:[#allocation12 + $0x50] sm:$0xff]  }
 0x457   : > { %6858 = vmatprep.mubr.msk.bf16.mxu0 %vm8117_vm0, %v8116_v0  ;;  %1891 = vmatprep.mubr.bf16.mxu1 %v8118_v11 }
 0x458   : > { %1860 = vmatpush1.bf16.msra.mxu1 %v7174_v30  ;;  %v7222_v30 = vld [vmem:[#allocation12 + $0x58] sm:$0xff]  }
 0x459   : > { %1861 = vmatprep.subr.bf16.mxu1 %v7179_v32  ;;  %v7226_v32 = vld [vmem:[#allocation12 + $0x68] sm:$0xff]  }
 0x45c   : > { %1862 = vmatpush1.bf16.msra.mxu1 %v7177_v33  ;;  %v7228_v33 = vld [vmem:[#allocation12 + $0x70] sm:$0xff]  }
 0x45d   : > { %1863 = vmatprep.subr.bf16.mxu1 %v7182_v34  ;;  %v7230_v34 = vld [vmem:[#allocation12 + $0x78] sm:$0xff]  }
 0x460   : > { %1864 = vmatpush1.bf16.msra.mxu1 %v7180_v35  ;;  %v1744_v35 = vld [vmem:[%s9115_s12] sm:$0x3] }
 0x461   : > { %1865 = vmatprep.subr.bf16.mxu1 %v7185_v36  ;;  %v1904_v36 = vrot.slane %v1744_v35, %v8691_v41 }
 0x464   : > { %1866 = vmatpush1.bf16.msra.mxu1 %v7183_v37  ;;  %v1908_v37 = vrot.slane %v1744_v35, %v8693_v43 }
 0x465   : > { %1867 = vmatprep.subr.bf16.mxu1 %v7188_v38 }
 0x468   : > { %1868 = vmatpush1.bf16.msra.mxu1 %v7186_v39 }
 0x469   : > { %2023 = vmatprep.subr.bf16.mxu1 %v7191_v56  ;;  %v7225_v56 = vld [vmem:[#allocation12 + $0x18] sm:$0xff]  }
 0x529   : > { %v1623_v40 = vpop.f32.mrb[16].mxu0  ;;  %v1736_v42 = vpop.f32.mrb[8].mxu1 }
 0x52a   : > { %v1742_v44 = vmax.f32 %v1623_v40, %v1736_v42  ;;  %v1625_v45 = vpop.f32.mrb[17].mxu0  ;;  %v1738_v46 = vpop.f32.mrb[9].mxu1 }
 0x52b   : > { %v1626_v47 = vpop.f32.mrb[18].mxu0  ;;  %v1739_v48 = vpop.f32.mrb[10].mxu1 }
 0x52c   : > { %v1743_v49 = vpack.c.bf16 %v1742_v44, %v1742_v44  ;;  %v1627_v50 = vpop.f32.mrb[19].mxu0  ;;  %v1740_v51 = vpop.f32.mrb[11].mxu1 }
 0x52d   : > { %v2223_v51 = vld [vmem:[%s9116_s0] sm:$0x3] }
 0x52e   : > { %v1752_v52 = vsel %vm1750_vm4, %v1743_v49, 0 }
 0x52f   : > { %6857 = vmatpush3.bf16.msra.mxu0 %v1752_v52 }
 0x530   : > { %6862 = vmatprep.subr.bf16.mxu0 %v8116_v0 }
 0x532   : > { %6859 = vmatmul.mubr.msk.bf16.vlgmr.msra.gmra.mrb[20].mxu0 %vm1746_vm5, %v1745_v53  ;;  %v7219_v53 = vld [vmem:[#allocation12] sm:$0xff]  }
 0x533   : > { %6863 = vmatpush3.bf16.msra.mxu0 %v1752_v52  ;;  %6864 = vmatprep.mubr.msk.bf16.mxu0 %vm8117_vm0, %v8116_v0 }
 0x534   : > { %6868 = vmatprep.subr.bf16.mxu0 %v8116_v0 }
 0x53a   : > { %6865 = vmatmul.mubr.msk.bf16.vlgmr.msra.gmra.mrb[24].mxu0 %vm1746_vm5, %v6362_v54  ;;  %v7221_v54 = vld [vmem:[#allocation12 + $0x8] sm:$0xff]  }
 0x53b   : > { %6869 = vmatpush3.bf16.msra.mxu0 %v1752_v52  ;;  %6870 = vmatprep.mubr.msk.bf16.mxu0 %vm8117_vm0, %v8116_v0  ;;  %v6390_v52 = vld [vmem:[%s9116_s0 + $0x2] sm:$0x3] }
 0x542   : > { %6871 = vmatmul.mubr.msk.bf16.vlgmr.msra.gmra.mrb[28].mxu0 %vm1746_vm5, %v6375_v55  ;;  %v7223_v55 = vld [vmem:[#allocation12 + $0x10] sm:$0xff]  }
 0x543   : > { %2265 = vmatprep.mubr.bf16.mxu0 %v8118_v11 }
 0x605   : > { %v1788_v57 = vpop.f32.mrb[20].mxu0 }
 0x606   : > { %v1794_v59 = vpack.c.bf16 %v1788_v57, %v1788_v57  ;;  %v6860_v60 = vpop.f32.mrb[21].mxu0  ;;  %v7227_v57 = vld [vmem:[#allocation12 + $0x20] sm:$0xff]  }
 0x607   : > { %v1791_v62 = vpop.f32.mrb[22].mxu0  ;;  %v7232_v60 = vld [vmem:[#allocation12 + $0x80] sm:$0xff]  }
 0x608   : > { %v6861_v63 = vpop.f32.mrb[23].mxu0  ;;  %6361 = vmatmul.mubr.msk.bf16.vlgmr.msra.gmra.mrb[12].mxu1 %vm1855_vm6, %v1794_v59  ;;  %v7231_v59 = vld [vmem:[#allocation12 + $0x30] sm:$0xff]   ;;  %v7234_v62 = vld [vmem:[#allocation12 + $0x88] sm:$0xff]  }
 0x609   : > { %2024 = vmatpush1.bf16.msra.mxu1 %v7189_v58  ;;  %2055 = vmatprep.mubr.bf16.mxu1 %v8118_v11  ;;  %v7229_v58 = vld [vmem:[#allocation12 + $0x28] sm:$0xff]   ;;  %v7235_v63 = vld [vmem:[#allocation12 + $0x40] sm:$0xff]  }
 0x60a   : > { %2025 = vmatprep.subr.bf16.mxu1 %v7194_v61  ;;  %v7233_v61 = vld [vmem:[#allocation12 + $0x38] sm:$0xff]  }
 0x60d   : > { %2026 = vmatpush1.bf16.msra.mxu1 %v7192_v1  ;;  %v1952_v4 = vpop.f32.mrb[24].mxu0  ;;  %v7236_v1 = vld [vmem:[#allocation12 + $0x90] sm:$0xff]  }
 0x60e   : > { %2027 = vmatprep.subr.bf16.mxu1 %v7197_v2  ;;  %v6866_v6 = vpop.f32.mrb[25].mxu0  ;;  %v1958_v17 = vpack.c.bf16 %v1952_v4, %v1952_v4  ;;  %v7237_v2 = vld [vmem:[#allocation12 + $0x48] sm:$0xff]  }
 0x60f   : > { %v1955_v7 = vpop.f32.mrb[26].mxu0 }
 0x610   : > { %v6867_v8 = vpop.f32.mrb[27].mxu0 }
 0x611   : > { %2028 = vmatpush1.bf16.msra.mxu1 %v7195_v3  ;;  %v7238_v3 = vld [vmem:[#allocation12 + $0x98] sm:$0xff]  }
 0x612   : > { %2029 = vmatprep.subr.bf16.mxu1 %v7200_v5 }
 0x615   : > { %2030 = vmatpush1.bf16.msra.mxu1 %v7198_v9  ;;  %v2105_v13 = vpop.f32.mrb[28].mxu0 }
 0x616   : > { %2031 = vmatprep.subr.bf16.mxu1 %v7203_v10  ;;  %v6872_v15 = vpop.f32.mrb[29].mxu0  ;;  %v2111_v28 = vpack.c.bf16 %v2105_v13, %v2105_v13 }
 0x617   : > { %v2108_v16 = vpop.f32.mrb[30].mxu0 }
 0x618   : > { %v6873_v18 = vpop.f32.mrb[31].mxu0 }
 0x619   : > { %2032 = vmatpush1.bf16.msra.mxu1 %v7201_v12  ;;  %v7241_v18 = vld [vmem:[#allocation13 + $0x4] ss:$8 sps:$4 sm:$0xff]  }
 0x61a   : > { %2176 = vmatprep.subr.bf16.mxu1 %v7206_v14 }
 0x61c   : > { %6374 = vmatmul.mubr.msk.bf16.vlgmr.msra.gmra.mrb[12].mxu1 %vm1855_vm6, %v1958_v17  ;;  %v7239_v17 = vld [vmem:[#allocation13] ss:$8 sps:$4 sm:$0xff]  }
 0x61d   : > { %2177 = vmatpush1.bf16.msra.mxu1 %v7204_v19  ;;  %2208 = vmatprep.mubr.bf16.mxu1 %v8118_v11  ;;  %v7244_v19 = vld [vmem:[#allocation13 + $0x14] ss:$8 sps:$4 sm:$0xff]  }
 0x61e   : > { %2178 = vmatprep.subr.bf16.mxu1 %v7209_v20  ;;  %v7242_v20 = vld [vmem:[#allocation13 + $0x10] ss:$8 sps:$4 sm:$0xff]  }
 0x621   : > { %2179 = vmatpush1.bf16.msra.mxu1 %v7207_v21  ;;  %v7247_v21 = vld [vmem:[#allocation13 + $0x24] ss:$8 sps:$4 sm:$0xff]  }
 0x622   : > { %2180 = vmatprep.subr.bf16.mxu1 %v7212_v22  ;;  %v7245_v22 = vld [vmem:[#allocation13 + $0x20] ss:$8 sps:$4 sm:$0xff]  }
 0x625   : > { %2181 = vmatpush1.bf16.msra.mxu1 %v7210_v23  ;;  %v7250_v23 = vld [vmem:[#allocation13 + $0x34] ss:$8 sps:$4 sm:$0xff]  }
 0x626   : > { %2182 = vmatprep.subr.bf16.mxu1 %v7215_v24  ;;  %v7248_v24 = vld [vmem:[#allocation13 + $0x30] ss:$8 sps:$4 sm:$0xff]  }
 0x629   : > { %2183 = vmatpush1.bf16.msra.mxu1 %v7213_v25  ;;  %v7253_v25 = vld [vmem:[#allocation13 + $0x44] ss:$8 sps:$4 sm:$0xff]  }
 0x62a   : > { %2184 = vmatprep.subr.bf16.mxu1 %v7218_v26  ;;  %v7251_v26 = vld [vmem:[#allocation13 + $0x40] ss:$8 sps:$4 sm:$0xff]  }
 0x62d   : > { %2185 = vmatpush1.bf16.msra.mxu1 %v7216_v27  ;;  %v7256_v27 = vld [vmem:[#allocation13 + $0x54] ss:$8 sps:$4 sm:$0xff]  }
 0x62e   : > { %2529 = vmatprep.subr.bf16.mxu1 %v8118_v11 }
 0x630   : > { %6387 = vmatmul.mubr.msk.bf16.vlgmr.msra.gmra.mrb[12].mxu1 %vm1855_vm6, %v2111_v28  ;;  %v7254_v28 = vld [vmem:[#allocation13 + $0x50] ss:$8 sps:$4 sm:$0xff]  }
 0x631   : > { %2530 = vmatpush1.bf16.msra.mxu1 %v7220_v29 }
 0x632   : > { %2531 = vmatprep.subr.bf16.mxu1 %v8118_v11 }
 0x635   : > { %2532 = vmatpush1.bf16.msra.mxu1 %v7222_v30 }
 0x636   : > { %2533 = vmatprep.subr.bf16.mxu1 %v8118_v11 }
 0x639   : > { %2534 = vmatpush1.bf16.msra.mxu1 %v7224_v31 }
 0x63a   : > { %2535 = vmatprep.subr.bf16.mxu1 %v8118_v11 }
 0x63d   : > { %2536 = vmatpush1.bf16.msra.mxu1 %v7226_v32 }
 0x63e   : > { %2537 = vmatprep.subr.bf16.mxu1 %v8118_v11 }
 0x641   : > { %2538 = vmatpush1.bf16.msra.mxu1 %v7228_v33 }
 0x642   : > { %2539 = vmatprep.subr.bf16.mxu1 %v8118_v11 }
 0x645   : > { %2540 = vmatpush1.bf16.msra.mxu1 %v7230_v34 }
 0x646   : > { %2541 = vmatprep.subr.bf16.mxu1 %v8118_v11 }
 0x649   : > { %2542 = vmatpush1.bf16.msra.mxu1 %v7232_v60  ;;  %v7274_v60 = vld [vmem:[#allocation13 + $0xb4] ss:$8 sps:$4 sm:$0xff]  }
 0x64a   : > { %2543 = vmatprep.subr.bf16.mxu1 %v8118_v11 }
 0x64d   : > { %2544 = vmatpush1.bf16.msra.mxu1 %v7234_v62  ;;  %v7277_v62 = vld [vmem:[#allocation13 + $0xc4] ss:$8 sps:$4 sm:$0xff]  }
 0x64e   : > { %2545 = vmatprep.subr.bf16.mxu1 %v8118_v11 }
 0x651   : > { %2546 = vmatpush1.bf16.msra.mxu1 %v7236_v1 }
 0x652   : > { %2547 = vmatprep.subr.bf16.mxu1 %v8118_v11 }
 0x655   : > { %2548 = vmatpush1.bf16.msra.mxu1 %v7238_v3 }
 0x656   : > { %2698 = vmatprep.subr.bf16.mxu1 %v7241_v18 }
 0x703   : > { %v2210_v38 = vpop.f32.mrb[12].mxu1 }
 0x704   : > { %v6914_v39 = vadd.f32 %v2210_v38, %v1904_v36  ;;  %v2212_v40 = vpop.f32.mrb[13].mxu1 }
 0x705   : > { %v6915_v42 = vadd.f32 %v2212_v40, %v1908_v37  ;;  %v2214_v44 = vpop.f32.mrb[14].mxu1  ;;  %v2572_v40 = vld [vmem:[%s9117_s13] sm:$0x3] }
 0x706   : > { %v2219_v45 = vmax.f32 %v6914_v39, 0.0  ;;  %v2215_v46 = vpop.f32.mrb[15].mxu1  ;;  %v7259_v44 = vld [vmem:[#allocation13 + $0x64] ss:$8 sps:$4 sm:$0xff]  }
 0x707   : > { %v2220_v47 = vmax.f32 %v6915_v42, 0.0  ;;  %v7257_v42 = vld [vmem:[#allocation13 + $0x60] ss:$8 sps:$4 sm:$0xff]   ;;  %v7260_v46 = vld [vmem:[#allocation13 + $0x70] ss:$8 sps:$4 sm:$0xff]  }
 0x708   : > { %v2221_v48 = vpack.c.bf16 %v2219_v45, %v2219_v45  ;;  %v7262_v45 = vld [vmem:[#allocation13 + $0x74] ss:$8 sps:$4 sm:$0xff]  }
 0x709   : > { %v2222_v49 = vpack.c.bf16 %v2220_v47, %v2220_v47  ;;  %v7265_v47 = vld [vmem:[#allocation13 + $0x84] ss:$8 sps:$4 sm:$0xff]  }
 0x70a   : > { %v2228_v50 = vsel %vm1750_vm4, %v2221_v48, 0  ;;  %v7263_v48 = vld [vmem:[#allocation13 + $0x80] ss:$8 sps:$4 sm:$0xff]  }
 0x70b   : > { %6388 = vmatprep.subr.msk.bf16.mxu0 %vm1750_vm4, %v2222_v49 }
 0x70c   : > { %2234 = vmatpush1.bf16.msra.mxu0 %v2228_v50 }
 0x70d   : > { %6391 = vmatprep.subr.msk.bf16.mxu0 %vm1750_vm4, %v2222_v49  ;;  %v7268_v49 = vld [vmem:[#allocation13 + $0x94] ss:$8 sps:$4 sm:$0xff]  }
 0x70f   : > { %6389 = vmatmul.mubr.msk.bf16.vlgmr.msra.gmra.mrb[32].mxu0 %vm1746_vm5, %v2223_v51 }
 0x710   : > { %2280 = vmatpush1.bf16.msra.mxu0 %v2228_v50  ;;  %2311 = vmatprep.mubr.bf16.mxu0 %v8118_v11  ;;  %v7266_v50 = vld [vmem:[#allocation13 + $0x90] ss:$8 sps:$4 sm:$0xff]  }
 0x711   : > { %2408 = vmatprep.subr.bf16.mxu0 %v8118_v11 }
 0x717   : > { %6392 = vmatmul.mubr.msk.bf16.vlgmr.msra.gmra.mrb[36].mxu0 %vm1746_vm5, %v6390_v52 }
 0x718   : > { %2409 = vmatpush1.bf16.msra.mxu0 %v7219_v53 }
 0x719   : > { %2410 = vmatprep.subr.bf16.mxu0 %v8118_v11 }
 0x71c   : > { %2411 = vmatpush1.bf16.msra.mxu0 %v7221_v54 }
 0x71d   : > { %2412 = vmatprep.subr.bf16.mxu0 %v8118_v11 }
 0x720   : > { %2413 = vmatpush1.bf16.msra.mxu0 %v7223_v55 }
 0x721   : > { %2414 = vmatprep.subr.bf16.mxu0 %v8118_v11 }
 0x724   : > { %2415 = vmatpush1.bf16.msra.mxu0 %v7225_v56  ;;  %v6429_v56 = vld [vmem:[%s9117_s13 + $0x2] sm:$0x3] }
 0x725   : > { %2416 = vmatprep.subr.bf16.mxu0 %v8118_v11 }
 0x728   : > { %2417 = vmatpush1.bf16.msra.mxu0 %v7227_v57  ;;  %v6444_v57 = vld [vmem:[%s9117_s13 + $0x4] sm:$0x3] }
 0x729   : > { %2418 = vmatprep.subr.bf16.mxu0 %v8118_v11 }
 0x72c   : > { %2419 = vmatpush1.bf16.msra.mxu0 %v7229_v58  ;;  %v7271_v58 = vld [vmem:[#allocation13 + $0xa4] ss:$8 sps:$4 sm:$0xff]  }
 0x72d   : > { %2420 = vmatprep.subr.bf16.mxu0 %v8118_v11 }
 0x730   : > { %2421 = vmatpush1.bf16.msra.mxu0 %v7231_v59  ;;  %v7269_v59 = vld [vmem:[#allocation13 + $0xa0] ss:$8 sps:$4 sm:$0xff]  }
 0x731   : > { %2422 = vmatprep.subr.bf16.mxu0 %v8118_v11 }
 0x734   : > { %2423 = vmatpush1.bf16.msra.mxu0 %v7233_v61  ;;  %v7272_v61 = vld [vmem:[#allocation13 + $0xb0] ss:$8 sps:$4 sm:$0xff]  }
 0x735   : > { %2424 = vmatprep.subr.bf16.mxu0 %v8118_v11 }
 0x738   : > { %2425 = vmatpush1.bf16.msra.mxu0 %v7235_v63 }
 0x739   : > { %2426 = vmatprep.subr.bf16.mxu0 %v8118_v11 }
 0x73c   : > { %2427 = vmatpush1.bf16.msra.mxu0 %v7237_v2 }
 0x73d   : > { %6874 = vmatprep.subr.bf16.mxu0 %v8116_v0 }
 0x7e2   : > { %v2267_v4 = vpop.f32.mrb[32].mxu0 }
 0x7e3   : > { %v2269_v5 = vpop.f32.mrb[33].mxu0 }
 0x7e4   : > { %v2271_v6 = vpop.f32.mrb[34].mxu0 }
 0x7e5   : > { %v2272_v7 = vpop.f32.mrb[35].mxu0 }
 0x7ea   : > { %v2313_v8 = vpop.f32.mrb[36].mxu0 }
 0x7eb   : > { %v2320_v9 = vmax.f32 %v2267_v4, %v2313_v8  ;;  %v2315_v10 = vpop.f32.mrb[37].mxu0  ;;  %v7280_v8 = vld [vmem:[#allocation13 + $0xd4] ss:$8 sps:$4 sm:$0xff]  }
 0x7ec   : > { %v2321_v12 = vmax.f32 %v2269_v5, %v2315_v10  ;;  %v2317_v13 = vpop.f32.mrb[38].mxu0  ;;  %v7275_v5 = vld [vmem:[#allocation13 + $0xc0] ss:$8 sps:$4 sm:$0xff]  }
 0x7ed   : > { %v2318_v14 = vpop.f32.mrb[39].mxu0  ;;  %v2322_v16 = vpack.c.bf16 %v2320_v9, %v2320_v9  ;;  %v7283_v13 = vld [vmem:[#allocation13 + $0xe4] ss:$8 sps:$4 sm:$0xff]  }
 0x7ee   : > { %v2323_v15 = vpack.c.bf16 %v2321_v12, %v2321_v12  ;;  %v7278_v12 = vld [vmem:[#allocation13 + $0xd0] ss:$8 sps:$4 sm:$0xff]   ;;  %v7281_v14 = vld [vmem:[#allocation13 + $0xe0] ss:$8 sps:$4 sm:$0xff]  }
 0x7f0   : > { %6403 = vmatprep.mubr.msk.bf16.mxu0 %vm2404_vm7, %v2323_v15  ;;  %6414 = vmatprep.mubr.msk.bf16.mxu1 %vm2404_vm7, %v2323_v15 }
 0x7f1   : > { %2441 = vmatmul.mubr.bf16.vlgmr.msra.gmra.mrb[40].mxu0 %v2322_v16  ;;  %2562 = vmatmul.mubr.bf16.vlgmr.msra.gmra.mrb[16].mxu1 %v2322_v16  ;;  %v7286_v16 = vld [vmem:[#allocation13 + $0xf4] ss:$8 sps:$4 sm:$0xff]  }
 0x7f2   : > { %6876 = vmatprep.mubr.msk.bf16.mxu0 %vm8117_vm0, %v8116_v0  ;;  %2730 = vmatprep.mubr.bf16.mxu1 %v8118_v11 }
 0x7f3   : > { %2699 = vmatpush1.bf16.msra.mxu1 %v7239_v17 }
 0x7f4   : > { %2700 = vmatprep.subr.bf16.mxu1 %v7244_v19 }
 0x7f7   : > { %2701 = vmatpush1.bf16.msra.mxu1 %v7242_v20  ;;  %v7284_v20 = vld [vmem:[#allocation13 + $0xf0] ss:$8 sps:$4 sm:$0xff]  }
 0x7f8   : > { %2702 = vmatprep.subr.bf16.mxu1 %v7247_v21  ;;  %v7289_v21 = vld [vmem:[#allocation13 + $0x104] ss:$8 sps:$4 sm:$0xff]  }
 0x7fb   : > { %2703 = vmatpush1.bf16.msra.mxu1 %v7245_v22  ;;  %v7287_v22 = vld [vmem:[#allocation13 + $0x100] ss:$8 sps:$4 sm:$0xff]  }
 0x7fc   : > { %2704 = vmatprep.subr.bf16.mxu1 %v7250_v23  ;;  %v7292_v23 = vld [vmem:[#allocation13 + $0x114] ss:$8 sps:$4 sm:$0xff]  }
 0x7ff   : > { %2705 = vmatpush1.bf16.msra.mxu1 %v7248_v24  ;;  %v7290_v24 = vld [vmem:[#allocation13 + $0x110] ss:$8 sps:$4 sm:$0xff]  }
 0x800   : > { %2706 = vmatprep.subr.bf16.mxu1 %v7253_v25 }
 0x803   : > { %2707 = vmatpush1.bf16.msra.mxu1 %v7251_v26  ;;  %v2571_v26 = vld [vmem:[%s9118_s2] sm:$0x3]  ;;  %s9122_s2 = smov %s9121_s7 }
 0x804   : > { %2708 = vmatprep.subr.bf16.mxu1 %v7256_v27  ;;  %v2743_v27 = vrot.slane %v2571_v26, %v8691_v41 }
 0x807   : > { %2709 = vmatpush1.bf16.msra.mxu1 %v7254_v28  ;;  %v2747_v28 = vrot.slane %v2571_v26, %v8693_v43 }
 0x808   : > { %6880 = vmatprep.subr.bf16.mxu1 %v8116_v0 }
 0x8c4   : > { %v2442_v29 = vpop.f32.mrb[40].mxu0  ;;  %v2563_v30 = vpop.f32.mrb[16].mxu1 }
 0x8c5   : > { %v2569_v31 = vmax.f32 %v2442_v29, %v2563_v30  ;;  %v2444_v32 = vpop.f32.mrb[41].mxu0  ;;  %v2565_v33 = vpop.f32.mrb[17].mxu1 }
 0x8c6   : > { %v2445_v34 = vpop.f32.mrb[42].mxu0  ;;  %v2566_v35 = vpop.f32.mrb[18].mxu1 }
 0x8c7   : > { %v2570_v36 = vpack.c.bf16 %v2569_v31, %v2569_v31  ;;  %v2446_v37 = vpop.f32.mrb[43].mxu0  ;;  %v2567_v38 = vpop.f32.mrb[19].mxu1 }
 0x8c9   : > { %v2579_v39 = vsel %vm2577_vm8, %v2570_v36, 0 }
 0x8ca   : > { %6875 = vmatpush3.bf16.msra.mxu0 %v2579_v39 }
 0x8cb   : > { %2874 = vmatprep.subr.bf16.mxu0 %v7259_v44 }
 0x8cd   : > { %6877 = vmatmul.mubr.msk.bf16.vlgmr.msra.gmra.mrb[44].mxu0 %vm2573_vm9, %v2572_v40 }
 0x8ce   : > { %2906 = vmatprep.mubr.bf16.mxu0 %v8118_v11  ;;  %2875 = vmatpush1.bf16.msra.mxu0 %v7257_v42  ;;  %v7295_v42 = vld [vmem:[#allocation15 + $0x4] ss:$8 sps:$4 sm:$0xff]  }
 0x8cf   : > { %2876 = vmatprep.subr.bf16.mxu0 %v7262_v45  ;;  %v3087_v45 = vld [vmem:[%s9119_s23] sm:$0x3] }
 0x8d2   : > { %2877 = vmatpush1.bf16.msra.mxu0 %v7260_v46  ;;  %v6486_v46 = vld [vmem:[%s9119_s23 + $0x2] sm:$0x3] }
 0x8d3   : > { %2878 = vmatprep.subr.bf16.mxu0 %v7265_v47  ;;  %v7293_v47 = vld [vmem:[#allocation15] ss:$8 sps:$4 sm:$0xff]  }
 0x8d6   : > { %2879 = vmatpush1.bf16.msra.mxu0 %v7263_v48  ;;  %v7298_v48 = vld [vmem:[#allocation15 + $0x14] ss:$8 sps:$4 sm:$0xff]  }
 0x8d7   : > { %2880 = vmatprep.subr.bf16.mxu0 %v7268_v49  ;;  %v7296_v49 = vld [vmem:[#allocation15 + $0x10] ss:$8 sps:$4 sm:$0xff]  }
 0x8da   : > { %2881 = vmatpush1.bf16.msra.mxu0 %v7266_v50  ;;  %v7301_v50 = vld [vmem:[#allocation15 + $0x24] ss:$8 sps:$4 sm:$0xff]  }
 0x8db   : > { %2882 = vmatprep.subr.bf16.mxu0 %v7271_v58  ;;  %v7308_v58 = vld [vmem:[#allocation15 + $0x50] ss:$8 sps:$4 sm:$0xff]  }
 0x8de   : > { %2883 = vmatpush1.bf16.msra.mxu0 %v7269_v59  ;;  %v7313_v59 = vld [vmem:[#allocation15 + $0x64] ss:$8 sps:$4 sm:$0xff]  }
 0x8df   : > { %2884 = vmatprep.subr.bf16.mxu0 %v7274_v60  ;;  %v7311_v60 = vld [vmem:[#allocation15 + $0x60] ss:$8 sps:$4 sm:$0xff]  }
 0x8e2   : > { %2885 = vmatpush1.bf16.msra.mxu0 %v7272_v61  ;;  %v7316_v61 = vld [vmem:[#allocation15 + $0x74] ss:$8 sps:$4 sm:$0xff]  }
 0x8e3   : > { %3039 = vmatprep.subr.bf16.mxu0 %v7277_v62  ;;  %v7314_v62 = vld [vmem:[#allocation15 + $0x70] ss:$8 sps:$4 sm:$0xff]  }
 0x9a0   : > { %v2615_v51 = vpop.f32.mrb[44].mxu0 }
 0x9a1   : > { %v2621_v52 = vpack.c.bf16 %v2615_v51, %v2615_v51  ;;  %v6878_v53 = vpop.f32.mrb[45].mxu0  ;;  %v6514_v51 = vld [vmem:[%s9119_s23 + $0x4] sm:$0x3] }
 0x9a2   : > { %v2618_v54 = vpop.f32.mrb[46].mxu0  ;;  %v7304_v53 = vld [vmem:[#allocation15 + $0x34] ss:$8 sps:$4 sm:$0xff]  }
 0x9a3   : > { %v6879_v55 = vpop.f32.mrb[47].mxu0  ;;  %6428 = vmatmul.mubr.msk.bf16.vlgmr.msra.gmra.mrb[20].mxu1 %vm2694_vm10, %v2621_v52  ;;  %v7299_v52 = vld [vmem:[#allocation15 + $0x20] ss:$8 sps:$4 sm:$0xff]   ;;  %v7302_v54 = vld [vmem:[#allocation15 + $0x30] ss:$8 sps:$4 sm:$0xff]  }
 0x9a4   : > { %6881 = vmatpush3.bf16.msra.mxu1 %v2579_v39  ;;  %6882 = vmatprep.mubr.msk.bf16.mxu1 %vm8117_vm0, %v8116_v0  ;;  %v7307_v55 = vld [vmem:[#allocation15 + $0x44] ss:$8 sps:$4 sm:$0xff]  }
 0x9a5   : > { %6886 = vmatprep.subr.bf16.mxu1 %v8116_v0 }
 0x9ab   : > { %6883 = vmatmul.mubr.msk.bf16.vlgmr.msra.gmra.mrb[24].mxu1 %vm2573_vm9, %v6429_v56  ;;  %v7305_v56 = vld [vmem:[#allocation15 + $0x40] ss:$8 sps:$4 sm:$0xff]  }
 0x9ac   : > { %6887 = vmatpush3.bf16.msra.mxu1 %v2579_v39  ;;  %6888 = vmatprep.mubr.msk.bf16.mxu1 %vm8117_vm0, %v8116_v0 }
 0x9b3   : > { %6889 = vmatmul.mubr.msk.bf16.vlgmr.msra.gmra.mrb[28].mxu1 %vm2573_vm9, %v6444_v57  ;;  %v7310_v57 = vld [vmem:[#allocation15 + $0x54] ss:$8 sps:$4 sm:$0xff]  }
 0x9b4   : > { %3129 = vmatprep.mubr.bf16.mxu1 %v8118_v11 }
 0xa76   : > { %v2732_v63 = vpop.f32.mrb[20].mxu1 }
 0xa77   : > { %v2734_v1 = vpop.f32.mrb[21].mxu1  ;;  %v2750_v29 = vadd.f32 %v2743_v27, %v2732_v63  ;;  %v7319_v63 = vld [vmem:[#allocation15 + $0x84] ss:$8 sps:$4 sm:$0xff]   ;;  %v7335_v27 = vld [vmem:[#allocation15 + $0xe0] ss:$8 sps:$4 sm:$0xff]  }
 0xa78   : > { %v2736_v2 = vpop.f32.mrb[22].mxu1  ;;  %v2751_v30 = vadd.f32 %v2747_v28, %v2734_v1  ;;  %v7317_v1 = vld [vmem:[#allocation15 + $0x80] ss:$8 sps:$4 sm:$0xff]  }
 0xa79   : > { %v2737_v3 = vpop.f32.mrb[23].mxu1  ;;  %v7322_v2 = vld [vmem:[#allocation15 + $0x94] ss:$8 sps:$4 sm:$0xff]  }
 0xa7a   : > { %v7320_v3 = vld [vmem:[#allocation15 + $0x90] ss:$8 sps:$4 sm:$0xff]  }
 0xa7e   : > { %v2791_v4 = vpop.f32.mrb[24].mxu1 }
 0xa7f   : > { %v2797_v6 = vpack.c.bf16 %v2791_v4, %v2791_v4  ;;  %v6884_v7 = vpop.f32.mrb[25].mxu1  ;;  %v7325_v4 = vld [vmem:[#allocation15 + $0xa4] ss:$8 sps:$4 sm:$0xff]  }
 0xa80   : > { %v2794_v9 = vpop.f32.mrb[26].mxu1  ;;  %v7326_v7 = vld [vmem:[#allocation15 + $0xb0] ss:$8 sps:$4 sm:$0xff]  }
 0xa81   : > { %v6885_v10 = vpop.f32.mrb[27].mxu1  ;;  %6443 = vmatmul.mubr.msk.bf16.vlgmr.msra.gmra.mrb[48].mxu0 %vm2694_vm10, %v2797_v6  ;;  %v7328_v6 = vld [vmem:[#allocation15 + $0xb4] ss:$8 sps:$4 sm:$0xff]  }
 0xa82   : > { %3040 = vmatpush1.bf16.msra.mxu0 %v7275_v5  ;;  %3071 = vmatprep.mubr.bf16.mxu0 %v8118_v11  ;;  %v7323_v5 = vld [vmem:[#allocation15 + $0xa0] ss:$8 sps:$4 sm:$0xff]  }
 0xa83   : > { %3041 = vmatprep.subr.bf16.mxu0 %v7280_v8  ;;  %v7331_v8 = vld [vmem:[#allocation15 + $0xc4] ss:$8 sps:$4 sm:$0xff]  }
 0xa86   : > { %3042 = vmatpush1.bf16.msra.mxu0 %v7278_v12  ;;  %v2956_v15 = vpop.f32.mrb[28].mxu1 }
 0xa87   : > { %3043 = vmatprep.subr.bf16.mxu0 %v7283_v13  ;;  %v6890_v17 = vpop.f32.mrb[29].mxu1  ;;  %v2962_v25 = vpack.c.bf16 %v2956_v15, %v2956_v15 }
 0xa88   : > { %v2959_v18 = vpop.f32.mrb[30].mxu1 }
 0xa89   : > { %v6891_v19 = vpop.f32.mrb[31].mxu1 }
 0xa8a   : > { %3044 = vmatpush1.bf16.msra.mxu0 %v7281_v14 }
 0xa8b   : > { %3045 = vmatprep.subr.bf16.mxu0 %v7286_v16  ;;  %v7329_v16 = vld [vmem:[#allocation15 + $0xc0] ss:$8 sps:$4 sm:$0xff]  }
 0xa8e   : > { %3046 = vmatpush1.bf16.msra.mxu0 %v7284_v20 }
 0xa8f   : > { %3047 = vmatprep.subr.bf16.mxu0 %v7289_v21  ;;  %v7334_v21 = vld [vmem:[#allocation15 + $0xd4] ss:$8 sps:$4 sm:$0xff]  }
 0xa92   : > { %3048 = vmatpush1.bf16.msra.mxu0 %v7287_v22 }
 0xa93   : > { %3049 = vmatprep.subr.bf16.mxu0 %v7292_v23  ;;  %v7332_v23 = vld [vmem:[#allocation15 + $0xd0] ss:$8 sps:$4 sm:$0xff]  }
 0xa96   : > { %3050 = vmatpush1.bf16.msra.mxu0 %v7290_v24  ;;  %v7337_v24 = vld [vmem:[#allocation15 + $0xe4] ss:$8 sps:$4 sm:$0xff]  }
 0xa99   : > { %6458 = vmatmul.mubr.msk.bf16.vlgmr.msra.gmra.mrb[48].mxu0 %vm2694_vm10, %v2962_v25 }
 0xa9a   : > { %3379 = vmatprep.mubr.bf16.mxu0 %v8118_v11 }
 0xb6c   : > { %v3073_v31 = vpop.f32.mrb[48].mxu0 }
 0xb6d   : > { %v6917_v32 = vadd.f32 %v3073_v31, %v2750_v29  ;;  %v3075_v33 = vpop.f32.mrb[49].mxu0  ;;  %v7340_v29 = vld [vmem:[#allocation15 + $0xf4] ss:$8 sps:$4 sm:$0xff]   ;;  %v7338_v31 = vld [vmem:[#allocation15 + $0xf0] ss:$8 sps:$4 sm:$0xff]  }
 0xb6e   : > { %v6919_v34 = vadd.f32 %v3075_v33, %v2751_v30  ;;  %v3077_v35 = vpop.f32.mrb[50].mxu0  ;;  %v7341_v33 = vld [vmem:[#allocation15 + $0x100] ss:$8 sps:$4 sm:$0xff]  }
 0xb6f   : > { %v3082_v36 = vmax.f32 %v6917_v32, 0.0  ;;  %v3078_v37 = vpop.f32.mrb[51].mxu0  ;;  %v7343_v32 = vld [vmem:[#allocation15 + $0x104] ss:$8 sps:$4 sm:$0xff]   ;;  %v7344_v35 = vld [vmem:[#allocation15 + $0x110] ss:$8 sps:$4 sm:$0xff]  }
 0xb70   : > { %v3083_v38 = vmax.f32 %v6919_v34, 0.0  ;;  %v7346_v34 = vld [vmem:[#allocation15 + $0x114] ss:$8 sps:$4 sm:$0xff]   ;;  %v7347_v37 = vld [vmem:[#allocation15 + $0x120] ss:$8 sps:$4 sm:$0xff]  }
 0xb71   : > { %v3084_v39 = vpack.c.bf16 %v3082_v36, %v3082_v36  ;;  %v7349_v36 = vld [vmem:[#allocation15 + $0x124] ss:$8 sps:$4 sm:$0xff]  }
 0xb72   : > { %v3085_v40 = vpack.c.bf16 %v3083_v38, %v3083_v38  ;;  %v7352_v38 = vld [vmem:[#allocation15 + $0x134] ss:$8 sps:$4 sm:$0xff]  }
 0xb73   : > { %v3092_v44 = vsel %vm2577_vm8, %v3084_v39, 0  ;;  %v7350_v39 = vld [vmem:[#allocation15 + $0x130] ss:$8 sps:$4 sm:$0xff]  }
 0xb74   : > { %6459 = vmatprep.subr.msk.bf16.mxu1 %vm2577_vm8, %v3085_v40  ;;  %6487 = vmatprep.subr.msk.bf16.mxu0 %vm2577_vm8, %v3085_v40 }
 0xb75   : > { %3098 = vmatpush1.bf16.msra.mxu1 %v3092_v44  ;;  %3348 = vmatpush1.bf16.msra.mxu0 %v3092_v44 }
 0xb76   : > { %6515 = vmatprep.subr.msk.bf16.mxu0 %vm2577_vm8, %v3085_v40  ;;  %3288 = vmatprep.subr.bf16.mxu1 %v7295_v42  ;;  %v7355_v40 = vld [vmem:[#allocation15 + $0x144] ss:$8 sps:$4 sm:$0xff]   ;;  %v7353_v42 = vld [vmem:[#allocation15 + $0x140] ss:$8 sps:$4 sm:$0xff]  }
 0xb78   : > { %6460 = vmatmul.mubr.msk.bf16.vlgmr.msra.gmra.mrb[32].mxu1 %vm2573_vm9, %v3087_v45  ;;  %6488 = vmatmul.mubr.msk.bf16.vlgmr.msra.gmra.mrb[52].mxu0 %vm2573_vm9, %v6486_v46  ;;  %v7356_v45 = vld [vmem:[#allocation15 + $0x150] ss:$8 sps:$4 sm:$0xff]   ;;  %v7361_v46 = vld [vmem:[#allocation15 + $0x164] ss:$8 sps:$4 sm:$0xff]  }
 0xb79   : > { %3587 = vmatpush1.bf16.msra.mxu0 %v3092_v44  ;;  %3618 = vmatprep.mubr.bf16.mxu0 %v8118_v11  ;;  %v7358_v44 = vld [vmem:[#allocation15 + $0x154] ss:$8 sps:$4 sm:$0xff]  }
 0xb7a   : > { %3289 = vmatpush1.bf16.msra.mxu1 %v7293_v47  ;;  %v7359_v47 = vld [vmem:[#allocation15 + $0x160] ss:$8 sps:$4 sm:$0xff]  }
 0xb7b   : > { %3290 = vmatprep.subr.bf16.mxu1 %v7298_v48  ;;  %v7364_v48 = vld [vmem:[#allocation15 + $0x174] ss:$8 sps:$4 sm:$0xff]  }
 0xb7e   : > { %3291 = vmatpush1.bf16.msra.mxu1 %v7296_v49  ;;  %v7362_v49 = vld [vmem:[#allocation15 + $0x170] ss:$8 sps:$4 sm:$0xff]  }
 0xb7f   : > { %3292 = vmatprep.subr.bf16.mxu1 %v7301_v50  ;;  %v7367_v50 = vld [vmem:[#allocation15 + $0x184] ss:$8 sps:$4 sm:$0xff]  }
 0xb80   : > { %6516 = vmatmul.mubr.msk.bf16.vlgmr.msra.gmra.mrb[56].mxu0 %vm2573_vm9, %v6514_v51 }
 0xb81   : > { %3866 = vmatprep.mubr.bf16.mxu0 %v8118_v11 }
 0xb82   : > { %3293 = vmatpush1.bf16.msra.mxu1 %v7299_v52  ;;  %v7365_v52 = vld [vmem:[#allocation15 + $0x180] ss:$8 sps:$4 sm:$0xff]  }
 0xb83   : > { %3294 = vmatprep.subr.bf16.mxu1 %v7304_v53 }
 0xb86   : > { %3295 = vmatpush1.bf16.msra.mxu1 %v7302_v54  ;;  %v7370_v54 = vld [vmem:[#allocation15 + $0x194] ss:$8 sps:$4 sm:$0xff]  }
 0xb87   : > { %3296 = vmatprep.subr.bf16.mxu1 %v7307_v55  ;;  %v7368_v55 = vld [vmem:[#allocation15 + $0x190] ss:$8 sps:$4 sm:$0xff]  }
 0xb8a   : > { %3297 = vmatpush1.bf16.msra.mxu1 %v7305_v56  ;;  %v7373_v56 = vld [vmem:[#allocation15 + $0x1a4] ss:$8 sps:$4 sm:$0xff]  }
 0xb8b   : > { %3298 = vmatprep.subr.bf16.mxu1 %v7310_v57  ;;  %v7371_v57 = vld [vmem:[#allocation15 + $0x1a0] ss:$8 sps:$4 sm:$0xff]  }
 0xb8e   : > { %3299 = vmatpush1.bf16.msra.mxu1 %v7308_v58  ;;  %v7376_v58 = vld [vmem:[#allocation15 + $0x1b4] ss:$8 sps:$4 sm:$0xff]  }
 0xb8f   : > { %3300 = vmatprep.subr.bf16.mxu1 %v7313_v59  ;;  %v7374_v59 = vld [vmem:[#allocation15 + $0x1b0] ss:$8 sps:$4 sm:$0xff]  }
 0xb92   : > { %3301 = vmatpush1.bf16.msra.mxu1 %v7311_v60  ;;  %v7379_v60 = vld [vmem:[#allocation15 + $0x1c4] ss:$8 sps:$4 sm:$0xff]  }
 0xb93   : > { %3302 = vmatprep.subr.bf16.mxu1 %v7316_v61  ;;  %v7377_v61 = vld [vmem:[#allocation15 + $0x1c0] ss:$8 sps:$4 sm:$0xff]  }
 0xb96   : > { %3303 = vmatpush1.bf16.msra.mxu1 %v7314_v62  ;;  %v7382_v62 = vld [vmem:[#allocation15 + $0x1d4] ss:$8 sps:$4 sm:$0xff]  }
 0xb97   : > { %3304 = vmatprep.subr.bf16.mxu1 %v7319_v63  ;;  %v7380_v63 = vld [vmem:[#allocation15 + $0x1d0] ss:$8 sps:$4 sm:$0xff]  }
 0xb9a   : > { %3305 = vmatpush1.bf16.msra.mxu1 %v7317_v1  ;;  %v7385_v1 = vld [vmem:[#allocation15 + $0x1e4] ss:$8 sps:$4 sm:$0xff]  }
 0xb9b   : > { %3306 = vmatprep.subr.bf16.mxu1 %v7322_v2  ;;  %v7383_v2 = vld [vmem:[#allocation15 + $0x1e0] ss:$8 sps:$4 sm:$0xff]  }
 0xb9e   : > { %3307 = vmatpush1.bf16.msra.mxu1 %v7320_v3  ;;  %v7388_v3 = vld [vmem:[#allocation15 + $0x1f4] ss:$8 sps:$4 sm:$0xff]  }
 0xb9f   : > { %3308 = vmatprep.subr.bf16.mxu1 %v7325_v4  ;;  %v7386_v4 = vld [vmem:[#allocation15 + $0x1f0] ss:$8 sps:$4 sm:$0xff]  }
 0xba2   : > { %3309 = vmatpush1.bf16.msra.mxu1 %v7323_v5  ;;  %v7391_v5 = vld [vmem:[#allocation15 + $0x204] ss:$8 sps:$4 sm:$0xff]  }
 0xba3   : > { %3310 = vmatprep.subr.bf16.mxu1 %v7328_v6  ;;  %v7389_v6 = vld [vmem:[#allocation15 + $0x200] ss:$8 sps:$4 sm:$0xff]  }
 0xba6   : > { %3311 = vmatpush1.bf16.msra.mxu1 %v7326_v7  ;;  %v7394_v7 = vld [vmem:[#allocation15 + $0x214] ss:$8 sps:$4 sm:$0xff]  }
 0xba7   : > { %3538 = vmatprep.subr.bf16.mxu1 %v7331_v8  ;;  %v7392_v8 = vld [vmem:[#allocation15 + $0x210] ss:$8 sps:$4 sm:$0xff]  }
 0xc4b   : > { %v3131_v9 = vpop.f32.mrb[32].mxu1  ;;  %v8844_v10 = vpop.f32.mrb[52].mxu0 }
 0xc4c   : > { %v3133_v12 = vpop.f32.mrb[33].mxu1  ;;  %v3383_v13 = vpop.f32.mrb[53].mxu0  ;;  %v3138_v19 = vpack.c.bf16 %v3131_v9, %v3131_v9  ;;  %v3388_v51 = vpack.c.bf16 %v8844_v10, %v8844_v10  ;;  %v7397_v9 = vld [vmem:[#allocation15 + $0x224] ss:$8 sps:$4 sm:$0xff]   ;;  %v7395_v10 = vld [vmem:[#allocation15 + $0x220] ss:$8 sps:$4 sm:$0xff]  }
 0xc4d   : > { %v3139_v14 = vpack.c.bf16 %v3133_v12, %v3133_v12  ;;  %v3135_v15 = vpop.f32.mrb[34].mxu1  ;;  %v3389_v17 = vpack.c.bf16 %v3383_v13, %v3383_v13  ;;  %v3385_v18 = vpop.f32.mrb[54].mxu0  ;;  %v7400_v12 = vld [vmem:[#allocation15 + $0x234] ss:$8 sps:$4 sm:$0xff]   ;;  %v7398_v13 = vld [vmem:[#allocation15 + $0x230] ss:$8 sps:$4 sm:$0xff]  }
 0xc4e   : > { %v3136_v20 = vpop.f32.mrb[35].mxu1  ;;  %v3386_v22 = vpop.f32.mrb[55].mxu0  ;;  %v3086_v15 = vld [vmem:[%s9120_s5] sm:$0x3]  ;;  %s9128_s5 = sld [smem:[#allocation53_spill]] }
 0xc4f   : > { %6485 = vmatprep.mubr.msk.bf16.mxu1 %vm3284_vm11, %v3139_v14 }
 0xc50   : > { %3321 = vmatmul.mubr.bf16.vlgmr.msra.gmra.mrb[36].mxu1 %v3138_v19 }
 0xc51   : > { %3539 = vmatpush1.bf16.msra.mxu1 %v7329_v16  ;;  %6513 = vmatprep.mubr.msk.bf16.mxu1 %vm3284_vm11, %v3389_v17  ;;  %v3333_v16 = vrot.slane %v3086_v15, %v8691_v41  ;;  %v3337_v17 = vrot.slane %v3086_v15, %v8693_v43 }
 0xc52   : > { %3540 = vmatprep.subr.bf16.mxu1 %v7334_v21 }
 0xc53   : > { %v8848_v25 = vpop.f32.mrb[56].mxu0 }
 0xc54   : > { %v3622_v26 = vpop.f32.mrb[57].mxu0  ;;  %v3627_v14 = vpack.c.bf16 %v8848_v25, %v8848_v25  ;;  %s1006_s29 = scalar_lea.vmem %s9128_s5, %s9134_s28 }
 0xc55   : > { %3541 = vmatpush1.bf16.msra.mxu1 %v7332_v23  ;;  %v3624_v28 = vpop.f32.mrb[58].mxu0  ;;  %v3628_v53 = vpack.c.bf16 %v3622_v26, %v3622_v26 }
 0xc56   : > { %3542 = vmatprep.subr.bf16.mxu1 %v7337_v24  ;;  %v3625_v30 = vpop.f32.mrb[59].mxu0 }
 0xc57   : > { %v6544_v30 = vld [vmem:[%s9122_s2 + $0x1] sm:$0x1] }
 0xc59   : > { %3543 = vmatpush1.bf16.msra.mxu1 %v7335_v27 }
 0xc5a   : > { %3544 = vmatprep.subr.bf16.mxu1 %v7340_v29  ;;  %v3824_v29 = vld [vmem:[%s9121_s7] sm:$0x1]  ;;  %s9124_s7 = sld [smem:[#allocation48_spill]] }
 0xc5d   : > { %3545 = vmatpush1.bf16.msra.mxu1 %v7338_v31  ;;  %v7401_v31 = vld [vmem:[#allocation16] sm:$0xff]  }
 0xc5e   : > { %3546 = vmatprep.subr.bf16.mxu1 %v7343_v32  ;;  %v7402_v32 = vld [vmem:[#allocation16 + $0x8] sm:$0xff]  }
 0xc61   : > { %3547 = vmatpush1.bf16.msra.mxu1 %v7341_v33  ;;  %v7403_v33 = vld [vmem:[#allocation16 + $0x10] sm:$0xff]  }
 0xc62   : > { %3548 = vmatprep.subr.bf16.mxu1 %v7346_v34  ;;  %v7404_v34 = vld [vmem:[#allocation16 + $0x18] sm:$0xff]  }
 0xc65   : > { %3549 = vmatpush1.bf16.msra.mxu1 %v7344_v35  ;;  %v7405_v35 = vld [vmem:[#allocation16 + $0x20] sm:$0xff]  }
 0xc66   : > { %3550 = vmatprep.subr.bf16.mxu1 %v7349_v36  ;;  %v7406_v36 = vld [vmem:[#allocation16 + $0x28] sm:$0xff]  }
 0xc69   : > { %3551 = vmatpush1.bf16.msra.mxu1 %v7347_v37  ;;  %v7407_v37 = vld [vmem:[#allocation16 + $0x30] sm:$0xff]  }
 0xc6a   : > { %3552 = vmatprep.subr.bf16.mxu1 %v7352_v38  ;;  %v7408_v38 = vld [vmem:[#allocation16 + $0x38] sm:$0xff]  }
 0xc6d   : > { %3553 = vmatpush1.bf16.msra.mxu1 %v7350_v39  ;;  %v7409_v39 = vld [vmem:[#allocation16 + $0x40] sm:$0xff]  }
 0xc6e   : > { %3554 = vmatprep.subr.bf16.mxu1 %v7355_v40  ;;  %v7410_v40 = vld [vmem:[#allocation16 + $0x48] sm:$0xff]  }
 0xc71   : > { %3555 = vmatpush1.bf16.msra.mxu1 %v7353_v42  ;;  %v7411_v42 = vld [vmem:[#allocation16 + $0x50] sm:$0xff]  }
 0xc72   : > { %3556 = vmatprep.subr.bf16.mxu1 %v7358_v44  ;;  %v7412_v44 = vld [vmem:[#allocation16 + $0x58] sm:$0xff]  }
 0xc75   : > { %3557 = vmatpush1.bf16.msra.mxu1 %v7356_v45 }
 0xc76   : > { %3558 = vmatprep.subr.bf16.mxu1 %v7361_v46 }
 0xc79   : > { %3559 = vmatpush1.bf16.msra.mxu1 %v7359_v47 }
 0xc7a   : > { %3560 = vmatprep.subr.bf16.mxu1 %v7364_v48 }
 0xc7d   : > { %3561 = vmatpush1.bf16.msra.mxu1 %v7362_v49 }
 0xc7e   : > { %3777 = vmatprep.subr.bf16.mxu1 %v7367_v50 }
 0xc80   : > { %3571 = vmatmul.mubr.bf16.vlgmr.msra.gmra.mrb[36].mxu1 %v3388_v51 }
 0xc81   : > { %3778 = vmatpush1.bf16.msra.mxu1 %v7365_v52  ;;  %6541 = vmatprep.mubr.msk.bf16.mxu1 %vm3284_vm11, %v3628_v53 }
 0xc82   : > { %3779 = vmatprep.subr.bf16.mxu1 %v7370_v54 }
 0xc85   : > { %3780 = vmatpush1.bf16.msra.mxu1 %v7368_v55 }
 0xc86   : > { %3781 = vmatprep.subr.bf16.mxu1 %v7373_v56  ;;  %v7413_v56 = vld [vmem:[#allocation16 + $0x60] sm:$0xff]  }
 0xc89   : > { %3782 = vmatpush1.bf16.msra.mxu1 %v7371_v57 }
 0xc8a   : > { %3783 = vmatprep.subr.bf16.mxu1 %v7376_v58  ;;  %v7414_v58 = vld [vmem:[#allocation16 + $0x68] sm:$0xff]  }
 0xc8d   : > { %3784 = vmatpush1.bf16.msra.mxu1 %v7374_v59  ;;  %v7415_v59 = vld [vmem:[#allocation16 + $0x70] sm:$0xff]  }
 0xc8e   : > { %3785 = vmatprep.subr.bf16.mxu1 %v7379_v60  ;;  %v7416_v60 = vld [vmem:[#allocation16 + $0x78] sm:$0xff]  }
 0xc91   : > { %3786 = vmatpush1.bf16.msra.mxu1 %v7377_v61  ;;  %v7417_v61 = vld [vmem:[#allocation16 + $0x80] sm:$0xff]  }
 0xc92   : > { %3787 = vmatprep.subr.bf16.mxu1 %v7382_v62  ;;  %v7418_v62 = vld [vmem:[#allocation16 + $0x88] sm:$0xff]  }
 0xc95   : > { %3788 = vmatpush1.bf16.msra.mxu1 %v7380_v63  ;;  %v7419_v63 = vld [vmem:[#allocation16 + $0x90] sm:$0xff]  }
 0xc96   : > { %3789 = vmatprep.subr.bf16.mxu1 %v7385_v1  ;;  %v7420_v1 = vld [vmem:[#allocation16 + $0x98] sm:$0xff]  }
 0xc99   : > { %3790 = vmatpush1.bf16.msra.mxu1 %v7383_v2  ;;  %v7421_v2 = vld [vmem:[#allocation16 + $0xa0] sm:$0xff]  }
 0xc9a   : > { %3791 = vmatprep.subr.bf16.mxu1 %v7388_v3  ;;  %v7422_v3 = vld [vmem:[#allocation16 + $0xa8] sm:$0xff]  }
 0xc9d   : > { %3792 = vmatpush1.bf16.msra.mxu1 %v7386_v4  ;;  %v7423_v4 = vld [vmem:[#allocation16 + $0xb0] sm:$0xff]  }
 0xc9e   : > { %3793 = vmatprep.subr.bf16.mxu1 %v7391_v5  ;;  %v7424_v5 = vld [vmem:[#allocation16 + $0xb8] sm:$0xff]  }
 0xca1   : > { %3794 = vmatpush1.bf16.msra.mxu1 %v7389_v6 }
 0xca2   : > { %3795 = vmatprep.subr.bf16.mxu1 %v7394_v7 }
 0xca5   : > { %3796 = vmatpush1.bf16.msra.mxu1 %v7392_v8 }
 0xca6   : > { %3797 = vmatprep.subr.bf16.mxu1 %v7397_v9 }
 0xca9   : > { %3798 = vmatpush1.bf16.msra.mxu1 %v7395_v10 }
 0xcaa   : > { %3799 = vmatprep.subr.bf16.mxu1 %v7400_v12 }
 0xcad   : > { %3800 = vmatpush1.bf16.msra.mxu1 %v7398_v13 }
 0xcae   : > { %6892 = vmatprep.subr.bf16.mxu1 %v8116_v0 }
 0xcb0   : > { %3810 = vmatmul.mubr.bf16.vlgmr.msra.gmra.mrb[36].mxu1 %v3627_v14 }
 0xcb1   : > { %6894 = vmatprep.mubr.msk.bf16.mxu1 %vm8117_vm0, %v8116_v0 }
 0xd83   : > { %v3811_v18 = vpop.f32.mrb[36].mxu1 }
 0xd84   : > { %v6920_v19 = vadd.f32 %v3811_v18, %v3333_v16  ;;  %v3813_v20 = vpop.f32.mrb[37].mxu1 }
 0xd85   : > { %v6921_v21 = vadd.f32 %v3813_v20, %v3337_v17  ;;  %v3815_v22 = vpop.f32.mrb[38].mxu1  ;;  %v7427_v17 = vld [vmem:[#allocation18 + $0x4] ss:$8 sps:$4 sm:$0xff]  }
 0xd86   : > { %v3820_v23 = vmax.f32 %v6920_v19, 0.0  ;;  %v3816_v24 = vpop.f32.mrb[39].mxu1  ;;  %v4204_v19 = vld [vmem:[%s9123_s17] sm:$0x1]  ;;  %v6590_v20 = vld [vmem:[%s9123_s17 + $0x1] sm:$0x1] }
 0xd87   : > { %v3821_v25 = vmax.f32 %v6921_v21, 0.0  ;;  %v7425_v21 = vld [vmem:[#allocation18] ss:$8 sps:$4 sm:$0xff]   ;;  %v7430_v22 = vld [vmem:[#allocation18 + $0x14] ss:$8 sps:$4 sm:$0xff]  }
 0xd88   : > { %v3822_v26 = vpack.c.bf16 %v3820_v23, %v3820_v23  ;;  %v7428_v23 = vld [vmem:[#allocation18 + $0x10] ss:$8 sps:$4 sm:$0xff]   ;;  %v7433_v24 = vld [vmem:[#allocation18 + $0x24] ss:$8 sps:$4 sm:$0xff]  }
 0xd89   : > { %v3823_v27 = vpack.c.bf16 %v3821_v25, %v3821_v25  ;;  %v6608_v25 = vld [vmem:[%s9123_s17 + $0x2] sm:$0x1] }
 0xd8a   : > { %v3829_v28 = vsel %vm2577_vm8, %v3822_v26, 0  ;;  %v7431_v26 = vld [vmem:[#allocation18 + $0x20] ss:$8 sps:$4 sm:$0xff]  }
 0xd8b   : > { %6542 = vmatprep.subr.msk.bf16.mxu0 %vm2577_vm8, %v3823_v27 }
 0xd8c   : > { %3835 = vmatpush1.bf16.msra.mxu0 %v3829_v28 }
 0xd8d   : > { %6545 = vmatprep.subr.msk.bf16.mxu0 %vm2577_vm8, %v3823_v27  ;;  %v7436_v27 = vld [vmem:[#allocation18 + $0x34] ss:$8 sps:$4 sm:$0xff]  }
 0xd8f   : > { %6543 = vmatmul.mubr.msk.bf16.vlgmr.msra.gmra.mrb[60].mxu0 %vm2573_vm9, %v3824_v29  ;;  %v7437_v29 = vld [vmem:[#allocation18 + $0x40] ss:$8 sps:$4 sm:$0xff]  }
 0xd90   : > { %3881 = vmatpush1.bf16.msra.mxu0 %v3829_v28  ;;  %3912 = vmatprep.mubr.bf16.mxu0 %v8118_v11  ;;  %v7439_v28 = vld [vmem:[#allocation18 + $0x44] ss:$8 sps:$4 sm:$0xff]  }
 0xd91   : > { %4024 = vmatprep.subr.bf16.mxu0 %v8118_v11 }
 0xd97   : > { %6546 = vmatmul.mubr.msk.bf16.vlgmr.msra.gmra.mrb[64].mxu0 %vm2573_vm9, %v6544_v30  ;;  %v7442_v30 = vld [vmem:[#allocation18 + $0x54] ss:$8 sps:$4 sm:$0xff]  }
 0xd98   : > { %4025 = vmatpush1.bf16.msra.mxu0 %v7401_v31  ;;  %v7440_v31 = vld [vmem:[#allocation18 + $0x50] ss:$8 sps:$4 sm:$0xff]  }
 0xd99   : > { %4026 = vmatprep.subr.bf16.mxu0 %v8118_v11 }
 0xd9c   : > { %4027 = vmatpush1.bf16.msra.mxu0 %v7402_v32  ;;  %v7445_v32 = vld [vmem:[#allocation18 + $0x64] ss:$8 sps:$4 sm:$0xff]  }
 0xd9d   : > { %4028 = vmatprep.subr.bf16.mxu0 %v8118_v11 }
 0xda0   : > { %4029 = vmatpush1.bf16.msra.mxu0 %v7403_v33  ;;  %v7443_v33 = vld [vmem:[#allocation18 + $0x60] ss:$8 sps:$4 sm:$0xff]  }
 0xda1   : > { %4030 = vmatprep.subr.bf16.mxu0 %v8118_v11 }
 0xda4   : > { %4031 = vmatpush1.bf16.msra.mxu0 %v7404_v34  ;;  %v7448_v34 = vld [vmem:[#allocation18 + $0x74] ss:$8 sps:$4 sm:$0xff]  }
 0xda5   : > { %4032 = vmatprep.subr.bf16.mxu0 %v8118_v11 }
 0xda8   : > { %4033 = vmatpush1.bf16.msra.mxu0 %v7405_v35  ;;  %v7446_v35 = vld [vmem:[#allocation18 + $0x70] ss:$8 sps:$4 sm:$0xff]  }
 0xda9   : > { %4034 = vmatprep.subr.bf16.mxu0 %v8118_v11 }
 0xdac   : > { %4035 = vmatpush1.bf16.msra.mxu0 %v7406_v36  ;;  %v7451_v36 = vld [vmem:[#allocation18 + $0x84] ss:$8 sps:$4 sm:$0xff]  }
 0xdad   : > { %4036 = vmatprep.subr.bf16.mxu0 %v8118_v11 }
 0xdb0   : > { %4037 = vmatpush1.bf16.msra.mxu0 %v7407_v37 }
 0xdb1   : > { %4038 = vmatprep.subr.bf16.mxu0 %v8118_v11 }
 0xdb4   : > { %4039 = vmatpush1.bf16.msra.mxu0 %v7408_v38  ;;  %v7449_v38 = vld [vmem:[#allocation18 + $0x80] ss:$8 sps:$4 sm:$0xff]  }
 0xdb5   : > { %4040 = vmatprep.subr.bf16.mxu0 %v8118_v11 }
 0xdb8   : > { %4041 = vmatpush1.bf16.msra.mxu0 %v7409_v39 }
 0xdb9   : > { %4042 = vmatprep.subr.bf16.mxu0 %v8118_v11 }
 0xdbc   : > { %4043 = vmatpush1.bf16.msra.mxu0 %v7410_v40 }
 0xdbd   : > { %4044 = vmatprep.subr.bf16.mxu0 %v8118_v11 }
 0xdc0   : > { %4045 = vmatpush1.bf16.msra.mxu0 %v7411_v42 }
 0xdc1   : > { %4046 = vmatprep.subr.bf16.mxu0 %v8118_v11 }
 0xdc4   : > { %4047 = vmatpush1.bf16.msra.mxu0 %v7412_v44  ;;  %v7454_v44 = vld [vmem:[#allocation18 + $0x94] ss:$8 sps:$4 sm:$0xff]  }
 0xdc5   : > { %4161 = vmatprep.subr.bf16.mxu0 %v8118_v11 }
 0xe62   : > { %v3868_v45 = vpop.f32.mrb[60].mxu0 }
 0xe63   : > { %v3870_v46 = vpop.f32.mrb[61].mxu0 }
 0xe64   : > { %v3872_v47 = vpop.f32.mrb[62].mxu0 }
 0xe65   : > { %v3873_v48 = vpop.f32.mrb[63].mxu0 }
 0xe6a   : > { %v3914_v49 = vpop.f32.mrb[64].mxu0 }
 0xe6b   : > { %v3921_v50 = vmax.f32 %v3868_v45, %v3914_v49  ;;  %v3916_v51 = vpop.f32.mrb[65].mxu0 }
 0xe6c   : > { %v3922_v52 = vmax.f32 %v3870_v46, %v3916_v51  ;;  %v3918_v53 = vpop.f32.mrb[66].mxu0  ;;  %v7457_v51 = vld [vmem:[#allocation18 + $0xa4] ss:$8 sps:$4 sm:$0xff]  }
 0xe6d   : > { %v3919_v54 = vpop.f32.mrb[67].mxu0  ;;  %v3923_v57 = vpack.c.bf16 %v3921_v50, %v3921_v50  ;;  %v7452_v50 = vld [vmem:[#allocation18 + $0x90] ss:$8 sps:$4 sm:$0xff]  }
 0xe6e   : > { %v3924_v55 = vpack.c.bf16 %v3922_v52, %v3922_v52  ;;  %v7455_v52 = vld [vmem:[#allocation18 + $0xa0] ss:$8 sps:$4 sm:$0xff]   ;;  %v7460_v54 = vld [vmem:[#allocation18 + $0xb4] ss:$8 sps:$4 sm:$0xff]  }
 0xe70   : > { %6559 = vmatprep.mubr.msk.bf16.mxu0 %vm3284_vm11, %v3924_v55 }
 0xe71   : > { %4057 = vmatmul.mubr.bf16.vlgmr.msra.gmra.mrb[68].mxu0 %v3923_v57 }
 0xe72   : > { %4162 = vmatpush1.bf16.msra.mxu0 %v7413_v56  ;;  %6572 = vmatprep.mubr.msk.bf16.mxu0 %vm3284_vm11, %v3924_v55 }
 0xe73   : > { %4163 = vmatprep.subr.bf16.mxu0 %v8118_v11 }
 0xe76   : > { %4164 = vmatpush1.bf16.msra.mxu0 %v7414_v58  ;;  %v7458_v58 = vld [vmem:[#allocation18 + $0xb0] ss:$8 sps:$4 sm:$0xff]  }
 0xe77   : > { %4165 = vmatprep.subr.bf16.mxu0 %v8118_v11 }
 0xe7a   : > { %4166 = vmatpush1.bf16.msra.mxu0 %v7415_v59  ;;  %v7463_v59 = vld [vmem:[#allocation18 + $0xc4] ss:$8 sps:$4 sm:$0xff]  }
 0xe7b   : > { %4167 = vmatprep.subr.bf16.mxu0 %v8118_v11 }
 0xe7e   : > { %4168 = vmatpush1.bf16.msra.mxu0 %v7416_v60  ;;  %v7461_v60 = vld [vmem:[#allocation18 + $0xc0] ss:$8 sps:$4 sm:$0xff]  }
 0xe7f   : > { %4169 = vmatprep.subr.bf16.mxu0 %v8118_v11 }
 0xe82   : > { %4170 = vmatpush1.bf16.msra.mxu0 %v7417_v61  ;;  %v7466_v61 = vld [vmem:[#allocation18 + $0xd4] ss:$8 sps:$4 sm:$0xff]  }
 0xe83   : > { %4171 = vmatprep.subr.bf16.mxu0 %v8118_v11 }
 0xe86   : > { %4172 = vmatpush1.bf16.msra.mxu0 %v7418_v62  ;;  %v7464_v62 = vld [vmem:[#allocation18 + $0xd0] ss:$8 sps:$4 sm:$0xff]  }
 0xe87   : > { %4173 = vmatprep.subr.bf16.mxu0 %v8118_v11 }
 0xe8a   : > { %4174 = vmatpush1.bf16.msra.mxu0 %v7419_v63  ;;  %v7469_v63 = vld [vmem:[#allocation18 + $0xe4] ss:$8 sps:$4 sm:$0xff]  }
 0xe8b   : > { %4175 = vmatprep.subr.bf16.mxu0 %v8118_v11 }
 0xe8e   : > { %4176 = vmatpush1.bf16.msra.mxu0 %v7420_v1  ;;  %v7467_v1 = vld [vmem:[#allocation18 + $0xe0] ss:$8 sps:$4 sm:$0xff]  }
 0xe8f   : > { %4177 = vmatprep.subr.bf16.mxu0 %v8118_v11 }
 0xe92   : > { %4178 = vmatpush1.bf16.msra.mxu0 %v7421_v2  ;;  %v7472_v2 = vld [vmem:[#allocation18 + $0xf4] ss:$8 sps:$4 sm:$0xff]  }
 0xe93   : > { %4179 = vmatprep.subr.bf16.mxu0 %v8118_v11 }
 0xe96   : > { %4180 = vmatpush1.bf16.msra.mxu0 %v7422_v3  ;;  %v7470_v3 = vld [vmem:[#allocation18 + $0xf0] ss:$8 sps:$4 sm:$0xff]  }
 0xe97   : > { %4181 = vmatprep.subr.bf16.mxu0 %v8118_v11 }
 0xe9a   : > { %4182 = vmatpush1.bf16.msra.mxu0 %v7423_v4  ;;  %v7475_v4 = vld [vmem:[#allocation18 + $0x104] ss:$8 sps:$4 sm:$0xff]  }
 0xe9b   : > { %4183 = vmatprep.subr.bf16.mxu0 %v8118_v11 }
 0xe9e   : > { %4184 = vmatpush1.bf16.msra.mxu0 %v7424_v5 }
 0xe9f   : > { %6898 = vmatprep.subr.bf16.mxu0 %v8116_v0 }
 0xea1   : > { %4194 = vmatmul.mubr.bf16.vlgmr.msra.gmra.mrb[72].mxu0 %v3923_v57 }
 0xea2   : > { %6900 = vmatprep.mubr.msk.bf16.mxu0 %vm8117_vm0, %v8116_v0 }
 0xf44   : > { %v4058_v6 = vpop.f32.mrb[68].mxu0 }
 0xf45   : > { %v4060_v7 = vpop.f32.mrb[69].mxu0 }
 0xf46   : > { %v4061_v8 = vpop.f32.mrb[70].mxu0  ;;  %v7478_v7 = vld [vmem:[#allocation18 + $0x114] ss:$8 sps:$4 sm:$0xff]  }
 0xf47   : > { %v4062_v9 = vpop.f32.mrb[71].mxu0  ;;  %v7476_v8 = vld [vmem:[#allocation18 + $0x110] ss:$8 sps:$4 sm:$0xff]  }
 0xf48   : > { %v7481_v9 = vld [vmem:[#allocation18 + $0x124] ss:$8 sps:$4 sm:$0xff]  }
 0xf74   : > { %v4195_v10 = vpop.f32.mrb[72].mxu0 }
 0xf75   : > { %v4201_v12 = vmax.f32 %v4058_v6, %v4195_v10  ;;  %v4197_v13 = vpop.f32.mrb[73].mxu0  ;;  %v7473_v6 = vld [vmem:[#allocation18 + $0x100] ss:$8 sps:$4 sm:$0xff]  }
 0xf76   : > { %v4198_v14 = vpop.f32.mrb[74].mxu0  ;;  %v7479_v10 = vld [vmem:[#allocation18 + $0x120] ss:$8 sps:$4 sm:$0xff]   ;;  %v7482_v13 = vld [vmem:[#allocation18 + $0x130] ss:$8 sps:$4 sm:$0xff]  }
 0xf77   : > { %v4202_v15 = vpack.c.bf16 %v4201_v12, %v4201_v12  ;;  %v4199_v16 = vpop.f32.mrb[75].mxu0  ;;  %v7484_v12 = vld [vmem:[#allocation18 + $0x134] ss:$8 sps:$4 sm:$0xff]   ;;  %v7487_v14 = vld [vmem:[#allocation18 + $0x144] ss:$8 sps:$4 sm:$0xff]  }
 0xf78   : > { %v7490_v16 = vld [vmem:[#allocation18 + $0x154] ss:$8 sps:$4 sm:$0xff]  }
 0xf79   : > { %v4210_v18 = vsel %vm1092_vm2, %v4202_v15, 0  ;;  %v7485_v15 = vld [vmem:[#allocation18 + $0x140] ss:$8 sps:$4 sm:$0xff]  }
 0xf7a   : > { %6893 = vmatpush3.bf16.msra.mxu1 %v4210_v18  ;;  %6899 = vmatpush3.bf16.msra.mxu0 %v4210_v18 }
 0xf7b   : > { %6904 = vmatprep.subr.bf16.mxu0 %v8116_v0  ;;  %4349 = vmatprep.subr.bf16.mxu1 %v7427_v17  ;;  %v7488_v17 = vld [vmem:[#allocation18 + $0x150] ss:$8 sps:$4 sm:$0xff]  }
 0xf7d   : > { %6895 = vmatmul.mubr.msk.bf16.vlgmr.msra.gmra.mrb[40].mxu1 %vm4205_vm12, %v4204_v19  ;;  %6901 = vmatmul.mubr.msk.bf16.vlgmr.msra.gmra.mrb[76].mxu0 %vm4205_vm12, %v6590_v20  ;;  %v7491_v19 = vld [vmem:[#allocation18 + $0x160] ss:$8 sps:$4 sm:$0xff]   ;;  %v7496_v20 = vld [vmem:[#allocation18 + $0x174] ss:$8 sps:$4 sm:$0xff]  }
 0xf7e   : > { %6905 = vmatpush3.bf16.msra.mxu0 %v4210_v18  ;;  %6906 = vmatprep.mubr.msk.bf16.mxu0 %vm8117_vm0, %v8116_v0  ;;  %v7434_v0 = vld [vmem:[#allocation18 + $0x30] ss:$8 sps:$4 sm:$0xff]   ;;  %v7493_v18 = vld [vmem:[#allocation18 + $0x164] ss:$8 sps:$4 sm:$0xff]  }
 0xf7f   : > { %4350 = vmatpush1.bf16.msra.mxu1 %v7425_v21  ;;  %4381 = vmatprep.mubr.bf16.mxu1 %v8118_v11  ;;  %v7494_v21 = vld [vmem:[#allocation18 + $0x170] ss:$8 sps:$4 sm:$0xff]  }
 0xf80   : > { %4351 = vmatprep.subr.bf16.mxu1 %v7430_v22 }
 0xf83   : > { %4352 = vmatpush1.bf16.msra.mxu1 %v7428_v23  ;;  %v4203_v23 = vld [vmem:[%s9124_s7] sm:$0x3] }
 0xf84   : > { %4353 = vmatprep.subr.bf16.mxu1 %v7433_v24  ;;  %v4394_v24 = vrot.slane %v4203_v23, %v8691_v41 }
 0xf85   : > { %6907 = vmatmul.mubr.msk.bf16.vlgmr.msra.gmra.mrb[80].mxu0 %vm4205_vm12, %v6608_v25  ;;  %v4398_v25 = vrot.slane %v4203_v23, %v8693_v43  ;;  %v7556_v23 = vld [vmem:[#allocation19 + $0x134] ss:$8 sps:$4 sm:$0xff]  }
 0xf86   : > { %4822 = vmatprep.mubr.bf16.mxu0 %v8118_v11 }
 0xf87   : > { %4354 = vmatpush1.bf16.msra.mxu1 %v7431_v26 }
 0xf88   : > { %4355 = vmatprep.subr.bf16.mxu1 %v7436_v27 }
 0xf8b   : > { %4356 = vmatpush1.bf16.msra.mxu1 %v7434_v0 }
 0xf8c   : > { %4357 = vmatprep.subr.bf16.mxu1 %v7439_v28 }
 0xf8f   : > { %4358 = vmatpush1.bf16.msra.mxu1 %v7437_v29 }
 0xf90   : > { %4359 = vmatprep.subr.bf16.mxu1 %v7442_v30 }
 0xf93   : > { %4360 = vmatpush1.bf16.msra.mxu1 %v7440_v31 }
 0xf94   : > { %4361 = vmatprep.subr.bf16.mxu1 %v7445_v32 }
 0xf97   : > { %4362 = vmatpush1.bf16.msra.mxu1 %v7443_v33 }
 0xf98   : > { %4363 = vmatprep.subr.bf16.mxu1 %v7448_v34 }
 0xf9b   : > { %4364 = vmatpush1.bf16.msra.mxu1 %v7446_v35  ;;  %v7499_v35 = vld [vmem:[#allocation19 + $0x4] ss:$8 sps:$4 sm:$0xff]  }
 0xf9c   : > { %4546 = vmatprep.subr.bf16.mxu1 %v7451_v36 }
0x1050   : > { %v4246_v37 = vpop.f32.mrb[40].mxu1  ;;  %v4442_v39 = vpop.f32.mrb[76].mxu0 }
0x1051   : > { %v4252_v40 = vpack.c.bf16 %v4246_v37, %v4246_v37  ;;  %v6896_v42 = vpop.f32.mrb[41].mxu1  ;;  %v6902_v45 = vpop.f32.mrb[77].mxu0  ;;  %v4448_v5 = vpack.c.bf16 %v4442_v39, %v4442_v39  ;;  %v4780_v37 = vld [vmem:[%s9125_s3] sm:$0x1]  ;;  %v7502_v39 = vld [vmem:[#allocation19 + $0x14] ss:$8 sps:$4 sm:$0xff]  }
0x1052   : > { %v4249_v46 = vpop.f32.mrb[42].mxu1  ;;  %v4445_v47 = vpop.f32.mrb[78].mxu0  ;;  %v7505_v42 = vld [vmem:[#allocation19 + $0x24] ss:$8 sps:$4 sm:$0xff]   ;;  %v7508_v45 = vld [vmem:[#allocation19 + $0x34] ss:$8 sps:$4 sm:$0xff]  }
0x1053   : > { %v6897_v48 = vpop.f32.mrb[43].mxu1  ;;  %4382 = vmatmul.mubr.bf16.vlgmr.msra.gmra.mrb[44].mxu1 %v4252_v40  ;;  %v6903_v49 = vpop.f32.mrb[79].mxu0  ;;  %v7500_v40 = vld [vmem:[#allocation19 + $0x10] ss:$8 sps:$4 sm:$0xff]   ;;  %v7511_v47 = vld [vmem:[#allocation19 + $0x44] ss:$8 sps:$4 sm:$0xff]  }
0x1054   : > { %4547 = vmatpush1.bf16.msra.mxu1 %v7449_v38  ;;  %4578 = vmatprep.mubr.bf16.mxu1 %v8118_v11  ;;  %v7497_v38 = vld [vmem:[#allocation19] ss:$8 sps:$4 sm:$0xff]   ;;  %v7506_v46 = vld [vmem:[#allocation19 + $0x30] ss:$8 sps:$4 sm:$0xff]   ;;  %v7514_v49 = vld [vmem:[#allocation19 + $0x54] ss:$8 sps:$4 sm:$0xff]  }
0x1055   : > { %4548 = vmatprep.subr.bf16.mxu1 %v7454_v44  ;;  %v7503_v44 = vld [vmem:[#allocation19 + $0x20] ss:$8 sps:$4 sm:$0xff]  }
0x1056   : > { %v7509_v48 = vld [vmem:[#allocation19 + $0x40] ss:$8 sps:$4 sm:$0xff]  }
0x1058   : > { %4549 = vmatpush1.bf16.msra.mxu1 %v7452_v50  ;;  %v4628_v53 = vpop.f32.mrb[80].mxu0  ;;  %v7512_v50 = vld [vmem:[#allocation19 + $0x50] ss:$8 sps:$4 sm:$0xff]  }
0x1059   : > { %4550 = vmatprep.subr.bf16.mxu1 %v7457_v51  ;;  %v6908_v55 = vpop.f32.mrb[81].mxu0  ;;  %v4634_v22 = vpack.c.bf16 %v4628_v53, %v4628_v53  ;;  %v7517_v51 = vld [vmem:[#allocation19 + $0x64] ss:$8 sps:$4 sm:$0xff]   ;;  %v7520_v53 = vld [vmem:[#allocation19 + $0x74] ss:$8 sps:$4 sm:$0xff]  }
0x105a   : > { %v4631_v56 = vpop.f32.mrb[82].mxu0  ;;  %v7523_v55 = vld [vmem:[#allocation19 + $0x84] ss:$8 sps:$4 sm:$0xff]  }
0x105b   : > { %v6909_v57 = vpop.f32.mrb[83].mxu0  ;;  %v7521_v56 = vld [vmem:[#allocation19 + $0x80] ss:$8 sps:$4 sm:$0xff]  }
0x105c   : > { %4551 = vmatpush1.bf16.msra.mxu1 %v7455_v52  ;;  %v7515_v52 = vld [vmem:[#allocation19 + $0x60] ss:$8 sps:$4 sm:$0xff]   ;;  %v7526_v57 = vld [vmem:[#allocation19 + $0x94] ss:$8 sps:$4 sm:$0xff]  }
0x105d   : > { %4552 = vmatprep.subr.bf16.mxu1 %v7460_v54  ;;  %v7518_v54 = vld [vmem:[#allocation19 + $0x70] ss:$8 sps:$4 sm:$0xff]  }
0x1060   : > { %4553 = vmatpush1.bf16.msra.mxu1 %v7458_v58  ;;  %v7524_v58 = vld [vmem:[#allocation19 + $0x90] ss:$8 sps:$4 sm:$0xff]  }
0x1061   : > { %4554 = vmatprep.subr.bf16.mxu1 %v7463_v59  ;;  %v7529_v59 = vld [vmem:[#allocation19 + $0xa4] ss:$8 sps:$4 sm:$0xff]  }
0x1064   : > { %4555 = vmatpush1.bf16.msra.mxu1 %v7461_v60  ;;  %v7527_v60 = vld [vmem:[#allocation19 + $0xa0] ss:$8 sps:$4 sm:$0xff]  }
0x1065   : > { %4556 = vmatprep.subr.bf16.mxu1 %v7466_v61  ;;  %v7532_v61 = vld [vmem:[#allocation19 + $0xb4] ss:$8 sps:$4 sm:$0xff]  }
0x1068   : > { %4557 = vmatpush1.bf16.msra.mxu1 %v7464_v62  ;;  %v7530_v62 = vld [vmem:[#allocation19 + $0xb0] ss:$8 sps:$4 sm:$0xff]  }
0x1069   : > { %4558 = vmatprep.subr.bf16.mxu1 %v7469_v63  ;;  %v7535_v63 = vld [vmem:[#allocation19 + $0xc4] ss:$8 sps:$4 sm:$0xff]  }
0x106c   : > { %4559 = vmatpush1.bf16.msra.mxu1 %v7467_v1  ;;  %v7533_v1 = vld [vmem:[#allocation19 + $0xc0] ss:$8 sps:$4 sm:$0xff]  }
0x106d   : > { %4560 = vmatprep.subr.bf16.mxu1 %v7472_v2  ;;  %v7538_v2 = vld [vmem:[#allocation19 + $0xd4] ss:$8 sps:$4 sm:$0xff]  }
0x1070   : > { %4561 = vmatpush1.bf16.msra.mxu1 %v7470_v3  ;;  %v7536_v3 = vld [vmem:[#allocation19 + $0xd0] ss:$8 sps:$4 sm:$0xff]  }
0x1071   : > { %4732 = vmatprep.subr.bf16.mxu1 %v7475_v4  ;;  %v7541_v4 = vld [vmem:[#allocation19 + $0xe4] ss:$8 sps:$4 sm:$0xff]  }
0x1073   : > { %4579 = vmatmul.mubr.bf16.vlgmr.msra.gmra.mrb[44].mxu1 %v4448_v5  ;;  %v7539_v5 = vld [vmem:[#allocation19 + $0xe0] ss:$8 sps:$4 sm:$0xff]  }
0x1074   : > { %4733 = vmatpush1.bf16.msra.mxu1 %v7473_v6  ;;  %4764 = vmatprep.mubr.bf16.mxu1 %v8118_v11  ;;  %v7544_v6 = vld [vmem:[#allocation19 + $0xf4] ss:$8 sps:$4 sm:$0xff]  }
0x1075   : > { %4734 = vmatprep.subr.bf16.mxu1 %v7478_v7  ;;  %v7542_v7 = vld [vmem:[#allocation19 + $0xf0] ss:$8 sps:$4 sm:$0xff]  }
0x1078   : > { %4735 = vmatpush1.bf16.msra.mxu1 %v7476_v8  ;;  %v6695_v8 = vld [vmem:[%s9125_s3 + $0x2] sm:$0x1] }
0x1079   : > { %4736 = vmatprep.subr.bf16.mxu1 %v7481_v9 }
0x107c   : > { %4737 = vmatpush1.bf16.msra.mxu1 %v7479_v10 }
0x107d   : > { %4738 = vmatprep.subr.bf16.mxu1 %v7484_v12 }
0x1080   : > { %4739 = vmatpush1.bf16.msra.mxu1 %v7482_v13 }
0x1081   : > { %4740 = vmatprep.subr.bf16.mxu1 %v7487_v14 }
0x1084   : > { %4741 = vmatpush1.bf16.msra.mxu1 %v7485_v15 }
0x1085   : > { %4742 = vmatprep.subr.bf16.mxu1 %v7490_v16  ;;  %v7547_v16 = vld [vmem:[#allocation19 + $0x104] ss:$8 sps:$4 sm:$0xff]  }
0x1088   : > { %4743 = vmatpush1.bf16.msra.mxu1 %v7488_v17  ;;  %v6660_v17 = vld [vmem:[%s9125_s3 + $0x1] sm:$0x1] }
0x1089   : > { %4744 = vmatprep.subr.bf16.mxu1 %v7493_v18  ;;  %v7545_v18 = vld [vmem:[#allocation19 + $0x100] ss:$8 sps:$4 sm:$0xff]  }
0x108c   : > { %4745 = vmatpush1.bf16.msra.mxu1 %v7491_v19  ;;  %v7550_v19 = vld [vmem:[#allocation19 + $0x114] ss:$8 sps:$4 sm:$0xff]  }
0x108d   : > { %4746 = vmatprep.subr.bf16.mxu1 %v7496_v20  ;;  %v7548_v20 = vld [vmem:[#allocation19 + $0x110] ss:$8 sps:$4 sm:$0xff]  }
0x1090   : > { %4747 = vmatpush1.bf16.msra.mxu1 %v7494_v21  ;;  %v7553_v21 = vld [vmem:[#allocation19 + $0x124] ss:$8 sps:$4 sm:$0xff]  }
0x1093   : > { %4765 = vmatmul.mubr.bf16.vlgmr.msra.gmra.mrb[44].mxu1 %v4634_v22  ;;  %v7551_v22 = vld [vmem:[#allocation19 + $0x120] ss:$8 sps:$4 sm:$0xff]  }
0x1094   : > { %5400 = vmatprep.mubr.bf16.mxu1 %v8118_v11 }
0x1166   : > { %v4766_v26 = vpop.f32.mrb[44].mxu1 }
0x1167   : > { %v6922_v27 = vadd.f32 %v4766_v26, %v4394_v24  ;;  %v4768_v0 = vpop.f32.mrb[45].mxu1  ;;  %v7554_v24 = vld [vmem:[#allocation19 + $0x130] ss:$8 sps:$4 sm:$0xff]   ;;  %v7557_v26 = vld [vmem:[#allocation19 + $0x140] ss:$8 sps:$4 sm:$0xff]  }
0x1168   : > { %v6923_v28 = vadd.f32 %v4768_v0, %v4398_v25  ;;  %v4770_v29 = vpop.f32.mrb[46].mxu1  ;;  %v7559_v25 = vld [vmem:[#allocation19 + $0x144] ss:$8 sps:$4 sm:$0xff]   ;;  %v7560_v0 = vld [vmem:[#allocation19 + $0x150] ss:$8 sps:$4 sm:$0xff]  }
0x1169   : > { %v4775_v30 = vmax.f32 %v6922_v27, 0.0  ;;  %v4771_v31 = vpop.f32.mrb[47].mxu1  ;;  %v7562_v27 = vld [vmem:[#allocation19 + $0x154] ss:$8 sps:$4 sm:$0xff]   ;;  %v7563_v29 = vld [vmem:[#allocation19 + $0x160] ss:$8 sps:$4 sm:$0xff]  }
0x116a   : > { %v4776_v32 = vmax.f32 %v6923_v28, 0.0  ;;  %v7565_v28 = vld [vmem:[#allocation19 + $0x164] ss:$8 sps:$4 sm:$0xff]   ;;  %v7566_v31 = vld [vmem:[#allocation19 + $0x170] ss:$8 sps:$4 sm:$0xff]  }
0x116b   : > { %v4777_v33 = vpack.c.bf16 %v4775_v30, %v4775_v30  ;;  %v7568_v30 = vld [vmem:[#allocation19 + $0x174] ss:$8 sps:$4 sm:$0xff]  }
0x116c   : > { %v8930_v34 = vpack.c.bf16 %v4776_v32, %v4776_v32  ;;  %v7571_v32 = vld [vmem:[#allocation19 + $0x184] ss:$8 sps:$4 sm:$0xff]  }
0x116d   : > { %v8933_v36 = vsel %vm1092_vm2, %v4777_v33, 0  ;;  %v7569_v33 = vld [vmem:[#allocation19 + $0x180] ss:$8 sps:$4 sm:$0xff]  }
0x116e   : > { %6626 = vmatprep.subr.msk.bf16.mxu0 %vm1092_vm2, %v8930_v34  ;;  %6696 = vmatprep.subr.msk.bf16.mxu1 %vm1092_vm2, %v8930_v34 }
0x116f   : > { %4791 = vmatpush1.bf16.msra.mxu0 %v8933_v36  ;;  %5369 = vmatpush1.bf16.msra.mxu1 %v8933_v36 }
0x1170   : > { %5025 = vmatprep.subr.bf16.mxu0 %v7499_v35  ;;  %v7572_v35 = vld [vmem:[#allocation19 + $0x190] ss:$8 sps:$4 sm:$0xff]  }
0x1172   : > { %6627 = vmatmul.mubr.msk.bf16.vlgmr.msra.gmra.mrb[84].mxu0 %vm4205_vm12, %v4780_v37  ;;  %6697 = vmatmul.mubr.msk.bf16.vlgmr.msra.gmra.mrb[48].mxu1 %vm4205_vm12, %v6695_v8  ;;  %v7575_v37 = vld [vmem:[#allocation19 + $0x1a0] ss:$8 sps:$4 sm:$0xff]   ;;  %v7610_v8 = vld [vmem:[#allocation19 + $0x254] ss:$8 sps:$4 sm:$0xff]  }
0x1173   : > { %5026 = vmatpush1.bf16.msra.mxu0 %v7497_v38  ;;  %5693 = vmatprep.mubr.bf16.mxu1 %v8118_v11  ;;  %v7580_v38 = vld [vmem:[#allocation19 + $0x1b4] ss:$8 sps:$4 sm:$0xff]  }
0x1174   : > { %5027 = vmatprep.subr.bf16.mxu0 %v7502_v39  ;;  %v7578_v39 = vld [vmem:[#allocation19 + $0x1b0] ss:$8 sps:$4 sm:$0xff]  }
0x1177   : > { %5028 = vmatpush1.bf16.msra.mxu0 %v7500_v40  ;;  %v7583_v40 = vld [vmem:[#allocation19 + $0x1c4] ss:$8 sps:$4 sm:$0xff]  }
0x1178   : > { %5029 = vmatprep.subr.bf16.mxu0 %v7505_v42  ;;  %v7581_v42 = vld [vmem:[#allocation19 + $0x1c0] ss:$8 sps:$4 sm:$0xff]  }
0x117b   : > { %5030 = vmatpush1.bf16.msra.mxu0 %v7503_v44  ;;  %v7586_v44 = vld [vmem:[#allocation19 + $0x1d4] ss:$8 sps:$4 sm:$0xff]  }
0x117c   : > { %5031 = vmatprep.subr.bf16.mxu0 %v7508_v45  ;;  %v7584_v45 = vld [vmem:[#allocation19 + $0x1d0] ss:$8 sps:$4 sm:$0xff]  }
0x117f   : > { %5032 = vmatpush1.bf16.msra.mxu0 %v7506_v46  ;;  %v7589_v46 = vld [vmem:[#allocation19 + $0x1e4] ss:$8 sps:$4 sm:$0xff]  }
0x1180   : > { %5033 = vmatprep.subr.bf16.mxu0 %v7511_v47  ;;  %v7587_v47 = vld [vmem:[#allocation19 + $0x1e0] ss:$8 sps:$4 sm:$0xff]  }
0x1183   : > { %5034 = vmatpush1.bf16.msra.mxu0 %v7509_v48  ;;  %v7592_v48 = vld [vmem:[#allocation19 + $0x1f4] ss:$8 sps:$4 sm:$0xff]  }
0x1184   : > { %5035 = vmatprep.subr.bf16.mxu0 %v7514_v49  ;;  %v7590_v49 = vld [vmem:[#allocation19 + $0x1f0] ss:$8 sps:$4 sm:$0xff]  }
0x1187   : > { %5036 = vmatpush1.bf16.msra.mxu0 %v7512_v50  ;;  %v7595_v50 = vld [vmem:[#allocation19 + $0x204] ss:$8 sps:$4 sm:$0xff]  }
0x1188   : > { %5037 = vmatprep.subr.bf16.mxu0 %v7517_v51 }
0x118b   : > { %5038 = vmatpush1.bf16.msra.mxu0 %v7515_v52 }
0x118c   : > { %5039 = vmatprep.subr.bf16.mxu0 %v7520_v53 }
0x118f   : > { %5040 = vmatpush1.bf16.msra.mxu0 %v7518_v54 }
0x1190   : > { %5041 = vmatprep.subr.bf16.mxu0 %v7523_v55 }
0x1193   : > { %5042 = vmatpush1.bf16.msra.mxu0 %v7521_v56 }
0x1194   : > { %5043 = vmatprep.subr.bf16.mxu0 %v7526_v57 }
0x1197   : > { %5044 = vmatpush1.bf16.msra.mxu0 %v7524_v58 }
0x1198   : > { %5045 = vmatprep.subr.bf16.mxu0 %v7529_v59  ;;  %v7593_v59 = vld [vmem:[#allocation19 + $0x200] ss:$8 sps:$4 sm:$0xff]  }
0x119b   : > { %5046 = vmatpush1.bf16.msra.mxu0 %v7527_v60 }
0x119c   : > { %5047 = vmatprep.subr.bf16.mxu0 %v7532_v61 }
0x119f   : > { %5048 = vmatpush1.bf16.msra.mxu0 %v7530_v62 }
0x11a0   : > { %5049 = vmatprep.subr.bf16.mxu0 %v7535_v63  ;;  %v7598_v63 = vld [vmem:[#allocation19 + $0x214] ss:$8 sps:$4 sm:$0xff]  }
0x11a3   : > { %5050 = vmatpush1.bf16.msra.mxu0 %v7533_v1  ;;  %v7596_v1 = vld [vmem:[#allocation19 + $0x210] ss:$8 sps:$4 sm:$0xff]  }
0x11a4   : > { %5051 = vmatprep.subr.bf16.mxu0 %v7538_v2  ;;  %v7601_v2 = vld [vmem:[#allocation19 + $0x224] ss:$8 sps:$4 sm:$0xff]  }
0x11a7   : > { %5052 = vmatpush1.bf16.msra.mxu0 %v7536_v3  ;;  %v7599_v3 = vld [vmem:[#allocation19 + $0x220] ss:$8 sps:$4 sm:$0xff]  }
0x11a8   : > { %5053 = vmatprep.subr.bf16.mxu0 %v7541_v4  ;;  %v7604_v4 = vld [vmem:[#allocation19 + $0x234] ss:$8 sps:$4 sm:$0xff]  }
0x11ab   : > { %5054 = vmatpush1.bf16.msra.mxu0 %v7539_v5  ;;  %v7602_v5 = vld [vmem:[#allocation19 + $0x230] ss:$8 sps:$4 sm:$0xff]  }
0x11ac   : > { %5055 = vmatprep.subr.bf16.mxu0 %v7544_v6  ;;  %v7607_v6 = vld [vmem:[#allocation19 + $0x244] ss:$8 sps:$4 sm:$0xff]  }
0x11af   : > { %5056 = vmatpush1.bf16.msra.mxu0 %v7542_v7  ;;  %v7605_v7 = vld [vmem:[#allocation19 + $0x240] ss:$8 sps:$4 sm:$0xff]  }
0x11b0   : > { %6661 = vmatprep.subr.msk.bf16.mxu0 %vm1092_vm2, %v8930_v34  ;;  %v7574_v34 = vld [vmem:[#allocation19 + $0x194] ss:$8 sps:$4 sm:$0xff]  }
0x1245   : > { %v4824_v9 = vpop.f32.mrb[84].mxu0  ;;  %v8958_v51 = vpop.f32.mrb[48].mxu1 }
0x1246   : > { %v4826_v10 = vpop.f32.mrb[85].mxu0  ;;  %v4831_v14 = vpack.c.bf16 %v4824_v9, %v4824_v9  ;;  %v5404_v52 = vpop.f32.mrb[49].mxu1  ;;  %v7608_v9 = vld [vmem:[#allocation19 + $0x250] ss:$8 sps:$4 sm:$0xff]  }
0x1247   : > { %v4832_v12 = vpack.c.bf16 %v4826_v10, %v4826_v10  ;;  %v4828_v13 = vpop.f32.mrb[86].mxu0  ;;  %v5406_v53 = vpop.f32.mrb[50].mxu1  ;;  %v5410_v60 = vpack.c.bf16 %v5404_v52, %v5404_v52  ;;  %v7613_v10 = vld [vmem:[#allocation19 + $0x264] ss:$8 sps:$4 sm:$0xff]   ;;  %v7646_v52 = vld [vmem:[#allocation21 + $0x10] sm:$0xff]  }
0x1248   : > { %v4829_v15 = vpop.f32.mrb[87].mxu0  ;;  %v5407_v54 = vpop.f32.mrb[51].mxu1  ;;  %v7616_v13 = vld [vmem:[#allocation19 + $0x274] ss:$8 sps:$4 sm:$0xff]  }
0x1249   : > { %5057 = vmatprep.mubr.bf16.mxu0 %v4832_v12  ;;  %v7611_v12 = vld [vmem:[#allocation19 + $0x260] ss:$8 sps:$4 sm:$0xff]   ;;  %v7619_v15 = vld [vmem:[#allocation19 + $0x284] ss:$8 sps:$4 sm:$0xff]   ;;  %v7647_v53 = vld [vmem:[#allocation21 + $0x58] sm:$0xff]  }
0x124a   : > { %5058 = vmatmul.mubr.bf16.vlgmr.msra.gmra.mrb[88].mxu0 %v4831_v14  ;;  %v7614_v14 = vld [vmem:[#allocation19 + $0x270] ss:$8 sps:$4 sm:$0xff]  }
0x124b   : > { %5085 = vmatpush1.bf16.msra.mxu0 %v8933_v36  ;;  %5116 = vmatprep.mubr.bf16.mxu0 %v8118_v11  ;;  %v7577_v36 = vld [vmem:[#allocation19 + $0x1a4] ss:$8 sps:$4 sm:$0xff]   ;;  %v7648_v54 = vld [vmem:[#allocation21 + $0x18] sm:$0xff]  }
0x124c   : > { %5320 = vmatprep.subr.bf16.mxu0 %v7547_v16  ;;  %v7617_v16 = vld [vmem:[#allocation19 + $0x280] ss:$8 sps:$4 sm:$0xff]  }
0x1252   : > { %6662 = vmatmul.mubr.msk.bf16.vlgmr.msra.gmra.mrb[92].mxu0 %vm4205_vm12, %v6660_v17  ;;  %v7622_v17 = vld [vmem:[#allocation19 + $0x294] ss:$8 sps:$4 sm:$0xff]  }
0x1253   : > { %5321 = vmatpush1.bf16.msra.mxu0 %v7545_v18  ;;  %v7620_v18 = vld [vmem:[#allocation19 + $0x290] ss:$8 sps:$4 sm:$0xff]  }
0x1254   : > { %5322 = vmatprep.subr.bf16.mxu0 %v7550_v19  ;;  %v7625_v19 = vld [vmem:[#allocation19 + $0x2a4] ss:$8 sps:$4 sm:$0xff]  }
0x1257   : > { %5323 = vmatpush1.bf16.msra.mxu0 %v7548_v20  ;;  %v7623_v20 = vld [vmem:[#allocation19 + $0x2a0] ss:$8 sps:$4 sm:$0xff]  }
0x1258   : > { %5324 = vmatprep.subr.bf16.mxu0 %v7553_v21  ;;  %v7628_v21 = vld [vmem:[#allocation19 + $0x2b4] ss:$8 sps:$4 sm:$0xff]  }
0x125b   : > { %5325 = vmatpush1.bf16.msra.mxu0 %v7551_v22  ;;  %v7626_v22 = vld [vmem:[#allocation19 + $0x2b0] ss:$8 sps:$4 sm:$0xff]  }
0x125c   : > { %5326 = vmatprep.subr.bf16.mxu0 %v7556_v23  ;;  %v7631_v23 = vld [vmem:[#allocation19 + $0x2c4] ss:$8 sps:$4 sm:$0xff]  }
0x125f   : > { %5327 = vmatpush1.bf16.msra.mxu0 %v7554_v24  ;;  %v7629_v24 = vld [vmem:[#allocation19 + $0x2c0] ss:$8 sps:$4 sm:$0xff]  }
0x1260   : > { %5328 = vmatprep.subr.bf16.mxu0 %v7559_v25  ;;  %v7634_v25 = vld [vmem:[#allocation19 + $0x2d4] ss:$8 sps:$4 sm:$0xff]  }
0x1263   : > { %5329 = vmatpush1.bf16.msra.mxu0 %v7557_v26  ;;  %v7632_v26 = vld [vmem:[#allocation19 + $0x2d0] ss:$8 sps:$4 sm:$0xff]  }
0x1264   : > { %5330 = vmatprep.subr.bf16.mxu0 %v7562_v27  ;;  %v7637_v27 = vld [vmem:[#allocation19 + $0x2e4] ss:$8 sps:$4 sm:$0xff]  }
0x1267   : > { %5331 = vmatpush1.bf16.msra.mxu0 %v7560_v0  ;;  %v7635_v0 = vld [vmem:[#allocation19 + $0x2e0] ss:$8 sps:$4 sm:$0xff]  }
0x1268   : > { %5332 = vmatprep.subr.bf16.mxu0 %v7565_v28  ;;  %v7640_v28 = vld [vmem:[#allocation19 + $0x2f4] ss:$8 sps:$4 sm:$0xff]  }
0x126b   : > { %5333 = vmatpush1.bf16.msra.mxu0 %v7563_v29  ;;  %v7638_v29 = vld [vmem:[#allocation19 + $0x2f0] ss:$8 sps:$4 sm:$0xff]  }
0x126c   : > { %5334 = vmatprep.subr.bf16.mxu0 %v7568_v30  ;;  %v5409_v30 = vpack.c.bf16 %v8958_v51, %v8958_v51  ;;  %v7645_v51 = vld [vmem:[#allocation21 + $0x50] sm:$0xff]  }
0x126f   : > { %5335 = vmatpush1.bf16.msra.mxu0 %v7566_v31  ;;  %v4779_v31 = vld [vmem:[%s9126_s9] sm:$0x3] }
0x1270   : > { %5336 = vmatprep.subr.bf16.mxu0 %v7571_v32  ;;  %v5070_v32 = vrot.slane %v4779_v31, %v8691_v41  ;;  %v5651_v41 = vld [vmem:[%s9127_s10] sm:$0x1] }
0x1273   : > { %5337 = vmatpush1.bf16.msra.mxu0 %v7569_v33  ;;  %v5074_v33 = vrot.slane %v4779_v31, %v8693_v43  ;;  %v7641_v43 = vld [vmem:[#allocation21 + $0x40] sm:$0xff]  }
0x1274   : > { %5338 = vmatprep.subr.bf16.mxu0 %v7574_v34 }
0x1277   : > { %5339 = vmatpush1.bf16.msra.mxu0 %v7572_v35 }
0x1278   : > { %5340 = vmatprep.subr.bf16.mxu0 %v7577_v36 }
0x127b   : > { %5341 = vmatpush1.bf16.msra.mxu0 %v7575_v37 }
0x127c   : > { %5342 = vmatprep.subr.bf16.mxu0 %v7580_v38 }
0x127f   : > { %5343 = vmatpush1.bf16.msra.mxu0 %v7578_v39 }
0x1280   : > { %5344 = vmatprep.subr.bf16.mxu0 %v7583_v40 }
0x1283   : > { %5345 = vmatpush1.bf16.msra.mxu0 %v7581_v42 }
0x1284   : > { %5346 = vmatprep.subr.bf16.mxu0 %v7586_v44 }
0x1287   : > { %5347 = vmatpush1.bf16.msra.mxu0 %v7584_v45 }
0x1288   : > { %5348 = vmatprep.subr.bf16.mxu0 %v7589_v46 }
0x128b   : > { %5349 = vmatpush1.bf16.msra.mxu0 %v7587_v47  ;;  %v6732_v47 = vld [vmem:[%s9127_s10 + $0x1] sm:$0x1] }
0x128c   : > { %5350 = vmatprep.subr.bf16.mxu0 %v7592_v48  ;;  %v7642_v48 = vld [vmem:[#allocation21] sm:$0xff]  }
0x128f   : > { %5351 = vmatpush1.bf16.msra.mxu0 %v7590_v49  ;;  %v7643_v49 = vld [vmem:[#allocation21 + $0x48] sm:$0xff]  }
0x1290   : > { %5604 = vmatprep.subr.bf16.mxu0 %v7595_v50  ;;  %v7644_v50 = vld [vmem:[#allocation21 + $0x8] sm:$0xff]  }
0x1325   : > { %v5118_v55 = vpop.f32.mrb[92].mxu0 }
0x1326   : > { %v5120_v56 = vpop.f32.mrb[93].mxu0  ;;  %v5125_v61 = vpack.c.bf16 %v5118_v55, %v5118_v55  ;;  %v7650_v55 = vld [vmem:[#allocation21 + $0x20] sm:$0xff]  }
0x1327   : > { %v5126_v57 = vpack.c.bf16 %v5120_v56, %v5120_v56  ;;  %v5122_v58 = vpop.f32.mrb[94].mxu0  ;;  %v7651_v56 = vld [vmem:[#allocation21 + $0x68] sm:$0xff]  }
0x1328   : > { %v5123_v62 = vpop.f32.mrb[95].mxu0  ;;  %v7653_v58 = vld [vmem:[#allocation21 + $0x70] sm:$0xff]  }
0x1329   : > { %5352 = vmatprep.mubr.bf16.mxu0 %v5126_v57  ;;  %v7652_v57 = vld [vmem:[#allocation21 + $0x28] sm:$0xff]   ;;  %v7657_v62 = vld [vmem:[#allocation21 + $0xc0] sm:$0xff]  }
0x132a   : > { %5353 = vmatmul.mubr.bf16.vlgmr.msra.gmra.mrb[88].mxu0 %v5125_v61  ;;  %v7656_v61 = vld [vmem:[#allocation21 + $0x38] sm:$0xff]  }
0x132b   : > { %5605 = vmatpush1.bf16.msra.mxu0 %v7593_v59  ;;  %5636 = vmatprep.mubr.bf16.mxu0 %v5410_v60  ;;  %v7654_v59 = vld [vmem:[#allocation21 + $0x30] sm:$0xff]   ;;  %v7655_v60 = vld [vmem:[#allocation21 + $0x78] sm:$0xff]  }
0x132c   : > { %5606 = vmatprep.subr.bf16.mxu0 %v7598_v63 }
0x132f   : > { %5607 = vmatpush1.bf16.msra.mxu0 %v7596_v1 }
0x1330   : > { %5608 = vmatprep.subr.bf16.mxu0 %v7601_v2 }
0x1333   : > { %5609 = vmatpush1.bf16.msra.mxu0 %v7599_v3 }
0x1334   : > { %5610 = vmatprep.subr.bf16.mxu0 %v7604_v4 }
0x1337   : > { %5611 = vmatpush1.bf16.msra.mxu0 %v7602_v5 }
0x1338   : > { %5612 = vmatprep.subr.bf16.mxu0 %v7607_v6 }
0x133b   : > { %5613 = vmatpush1.bf16.msra.mxu0 %v7605_v7 }
0x133c   : > { %5614 = vmatprep.subr.bf16.mxu0 %v7610_v8 }
0x133f   : > { %5615 = vmatpush1.bf16.msra.mxu0 %v7608_v9 }
0x1340   : > { %5616 = vmatprep.subr.bf16.mxu0 %v7613_v10 }
0x1343   : > { %5617 = vmatpush1.bf16.msra.mxu0 %v7611_v12  ;;  %v7658_v12 = vld [vmem:[#allocation21 + $0x80] sm:$0xff]  }
0x1344   : > { %5618 = vmatprep.subr.bf16.mxu0 %v7616_v13 }
0x1347   : > { %5619 = vmatpush1.bf16.msra.mxu0 %v7614_v14  ;;  %v7659_v14 = vld [vmem:[#allocation21 + $0xc8] sm:$0xff]  }
0x1348   : > { %5620 = vmatprep.subr.bf16.mxu0 %v7619_v15  ;;  %v7660_v15 = vld [vmem:[#allocation21 + $0x88] sm:$0xff]  }
0x134b   : > { %5621 = vmatpush1.bf16.msra.mxu0 %v7617_v16  ;;  %v7661_v16 = vld [vmem:[#allocation21 + $0xd0] sm:$0xff]  }
0x134c   : > { %5622 = vmatprep.subr.bf16.mxu0 %v7622_v17  ;;  %v7662_v17 = vld [vmem:[#allocation21 + $0x90] sm:$0xff]  }
0x134f   : > { %5623 = vmatpush1.bf16.msra.mxu0 %v7620_v18  ;;  %v7663_v18 = vld [vmem:[#allocation21 + $0xd8] sm:$0xff]  }
0x1350   : > { %5624 = vmatprep.subr.bf16.mxu0 %v7625_v19  ;;  %v7664_v19 = vld [vmem:[#allocation21 + $0x98] sm:$0xff]  }
0x1353   : > { %5625 = vmatpush1.bf16.msra.mxu0 %v7623_v20  ;;  %v7665_v20 = vld [vmem:[#allocation21 + $0xe0] sm:$0xff]  }
0x1354   : > { %5626 = vmatprep.subr.bf16.mxu0 %v7628_v21  ;;  %v7666_v21 = vld [vmem:[#allocation21 + $0xa0] sm:$0xff]  }
0x1357   : > { %5627 = vmatpush1.bf16.msra.mxu0 %v7626_v22  ;;  %v7667_v22 = vld [vmem:[#allocation21 + $0xe8] sm:$0xff]  }
0x1358   : > { %5628 = vmatprep.subr.bf16.mxu0 %v7631_v23  ;;  %v7668_v23 = vld [vmem:[#allocation21 + $0xa8] sm:$0xff]  }
0x135b   : > { %5629 = vmatpush1.bf16.msra.mxu0 %v7629_v24  ;;  %v7669_v24 = vld [vmem:[#allocation21 + $0xf0] sm:$0xff]  }
0x135c   : > { %5630 = vmatprep.subr.bf16.mxu0 %v7634_v25  ;;  %v7670_v25 = vld [vmem:[#allocation21 + $0xb0] sm:$0xff]  }
0x135f   : > { %5631 = vmatpush1.bf16.msra.mxu0 %v7632_v26  ;;  %v7671_v26 = vld [vmem:[#allocation21 + $0xf8] sm:$0xff]  }
0x1360   : > { %5632 = vmatprep.subr.bf16.mxu0 %v7637_v27  ;;  %v7672_v27 = vld [vmem:[#allocation21 + $0xb8] sm:$0xff]  }
0x1363   : > { %5633 = vmatpush1.bf16.msra.mxu0 %v7635_v0 }
0x1364   : > { %5634 = vmatprep.subr.bf16.mxu0 %v7640_v28 }
0x1367   : > { %5635 = vmatpush1.bf16.msra.mxu0 %v7638_v29 }
0x136a   : > { %5637 = vmatmul.mubr.bf16.vlgmr.msra.gmra.mrb[88].mxu0 %v5409_v30 }
0x143d   : > { %v5638_v34 = vpop.f32.mrb[88].mxu0 }
0x143e   : > { %v6924_v35 = vadd.f32 %v5638_v34, %v5070_v32  ;;  %v5640_v36 = vpop.f32.mrb[89].mxu0 }
0x143f   : > { %v6925_v37 = vadd.f32 %v5640_v36, %v5074_v33  ;;  %v5642_v38 = vpop.f32.mrb[90].mxu0 }
0x1440   : > { %v5647_v39 = vmax.f32 %v6924_v35, 0.0  ;;  %v5643_v40 = vpop.f32.mrb[91].mxu0  ;;  %v6094_v38 = vld [vmem:[%s1006_s29] sm:$0x1] }
0x1441   : > { %v5648_v42 = vmax.f32 %v6925_v37, 0.0 }
0x1442   : > { %v5649_v44 = vpack.c.bf16 %v5647_v39, %v5647_v39 }
0x1443   : > { %v5650_v45 = vpack.c.bf16 %v5648_v42, %v5648_v42 }
0x1444   : > { %v5656_v46 = vsel %vm1092_vm2, %v5649_v44, 0 }
0x1445   : > { %6730 = vmatprep.subr.msk.bf16.mxu1 %vm1092_vm2, %v5650_v45 }
0x1446   : > { %5662 = vmatpush1.bf16.msra.mxu1 %v5656_v46 }
0x1447   : > { %6733 = vmatprep.subr.msk.bf16.mxu1 %vm1092_vm2, %v5650_v45 }
0x1449   : > { %6731 = vmatmul.mubr.msk.bf16.vlgmr.msra.gmra.mrb[52].mxu1 %vm4205_vm12, %v5651_v41 }
0x144a   : > { %5708 = vmatpush1.bf16.msra.mxu1 %v5656_v46  ;;  %5739 = vmatprep.mubr.bf16.mxu1 %v8118_v11  ;;  %v7649_v11 = vld [vmem:[#allocation21 + $0x60] sm:$0xff]  }
0x144b   : > { %6794 = vmatprep.subr.bf16.mxu1 %v7641_v43 }
0x1451   : > { %6734 = vmatmul.mubr.msk.bf16.vlgmr.msra.gmra.mrb[56].mxu1 %vm4205_vm12, %v6732_v47 }
0x1452   : > { %6795 = vmatpush3.bf16.msra.mxu1 %v7642_v48 }
0x1453   : > { %6796 = vmatprep.subr.bf16.mxu1 %v7643_v49 }
0x1456   : > { %6797 = vmatpush3.bf16.msra.mxu1 %v7644_v50 }
0x1457   : > { %6798 = vmatprep.subr.bf16.mxu1 %v7645_v51 }
0x145a   : > { %6799 = vmatpush3.bf16.msra.mxu1 %v7646_v52 }
0x145b   : > { %6800 = vmatprep.subr.bf16.mxu1 %v7647_v53 }
0x145e   : > { %6801 = vmatpush3.bf16.msra.mxu1 %v7648_v54 }
0x145f   : > { %6802 = vmatprep.subr.bf16.mxu1 %v7649_v11 }
0x1462   : > { %6803 = vmatpush3.bf16.msra.mxu1 %v7650_v55 }
0x1463   : > { %6804 = vmatprep.subr.bf16.mxu1 %v7651_v56 }
0x1466   : > { %6805 = vmatpush3.bf16.msra.mxu1 %v7652_v57 }
0x1467   : > { %6806 = vmatprep.subr.bf16.mxu1 %v7653_v58 }
0x146a   : > { %6807 = vmatpush3.bf16.msra.mxu1 %v7654_v59 }
0x146b   : > { %6808 = vmatprep.subr.bf16.mxu1 %v7655_v60 }
0x146e   : > { %6809 = vmatpush3.bf16.msra.mxu1 %v7656_v61 }
0x146f   : > { %6816 = vmatprep.subr.bf16.mxu1 %v7657_v62 }
0x151c   : > { %v5695_v63 = vpop.f32.mrb[52].mxu1 }
0x151d   : > { %v5697_v1 = vpop.f32.mrb[53].mxu1 }
0x151e   : > { %v5699_v2 = vpop.f32.mrb[54].mxu1 }
0x151f   : > { %v5700_v3 = vpop.f32.mrb[55].mxu1 }
0x1524   : > { %v5741_v4 = vpop.f32.mrb[56].mxu1 }
0x1525   : > { %v5748_v5 = vmax.f32 %v5695_v63, %v5741_v4  ;;  %v5743_v6 = vpop.f32.mrb[57].mxu1 }
0x1526   : > { %v5749_v7 = vmax.f32 %v5697_v1, %v5743_v6  ;;  %v5745_v8 = vpop.f32.mrb[58].mxu1 }
0x1527   : > { %v5746_v9 = vpop.f32.mrb[59].mxu1  ;;  %v5750_v13 = vpack.c.bf16 %v5748_v5, %v5748_v5 }
0x1528   : > { %v5751_v10 = vpack.c.bf16 %v5749_v7, %v5749_v7 }
0x152a   : > { %5912 = vmatprep.mubr.bf16.mxu1 %v5751_v10 }
0x152b   : > { %5913 = vmatmul.mubr.bf16.vlgmr.msra.gmra.mrb[60].mxu1 %v5750_v13 }
0x152c   : > { %6817 = vmatpush3.bf16.msra.mxu1 %v7658_v12  ;;  %6081 = vmatprep.mubr.bf16.mxu1 %v5751_v10 }
0x152d   : > { %6818 = vmatprep.subr.bf16.mxu1 %v7659_v14 }
0x1530   : > { %6819 = vmatpush3.bf16.msra.mxu1 %v7660_v15 }
0x1531   : > { %6820 = vmatprep.subr.bf16.mxu1 %v7661_v16 }
0x1534   : > { %6821 = vmatpush3.bf16.msra.mxu1 %v7662_v17 }
0x1535   : > { %6822 = vmatprep.subr.bf16.mxu1 %v7663_v18 }
0x1538   : > { %6823 = vmatpush3.bf16.msra.mxu1 %v7664_v19 }
0x1539   : > { %6824 = vmatprep.subr.bf16.mxu1 %v7665_v20 }
0x153c   : > { %6825 = vmatpush3.bf16.msra.mxu1 %v7666_v21 }
0x153d   : > { %6826 = vmatprep.subr.bf16.mxu1 %v7667_v22 }
0x1540   : > { %6827 = vmatpush3.bf16.msra.mxu1 %v7668_v23 }
0x1541   : > { %6828 = vmatprep.subr.bf16.mxu1 %v7669_v24 }
0x1544   : > { %6829 = vmatpush3.bf16.msra.mxu1 %v7670_v25 }
0x1545   : > { %6830 = vmatprep.subr.bf16.mxu1 %v7671_v26 }
0x1548   : > { %6831 = vmatpush3.bf16.msra.mxu1 %v7672_v27 }
0x154b   : > { %6082 = vmatmul.mubr.bf16.vlgmr.msra.gmra.mrb[64].mxu1 %v5750_v13 }
0x15fe   : > { %v6810_v0 = vpop.f32.mrb[60].mxu1 }
0x15ff   : > { %v6811_v28 = vpop.f32.mrb[61].mxu1 }
0x1600   : > { %v6812_v29 = vadd.f32 %v6811_v28, %v6810_v0  ;;  %v6813_v30 = vpop.f32.mrb[62].mxu1 }
0x1601   : > { %v6814_v31 = vpop.f32.mrb[63].mxu1 }
0x161e   : > { %v6832_v32 = vpop.f32.mrb[64].mxu1 }
0x161f   : > { %v6833_v33 = vpop.f32.mrb[65].mxu1 }
0x1620   : > { %v6834_v34 = vadd.f32 %v6833_v33, %v6832_v32  ;;  %v6835_v35 = vpop.f32.mrb[66].mxu1 }
0x1621   : > { %v6836_v36 = vpop.f32.mrb[67].mxu1 }
0x1622   : > { %v6089_v37 = vmax.f32 %v6812_v29, %v6834_v34 }
0x1624   : > { %v6090_v39 = vpack.c.bf16 %v6089_v37, %v6089_v37 }
0x1626   : > { %v6095_v40 = vsel %vm6093_vm14, %v6090_v39, %v6094_v38 }
0x1627   : > { %6096 = vst [vmem:[%s1006_s29] sm:$0x1] %v6095_v40 }
0x1628 PF: > { %p43_p6 = scmp.ge.s32.totalorder %s8570_s1, 6   ;;  %s9129_s7 = smov %s8089_s4 }
0x1629   : > { %s9130_s4 = smov %s8093_s8  ;;  %s9131_s8 = smov %s8582_s16 }
0x162a   : > { %s9132_s30 = smov %s8570_s1  ;;  %45 = sbr.rel (!%p43_p6) target bundleno = 35 (0x23), region = 248 }
0x1631   :  { %6114 = vsyncpa [#allocation3], 1 }
0x1632   :  { %6116 = vsyncpa [#allocation3 + $0x1], 1 }
0x1633   :  { %6117 = vsyncpa [#allocation5], 1 }
0x1634   :  { %6118 = vsyncpa [#allocation8], 1 }
0x1635   :  { %6119 = vsyncpa [#allocation11], 1 }
0x1636   :  { %6120 = vsyncpa [#allocation14], 1 }
0x1637   :  { %6121 = vsyncpa [#allocation17], 1 }
0x1638   :  { %6122 = vsyncpa [#allocation20], 1 }

</bundles_post_ra>
